<compile_context>
chip_gen: v7x
topology: tpu7x:2x2x1
jax: 0.10.0
libtpu: 0.0.40
codegen_flags: <defaults>
</compile_context>

<pallas_src>
import jax
import jax.numpy as jnp
from jax.experimental import pallas as pl
from jax.experimental.pallas import tpu as pltpu


# Matmul operand dtype. float32 keeps exact parity with the f32 reference.
# On v6e/v7x this can be switched to jnp.bfloat16 (~3x MXU throughput, f32
# accumulation kept via preferred_element_type) -- loosen tolerances if so.
MATMUL_DTYPE = jnp.float32


def _round_up(x, m):
    return ((x + m - 1) // m) * m


def _choose_t_block(T, max_blk=16):
    """Largest divisor of T that is <= max_blk (timesteps per grid step)."""
    for cand in range(min(T, max_blk), 0, -1):
        if T % cand == 0:
            return cand
    return 1


# ----------------------------------------------------------------------------
# Pallas kernel: fused BiLSTM recurrence + MLP head
# ----------------------------------------------------------------------------
def _bilstm_mlp_kernel(xf_ref, xb_ref,
                       wih_f_ref, whh_f_ref, b_f_ref,
                       wih_b_ref, whh_b_ref, b_b_ref,
                       w1f_ref, w1b_ref, b1_ref, w2_ref, b2_ref,
                       out_ref,
                       hf, cf, hb, cb):
    """One grid step == one block of T_blk timesteps.

    xf_ref / xb_ref: (T_blk * B, E) flattened time-major embedded blocks; the
    backward direction's BlockSpec reads blocks from the end of the sequence
    and the inner loop walks each block in reverse.  h/c states live in VMEM
    scratch and persist across grid iterations.
    """
    tb = pl.program_id(0)
    n_tb = pl.num_programs(0)
    Bq, Hq = hf.shape
    T_blk = xf_ref.shape[0] // Bq

    @pl.when(tb == 0)
    def _init():
        hf[...] = jnp.zeros_like(hf)
        cf[...] = jnp.zeros_like(cf)
        hb[...] = jnp.zeros_like(hb)
        cb[...] = jnp.zeros_like(cb)

    # ---- hoisted input projections (off the serial chain): one big matmul/dir
    def in_proj(x_ref, wih_ref, b_ref):
        g = jnp.dot(x_ref[...].astype(MATMUL_DTYPE),
                    wih_ref[...].astype(MATMUL_DTYPE),
                    preferred_element_type=jnp.float32)
        return g + b_ref[...]                       # (T_blk*B, 4H)

    gin_f = in_proj(xf_ref, wih_f_ref, b_f_ref)
    gin_b = in_proj(xb_ref, wih_b_ref, b_b_ref)

    whh_f = whh_f_ref[...].astype(MATMUL_DTYPE)
    whh_b = whh_b_ref[...].astype(MATMUL_DTYPE)

    def sigmoid(x):
        # sigmoid(x) == 0.5 * tanh(0.5 x) + 0.5 : one EUP push instead of exp+div
        return 0.5 * jnp.tanh(0.5 * x) + 0.5

    def cell(gin_t, h, c, whh):
        # Only this h @ W_hh (+ add + nonlinearities) is on the serial path.
        gates = gin_t + jnp.dot(h.astype(MATMUL_DTYPE), whh,
                                preferred_element_type=jnp.float32)
        i = sigmoid(gates[:, 0 * Hq:1 * Hq])        # 128-lane-aligned slices
        f = sigmoid(gates[:, 1 * Hq:2 * Hq])
        g = jnp.tanh(gates[:, 2 * Hq:3 * Hq])
        o = sigmoid(gates[:, 3 * Hq:4 * Hq])
        c_new = f * c + i * g
        h_new = o * jnp.tanh(c_new)
        return h_new, c_new

    h_f, c_f = hf[...], cf[...]
    h_b, c_b = hb[...], cb[...]
    for s in range(T_blk):                          # static unroll of the recurrence
        h_f, c_f = cell(gin_f[s * Bq:(s + 1) * Bq], h_f, c_f, whh_f)
        r = T_blk - 1 - s                           # backward walks the block in reverse
        h_b, c_b = cell(gin_b[r * Bq:(r + 1) * Bq], h_b, c_b, whh_b)
    hf[...], cf[...] = h_f, c_f
    hb[...], cb[...] = h_b, c_b

    @pl.when(tb == n_tb - 1)
    def _finalize():
        # torch.cat((h_fwd, h_bwd), 1) @ W1 == h_fwd @ W1[:H] + h_bwd @ W1[H:]
        # dropout (eval) == identity
        z = (jnp.dot(h_f, w1f_ref[...], preferred_element_type=jnp.float32)
             + jnp.dot(h_b, w1b_ref[...], preferred_element_type=jnp.float32)
             + b1_ref[...])
        z = jnp.maximum(z, 0.0)
        out_ref[...] = (jnp.dot(z, w2_ref[...], preferred_element_type=jnp.float32)
                        + b2_ref[...])


# ----------------------------------------------------------------------------
# Padding helpers (exact zero-padding to (8, 128) aligned shapes)
# ----------------------------------------------------------------------------
def _pad_gate_cols(w, H, Hp):
    """(..., 4H) -> (..., 4Hp): each of the 4 gate blocks zero-padded to width Hp."""
    pad_width = [(0, 0)] * (w.ndim - 1) + [(0, Hp - H)]
    blocks = [jnp.pad(w[..., k * H:(k + 1) * H], pad_width) for k in range(4)]
    return jnp.concatenate(blocks, axis=-1)


def _pad_lstm_dir(wih, whh, b, E, H, Ep, Hp):
    wih_p = _pad_gate_cols(jnp.pad(wih, ((0, Ep - E), (0, 0))), H, Hp)  # (Ep, 4Hp)
    whh_p = _pad_gate_cols(jnp.pad(whh, ((0, Hp - H), (0, 0))), H, Hp)  # (Hp, 4Hp)
    b_p = _pad_gate_cols(b, H, Hp)                                      # (1, 4Hp)
    return wih_p, whh_p, b_p


# ----------------------------------------------------------------------------
# Wrapper
# ----------------------------------------------------------------------------
def fake_review_classifier_forward(tokens, params, t_block=16):
    """tokens: (B, T) int32 token ids -> logits (B, O)."""
    B, T = tokens.shape
    E = params["embedding"].shape[1]
    H = params["whh_f"].shape[0]
    N1 = params["w1"].shape[1]
    O = params["w2"].shape[1]

    # lane / sublane alignment padding (sliced back at the end; exact).
    Bp = _round_up(B, 8)
    Ep = _round_up(E, 128)
    Hp = _round_up(H, 128)
    N1p = _round_up(N1, 128)
    Op = _round_up(O, 128)

    T_blk = _choose_t_block(T, t_block)
    n_tb = T // T_blk

    # Embedding lookup (gather) is glue -> plain JAX, done time-major directly.
    tok_tm = jnp.pad(jnp.transpose(tokens), ((0, 0), (0, Bp - B)))   # (T, Bp), pad -> id 0
    emb = jnp.pad(params["embedding"], ((0, 0), (0, Ep - E)))        # (V, Ep)
    x_flat = emb[tok_tm].reshape(T * Bp, Ep)                         # (T*Bp, Ep) time-major

    # Padded LSTM / MLP weights.
    wih_f, whh_f, b_f = _pad_lstm_dir(params["wih_f"], params["whh_f"], params["b_f"],
                                      E, H, Ep, Hp)
    wih_b, whh_b, b_b = _pad_lstm_dir(params["wih_b"], params["whh_b"], params["b_b"],
                                      E, H, Ep, Hp)
    w1 = params["w1"]
    w1f = jnp.pad(w1[:H], ((0, Hp - H), (0, N1p - N1)))              # (Hp, N1p)
    w1b = jnp.pad(w1[H:], ((0, Hp - H), (0, N1p - N1)))              # (Hp, N1p)
    b1 = jnp.pad(params["b1"], ((0, 0), (0, N1p - N1)))              # (1, N1p)
    w2 = jnp.pad(params["w2"], ((0, N1p - N1), (0, Op - O)))         # (N1p, Op)
    b2 = jnp.pad(params["b2"], ((0, 0), (0, Op - O)))                # (1, Op)

    def fwd_map(t):
        return (t, 0)

    def bwd_map(t):
        # backward direction consumes time blocks from the end of the sequence
        return (n_tb - 1 - t, 0)

    def w_spec(shape):
        # Constant-index (resident) weight blocks.
        # TODO(synk): on v7x, pipeline_mode=pl.Buffered(1) here would halve
        # resident weight VMEM (64 MiB budget); left at default for portability.
        return pl.BlockSpec(shape, lambda t: (0, 0))

    in_specs = [
        pl.BlockSpec((T_blk * Bp, Ep), fwd_map),
        pl.BlockSpec((T_blk * Bp, Ep), bwd_map),
        w_spec((Ep, 4 * Hp)), w_spec((Hp, 4 * Hp)), w_spec((1, 4 * Hp)),
        w_spec((Ep, 4 * Hp)), w_spec((Hp, 4 * Hp)), w_spec((1, 4 * Hp)),
        w_spec((Hp, N1p)), w_spec((Hp, N1p)), w_spec((1, N1p)),
        w_spec((N1p, Op)), w_spec((1, Op)),
    ]
    out_specs = pl.BlockSpec((Bp, Op), lambda t: (0, 0))

    logits_p = pl.pallas_call(
        _bilstm_mlp_kernel,
        out_shape=jax.ShapeDtypeStruct((Bp, Op), jnp.float32),
        grid_spec=pltpu.PrefetchScalarGridSpec(
            num_scalar_prefetch=0,
            grid=(n_tb,),
            in_specs=in_specs,
            out_specs=out_specs,
            scratch_shapes=[pltpu.VMEM((Bp, Hp), jnp.float32)] * 4,
        ),
        compiler_params=pltpu.CompilerParams(
            dimension_semantics=("arbitrary",),       # recurrence -> sequential
            vmem_limit_bytes=48 * 1024 * 1024,        # raise scoped VMEM (safe on v5e/v6e/v7x)
        ),
    )(x_flat, x_flat,
      wih_f, whh_f, b_f, wih_b, whh_b, b_b,
      w1f, w1b, b1, w2, b2)

    return logits_p[:B, :O]


# ----------------------------------------------------------------------------
# Pure-JAX reference (for correctness check)
# ----------------------------------------------------------------------------
def _ref_lstm_dir(x_tbe, wih, whh, b, H):
    B = x_tbe.shape[1]

    def step(carry, x):
        h, c = carry
        gates = x @ wih + h @ whh + b
        i = jax.nn.sigmoid(gates[:, 0 * H:1 * H])
        f = jax.nn.sigmoid(gates[:, 1 * H:2 * H])
        g = jnp.tanh(gates[:, 2 * H:3 * H])
        o = jax.nn.sigmoid(gates[:, 3 * H:4 * H])
        c = f * c + i * g
        h = o * jnp.tanh(c)
        return (h, c), None

    (h, _), _ = jax.lax.scan(
        step, (jnp.zeros((B, H), jnp.float32), jnp.zeros((B, H), jnp.float32)), x_tbe)
    return h


def reference_forward(tokens, params):
    H = params["whh_f"].shape[0]
    x = params["embedding"][tokens]
    x_tbe = jnp.transpose(x, (1, 0, 2))
    h_f = _ref_lstm_dir(x_tbe, params["wih_f"], params["whh_f"], params["b_f"], H)
    h_b = _ref_lstm_dir(x_tbe[::-1], params["wih_b"], params["whh_b"], params["b_b"], H)
    h = jnp.concatenate([h_f, h_b], axis=1)
    z = jnp.maximum(h @ params["w1"] + params["b1"], 0.0)
    return z @ params["w2"] + params["b2"]


# ----------------------------------------------------------------------------
# Deterministic parameter init (shapes implied by the module __init__)
# ----------------------------------------------------------------------------
def init_params(key, vocab_size, embed_size, hidden_size, output_size):
    ks = jax.random.split(key, 12)
    H, E, O = hidden_size, embed_size, output_size

    def unif(k, shape, scale):
        return jax.random.uniform(k, shape, jnp.float32, -scale, scale)

    s_lstm = 1.0 / jnp.sqrt(H)
    params = {
        # nn.Embedding.from_pretrained(...) -- synthetic deterministic matrix
        "embedding": jax.random.normal(ks[0], (vocab_size, E), jnp.float32) * 0.1,
        # LSTM weights stored pre-transposed: (in, 4H) / (H, 4H), gate order i,f,g,o
        "wih_f": unif(ks[1], (E, 4 * H), s_lstm),
        "whh_f": unif(ks[2], (H, 4 * H), s_lstm),
        "b_f": unif(ks[3], (1, 4 * H), s_lstm) + unif(ks[4], (1, 4 * H), s_lstm),
        "wih_b": unif(ks[5], (E, 4 * H), s_lstm),
        "whh_b": unif(ks[6], (H, 4 * H), s_lstm),
        "b_b": unif(ks[7], (1, 4 * H), s_lstm) + unif(ks[8], (1, 4 * H), s_lstm),
        # fc1: Linear(2H, 64), fc2: Linear(64, O) -- stored (in, out)
        "w1": unif(ks[9], (2 * H, 64), 1.0 / jnp.sqrt(2 * H)),
        "b1": jnp.zeros((1, 64), jnp.float32),
        "w2": unif(ks[10], (64, O), 1.0 / jnp.sqrt(64)),
        "b2": jnp.zeros((1, O), jnp.float32),
    }
    # padding_idx=0 -> zero row, as in nn.Embedding(padding_idx=0)
    params["embedding"] = params["embedding"].at[0].set(0.0)
    return params


# ----------------------------------------------------------------------------
if __name__ == "__main__":
    # Small shapes consistent with the module's forward
    VOCAB, EMBED, HIDDEN, OUTPUT = 16, 32, 32, 2
    BATCH, SEQ = 2, 8

    key = jax.random.PRNGKey(0)
    k_tok, k_par = jax.random.split(key)
    params = init_params(k_par, VOCAB, EMBED, HIDDEN, OUTPUT)
    tokens = jax.random.randint(k_tok, (BATCH, SEQ), 0, VOCAB, dtype=jnp.int32)

    logits = jax.block_until_ready(fake_review_classifier_forward(tokens, params))
    ref = jax.block_until_ready(reference_forward(tokens, params))

    assert logits.shape == (BATCH, OUTPUT), logits.shape
    assert jnp.allclose(logits, ref, atol=2e-4, rtol=2e-4), (logits, ref)
    print("KERNEL_OK")
</pallas_src>

<mosaic_0001>
module attributes {stable_mosaic.version = 11 : i64} {
  func.func @_bilstm_mlp_kernel(%arg0: i32, %arg1: memref<64x128xf32, #tpu.memory_space<vmem>>, %arg2: memref<64x128xf32, #tpu.memory_space<vmem>>, %arg3: memref<128x512xf32, #tpu.memory_space<vmem>>, %arg4: memref<128x512xf32, #tpu.memory_space<vmem>>, %arg5: memref<1x512xf32, #tpu.memory_space<vmem>>, %arg6: memref<128x512xf32, #tpu.memory_space<vmem>>, %arg7: memref<128x512xf32, #tpu.memory_space<vmem>>, %arg8: memref<1x512xf32, #tpu.memory_space<vmem>>, %arg9: memref<128x128xf32, #tpu.memory_space<vmem>>, %arg10: memref<128x128xf32, #tpu.memory_space<vmem>>, %arg11: memref<1x128xf32, #tpu.memory_space<vmem>>, %arg12: memref<128x128xf32, #tpu.memory_space<vmem>>, %arg13: memref<1x128xf32, #tpu.memory_space<vmem>>, %arg14: memref<8x128xf32, #tpu.memory_space<vmem>>, %arg15: memref<8x128xf32, #tpu.memory_space<vmem>>, %arg16: memref<8x128xf32, #tpu.memory_space<vmem>>, %arg17: memref<8x128xf32, #tpu.memory_space<vmem>>, %arg18: memref<8x128xf32, #tpu.memory_space<vmem>>) attributes {dimension_semantics = [#tpu.dimension_semantics<arbitrary>], iteration_bounds = array<i64: 1>, scalar_prefetch = 0 : i64, scratch_operands = 4 : i64, tpu.core_type = #tpu.core_type<tc>, window_params = [{transform_indices = @transform_0, window_bounds = array<i64: 64, 128>}, {transform_indices = @transform_1, window_bounds = array<i64: 64, 128>}, {pipeline_mode = #tpu.pipeline_mode<synchronous>, transform_indices = @transform_2, window_bounds = array<i64: 128, 512>}, {pipeline_mode = #tpu.pipeline_mode<synchronous>, transform_indices = @transform_3, window_bounds = array<i64: 128, 512>}, {pipeline_mode = #tpu.pipeline_mode<synchronous>, transform_indices = @transform_4, window_bounds = array<i64: 1, 512>}, {pipeline_mode = #tpu.pipeline_mode<synchronous>, transform_indices = @transform_5, window_bounds = array<i64: 128, 512>}, {pipeline_mode = #tpu.pipeline_mode<synchronous>, transform_indices = @transform_6, window_bounds = array<i64: 128, 512>}, {pipeline_mode = #tpu.pipeline_mode<synchronous>, transform_indices = @transform_7, window_bounds = array<i64: 1, 512>}, {pipeline_mode = #tpu.pipeline_mode<synchronous>, transform_indices = @transform_8, window_bounds = array<i64: 128, 128>}, {pipeline_mode = #tpu.pipeline_mode<synchronous>, transform_indices = @transform_9, window_bounds = array<i64: 128, 128>}, {pipeline_mode = #tpu.pipeline_mode<synchronous>, transform_indices = @transform_10, window_bounds = array<i64: 1, 128>}, {pipeline_mode = #tpu.pipeline_mode<synchronous>, transform_indices = @transform_11, window_bounds = array<i64: 128, 128>}, {pipeline_mode = #tpu.pipeline_mode<synchronous>, transform_indices = @transform_12, window_bounds = array<i64: 1, 128>}, {pipeline_mode = #tpu.pipeline_mode<synchronous>, transform_indices = @transform_13, window_bounds = array<i64: 8, 128>}]} {
    %c0_i32 = arith.constant 0 : i32
    %0 = arith.cmpi eq, %arg0, %c0_i32 : i32
    %1 = arith.extui %0 : i1 to i32
    %c0_i32_0 = arith.constant 0 : i32
    %2 = arith.cmpi ne, %1, %c0_i32_0 : i32
    scf.if %2 {
      %cst_195 = arith.constant 0.000000e+00 : f32
      %572 = vector.broadcast %cst_195 : f32 to vector<8x128xf32>
      %c0_196 = arith.constant 0 : index
      %c0_197 = arith.constant 0 : index
      %573 = vector.load %arg15[%c0_196, %c0_197] : memref<8x128xf32, #tpu.memory_space<vmem>>, vector<8x128xf32>
      tpu.vector_store %arg15[%c0_196, %c0_197], %572 {strides = array<i32>} : memref<8x128xf32, #tpu.memory_space<vmem>>, vector<8x128xf32>,
      %cst_198 = arith.constant 0.000000e+00 : f32
      %574 = vector.broadcast %cst_198 : f32 to vector<8x128xf32>
      %c0_199 = arith.constant 0 : index
      %c0_200 = arith.constant 0 : index
      %575 = vector.load %arg16[%c0_199, %c0_200] : memref<8x128xf32, #tpu.memory_space<vmem>>, vector<8x128xf32>
      tpu.vector_store %arg16[%c0_199, %c0_200], %574 {strides = array<i32>} : memref<8x128xf32, #tpu.memory_space<vmem>>, vector<8x128xf32>,
      %cst_201 = arith.constant 0.000000e+00 : f32
      %576 = vector.broadcast %cst_201 : f32 to vector<8x128xf32>
      %c0_202 = arith.constant 0 : index
      %c0_203 = arith.constant 0 : index
      %577 = vector.load %arg17[%c0_202, %c0_203] : memref<8x128xf32, #tpu.memory_space<vmem>>, vector<8x128xf32>
      tpu.vector_store %arg17[%c0_202, %c0_203], %576 {strides = array<i32>} : memref<8x128xf32, #tpu.memory_space<vmem>>, vector<8x128xf32>,
      %cst_204 = arith.constant 0.000000e+00 : f32
      %578 = vector.broadcast %cst_204 : f32 to vector<8x128xf32>
      %c0_205 = arith.constant 0 : index
      %c0_206 = arith.constant 0 : index
      %579 = vector.load %arg18[%c0_205, %c0_206] : memref<8x128xf32, #tpu.memory_space<vmem>>, vector<8x128xf32>
      tpu.vector_store %arg18[%c0_205, %c0_206], %578 {strides = array<i32>} : memref<8x128xf32, #tpu.memory_space<vmem>>, vector<8x128xf32>,
    } else {
    }
    %c0 = arith.constant 0 : index
    %c0_1 = arith.constant 0 : index
    %3 = vector.load %arg1[%c0, %c0_1] : memref<64x128xf32, #tpu.memory_space<vmem>>, vector<64x128xf32>
    %c0_2 = arith.constant 0 : index
    %c0_3 = arith.constant 0 : index
    %4 = vector.load %arg3[%c0_2, %c0_3] : memref<128x512xf32, #tpu.memory_space<vmem>>, vector<128x512xf32>
    %cst = arith.constant dense<0.000000e+00> : vector<64x512xf32>
    %5 = tpu.matmul %3, %4, %cst {dimension_numbers = #tpu.dot_dimension_numbers<[1], [0], [0], [1], [0, 0, 1, 1], [], []>} : vector<64x128xf32>, vector<128x512xf32>, vector<64x512xf32> -> vector<64x512xf32>
    %c0_4 = arith.constant 0 : index
    %c0_5 = arith.constant 0 : index
    %6 = vector.load %arg5[%c0_4, %c0_5] : memref<1x512xf32, #tpu.memory_space<vmem>>, vector<1x512xf32>
    %7 = vector.broadcast %6 : vector<1x512xf32> to vector<64x512xf32>
    %8 = arith.addf %5, %7 : vector<64x512xf32>
    %c0_6 = arith.constant 0 : index
    %c0_7 = arith.constant 0 : index
    %9 = vector.load %arg2[%c0_6, %c0_7] : memref<64x128xf32, #tpu.memory_space<vmem>>, vector<64x128xf32>
    %c0_8 = arith.constant 0 : index
    %c0_9 = arith.constant 0 : index
    %10 = vector.load %arg6[%c0_8, %c0_9] : memref<128x512xf32, #tpu.memory_space<vmem>>, vector<128x512xf32>
    %cst_10 = arith.constant dense<0.000000e+00> : vector<64x512xf32>
    %11 = tpu.matmul %9, %10, %cst_10 {dimension_numbers = #tpu.dot_dimension_numbers<[1], [0], [0], [1], [0, 0, 1, 1], [], []>} : vector<64x128xf32>, vector<128x512xf32>, vector<64x512xf32> -> vector<64x512xf32>
    %c0_11 = arith.constant 0 : index
    %c0_12 = arith.constant 0 : index
    %12 = vector.load %arg8[%c0_11, %c0_12] : memref<1x512xf32, #tpu.memory_space<vmem>>, vector<1x512xf32>
    %13 = vector.broadcast %12 : vector<1x512xf32> to vector<64x512xf32>
    %14 = arith.addf %11, %13 : vector<64x512xf32>
    %c0_13 = arith.constant 0 : index
    %c0_14 = arith.constant 0 : index
    %15 = vector.load %arg4[%c0_13, %c0_14] : memref<128x512xf32, #tpu.memory_space<vmem>>, vector<128x512xf32>
    %c0_15 = arith.constant 0 : index
    %c0_16 = arith.constant 0 : index
    %16 = vector.load %arg7[%c0_15, %c0_16] : memref<128x512xf32, #tpu.memory_space<vmem>>, vector<128x512xf32>
    %c0_17 = arith.constant 0 : index
    %c0_18 = arith.constant 0 : index
    %17 = vector.load %arg15[%c0_17, %c0_18] : memref<8x128xf32, #tpu.memory_space<vmem>>, vector<8x128xf32>
    %c0_19 = arith.constant 0 : index
    %c0_20 = arith.constant 0 : index
    %18 = vector.load %arg16[%c0_19, %c0_20] : memref<8x128xf32, #tpu.memory_space<vmem>>, vector<8x128xf32>
    %c0_21 = arith.constant 0 : index
    %c0_22 = arith.constant 0 : index
    %19 = vector.load %arg17[%c0_21, %c0_22] : memref<8x128xf32, #tpu.memory_space<vmem>>, vector<8x128xf32>
    %c0_23 = arith.constant 0 : index
    %c0_24 = arith.constant 0 : index
    %20 = vector.load %arg18[%c0_23, %c0_24] : memref<8x128xf32, #tpu.memory_space<vmem>>, vector<8x128xf32>
    %21 = vector.extract_strided_slice %8 {offsets = [0, 0], sizes = [8, 512], strides = [1, 1]} : vector<64x512xf32> to vector<8x512xf32>
    %cst_25 = arith.constant dense<0.000000e+00> : vector<8x512xf32>
    %22 = tpu.matmul %17, %15, %cst_25 {dimension_numbers = #tpu.dot_dimension_numbers<[1], [0], [0], [1], [0, 0, 1, 1], [], []>} : vector<8x128xf32>, vector<128x512xf32>, vector<8x512xf32> -> vector<8x512xf32>
    %23 = arith.addf %21, %22 : vector<8x512xf32>
    %24 = vector.extract_strided_slice %23 {offsets = [0, 0], sizes = [8, 128], strides = [1, 1]} : vector<8x512xf32> to vector<8x128xf32>
    %cst_26 = arith.constant 5.000000e-01 : f32
    %25 = vector.broadcast %cst_26 : f32 to vector<8x128xf32>
    %26 = arith.mulf %25, %24 : vector<8x128xf32>
    %27 = math.tanh %26 : vector<8x128xf32>
    %cst_27 = arith.constant 5.000000e-01 : f32
    %28 = vector.broadcast %cst_27 : f32 to vector<8x128xf32>
    %29 = arith.mulf %28, %27 : vector<8x128xf32>
    %cst_28 = arith.constant 5.000000e-01 : f32
    %30 = vector.broadcast %cst_28 : f32 to vector<8x128xf32>
    %31 = arith.addf %29, %30 : vector<8x128xf32>
    %32 = vector.extract_strided_slice %23 {offsets = [0, 128], sizes = [8, 128], strides = [1, 1]} : vector<8x512xf32> to vector<8x128xf32>
    %cst_29 = arith.constant 5.000000e-01 : f32
    %33 = vector.broadcast %cst_29 : f32 to vector<8x128xf32>
    %34 = arith.mulf %33, %32 : vector<8x128xf32>
    %35 = math.tanh %34 : vector<8x128xf32>
    %cst_30 = arith.constant 5.000000e-01 : f32
    %36 = vector.broadcast %cst_30 : f32 to vector<8x128xf32>
    %37 = arith.mulf %36, %35 : vector<8x128xf32>
    %cst_31 = arith.constant 5.000000e-01 : f32
    %38 = vector.broadcast %cst_31 : f32 to vector<8x128xf32>
    %39 = arith.addf %37, %38 : vector<8x128xf32>
    %40 = vector.extract_strided_slice %23 {offsets = [0, 256], sizes = [8, 128], strides = [1, 1]} : vector<8x512xf32> to vector<8x128xf32>
    %41 = math.tanh %40 : vector<8x128xf32>
    %42 = vector.extract_strided_slice %23 {offsets = [0, 384], sizes = [8, 128], strides = [1, 1]} : vector<8x512xf32> to vector<8x128xf32>
    %cst_32 = arith.constant 5.000000e-01 : f32
    %43 = vector.broadcast %cst_32 : f32 to vector<8x128xf32>
    %44 = arith.mulf %43, %42 : vector<8x128xf32>
    %45 = math.tanh %44 : vector<8x128xf32>
    %cst_33 = arith.constant 5.000000e-01 : f32
    %46 = vector.broadcast %cst_33 : f32 to vector<8x128xf32>
    %47 = arith.mulf %46, %45 : vector<8x128xf32>
    %cst_34 = arith.constant 5.000000e-01 : f32
    %48 = vector.broadcast %cst_34 : f32 to vector<8x128xf32>
    %49 = arith.addf %47, %48 : vector<8x128xf32>
    %50 = arith.mulf %39, %18 : vector<8x128xf32>
    %51 = arith.mulf %31, %41 : vector<8x128xf32>
    %52 = arith.addf %50, %51 : vector<8x128xf32>
    %53 = math.tanh %52 : vector<8x128xf32>
    %54 = arith.mulf %49, %53 : vector<8x128xf32>
    %55 = vector.extract_strided_slice %14 {offsets = [56, 0], sizes = [8, 512], strides = [1, 1]} : vector<64x512xf32> to vector<8x512xf32>
    %cst_35 = arith.constant dense<0.000000e+00> : vector<8x512xf32>
    %56 = tpu.matmul %19, %16, %cst_35 {dimension_numbers = #tpu.dot_dimension_numbers<[1], [0], [0], [1], [0, 0, 1, 1], [], []>} : vector<8x128xf32>, vector<128x512xf32>, vector<8x512xf32> -> vector<8x512xf32>
    %57 = arith.addf %55, %56 : vector<8x512xf32>
    %58 = vector.extract_strided_slice %57 {offsets = [0, 0], sizes = [8, 128], strides = [1, 1]} : vector<8x512xf32> to vector<8x128xf32>
    %cst_36 = arith.constant 5.000000e-01 : f32
    %59 = vector.broadcast %cst_36 : f32 to vector<8x128xf32>
    %60 = arith.mulf %59, %58 : vector<8x128xf32>
    %61 = math.tanh %60 : vector<8x128xf32>
    %cst_37 = arith.constant 5.000000e-01 : f32
    %62 = vector.broadcast %cst_37 : f32 to vector<8x128xf32>
    %63 = arith.mulf %62, %61 : vector<8x128xf32>
    %cst_38 = arith.constant 5.000000e-01 : f32
    %64 = vector.broadcast %cst_38 : f32 to vector<8x128xf32>
    %65 = arith.addf %63, %64 : vector<8x128xf32>
    %66 = vector.extract_strided_slice %57 {offsets = [0, 128], sizes = [8, 128], strides = [1, 1]} : vector<8x512xf32> to vector<8x128xf32>
    %cst_39 = arith.constant 5.000000e-01 : f32
    %67 = vector.broadcast %cst_39 : f32 to vector<8x128xf32>
    %68 = arith.mulf %67, %66 : vector<8x128xf32>
    %69 = math.tanh %68 : vector<8x128xf32>
    %cst_40 = arith.constant 5.000000e-01 : f32
    %70 = vector.broadcast %cst_40 : f32 to vector<8x128xf32>
    %71 = arith.mulf %70, %69 : vector<8x128xf32>
    %cst_41 = arith.constant 5.000000e-01 : f32
    %72 = vector.broadcast %cst_41 : f32 to vector<8x128xf32>
    %73 = arith.addf %71, %72 : vector<8x128xf32>
    %74 = vector.extract_strided_slice %57 {offsets = [0, 256], sizes = [8, 128], strides = [1, 1]} : vector<8x512xf32> to vector<8x128xf32>
    %75 = math.tanh %74 : vector<8x128xf32>
    %76 = vector.extract_strided_slice %57 {offsets = [0, 384], sizes = [8, 128], strides = [1, 1]} : vector<8x512xf32> to vector<8x128xf32>
    %cst_42 = arith.constant 5.000000e-01 : f32
    %77 = vector.broadcast %cst_42 : f32 to vector<8x128xf32>
    %78 = arith.mulf %77, %76 : vector<8x128xf32>
    %79 = math.tanh %78 : vector<8x128xf32>
    %cst_43 = arith.constant 5.000000e-01 : f32
    %80 = vector.broadcast %cst_43 : f32 to vector<8x128xf32>
    %81 = arith.mulf %80, %79 : vector<8x128xf32>
    %cst_44 = arith.constant 5.000000e-01 : f32
    %82 = vector.broadcast %cst_44 : f32 to vector<8x128xf32>
    %83 = arith.addf %81, %82 : vector<8x128xf32>
    %84 = arith.mulf %73, %20 : vector<8x128xf32>
    %85 = arith.mulf %65, %75 : vector<8x128xf32>
    %86 = arith.addf %84, %85 : vector<8x128xf32>
    %87 = math.tanh %86 : vector<8x128xf32>
    %88 = arith.mulf %83, %87 : vector<8x128xf32>
    %89 = vector.extract_strided_slice %8 {offsets = [8, 0], sizes = [8, 512], strides = [1, 1]} : vector<64x512xf32> to vector<8x512xf32>
    %cst_45 = arith.constant dense<0.000000e+00> : vector<8x512xf32>
    %90 = tpu.matmul %54, %15, %cst_45 {dimension_numbers = #tpu.dot_dimension_numbers<[1], [0], [0], [1], [0, 0, 1, 1], [], []>} : vector<8x128xf32>, vector<128x512xf32>, vector<8x512xf32> -> vector<8x512xf32>
    %91 = arith.addf %89, %90 : vector<8x512xf32>
    %92 = vector.extract_strided_slice %91 {offsets = [0, 0], sizes = [8, 128], strides = [1, 1]} : vector<8x512xf32> to vector<8x128xf32>
    %cst_46 = arith.constant 5.000000e-01 : f32
    %93 = vector.broadcast %cst_46 : f32 to vector<8x128xf32>
    %94 = arith.mulf %93, %92 : vector<8x128xf32>
    %95 = math.tanh %94 : vector<8x128xf32>
    %cst_47 = arith.constant 5.000000e-01 : f32
    %96 = vector.broadcast %cst_47 : f32 to vector<8x128xf32>
    %97 = arith.mulf %96, %95 : vector<8x128xf32>
    %cst_48 = arith.constant 5.000000e-01 : f32
    %98 = vector.broadcast %cst_48 : f32 to vector<8x128xf32>
    %99 = arith.addf %97, %98 : vector<8x128xf32>
    %100 = vector.extract_strided_slice %91 {offsets = [0, 128], sizes = [8, 128], strides = [1, 1]} : vector<8x512xf32> to vector<8x128xf32>
    %cst_49 = arith.constant 5.000000e-01 : f32
    %101 = vector.broadcast %cst_49 : f32 to vector<8x128xf32>
    %102 = arith.mulf %101, %100 : vector<8x128xf32>
    %103 = math.tanh %102 : vector<8x128xf32>
    %cst_50 = arith.constant 5.000000e-01 : f32
    %104 = vector.broadcast %cst_50 : f32 to vector<8x128xf32>
    %105 = arith.mulf %104, %103 : vector<8x128xf32>
    %cst_51 = arith.constant 5.000000e-01 : f32
    %106 = vector.broadcast %cst_51 : f32 to vector<8x128xf32>
    %107 = arith.addf %105, %106 : vector<8x128xf32>
    %108 = vector.extract_strided_slice %91 {offsets = [0, 256], sizes = [8, 128], strides = [1, 1]} : vector<8x512xf32> to vector<8x128xf32>
    %109 = math.tanh %108 : vector<8x128xf32>
    %110 = vector.extract_strided_slice %91 {offsets = [0, 384], sizes = [8, 128], strides = [1, 1]} : vector<8x512xf32> to vector<8x128xf32>
    %cst_52 = arith.constant 5.000000e-01 : f32
    %111 = vector.broadcast %cst_52 : f32 to vector<8x128xf32>
    %112 = arith.mulf %111, %110 : vector<8x128xf32>
    %113 = math.tanh %112 : vector<8x128xf32>
    %cst_53 = arith.constant 5.000000e-01 : f32
    %114 = vector.broadcast %cst_53 : f32 to vector<8x128xf32>
    %115 = arith.mulf %114, %113 : vector<8x128xf32>
    %cst_54 = arith.constant 5.000000e-01 : f32
    %116 = vector.broadcast %cst_54 : f32 to vector<8x128xf32>
    %117 = arith.addf %115, %116 : vector<8x128xf32>
    %118 = arith.mulf %107, %52 : vector<8x128xf32>
    %119 = arith.mulf %99, %109 : vector<8x128xf32>
    %120 = arith.addf %118, %119 : vector<8x128xf32>
    %121 = math.tanh %120 : vector<8x128xf32>
    %122 = arith.mulf %117, %121 : vector<8x128xf32>
    %123 = vector.extract_strided_slice %14 {offsets = [48, 0], sizes = [8, 512], strides = [1, 1]} : vector<64x512xf32> to vector<8x512xf32>
    %cst_55 = arith.constant dense<0.000000e+00> : vector<8x512xf32>
    %124 = tpu.matmul %88, %16, %cst_55 {dimension_numbers = #tpu.dot_dimension_numbers<[1], [0], [0], [1], [0, 0, 1, 1], [], []>} : vector<8x128xf32>, vector<128x512xf32>, vector<8x512xf32> -> vector<8x512xf32>
    %125 = arith.addf %123, %124 : vector<8x512xf32>
    %126 = vector.extract_strided_slice %125 {offsets = [0, 0], sizes = [8, 128], strides = [1, 1]} : vector<8x512xf32> to vector<8x128xf32>
    %cst_56 = arith.constant 5.000000e-01 : f32
    %127 = vector.broadcast %cst_56 : f32 to vector<8x128xf32>
    %128 = arith.mulf %127, %126 : vector<8x128xf32>
    %129 = math.tanh %128 : vector<8x128xf32>
    %cst_57 = arith.constant 5.000000e-01 : f32
    %130 = vector.broadcast %cst_57 : f32 to vector<8x128xf32>
    %131 = arith.mulf %130, %129 : vector<8x128xf32>
    %cst_58 = arith.constant 5.000000e-01 : f32
    %132 = vector.broadcast %cst_58 : f32 to vector<8x128xf32>
    %133 = arith.addf %131, %132 : vector<8x128xf32>
    %134 = vector.extract_strided_slice %125 {offsets = [0, 128], sizes = [8, 128], strides = [1, 1]} : vector<8x512xf32> to vector<8x128xf32>
    %cst_59 = arith.constant 5.000000e-01 : f32
    %135 = vector.broadcast %cst_59 : f32 to vector<8x128xf32>
    %136 = arith.mulf %135, %134 : vector<8x128xf32>
    %137 = math.tanh %136 : vector<8x128xf32>
    %cst_60 = arith.constant 5.000000e-01 : f32
    %138 = vector.broadcast %cst_60 : f32 to vector<8x128xf32>
    %139 = arith.mulf %138, %137 : vector<8x128xf32>
    %cst_61 = arith.constant 5.000000e-01 : f32
    %140 = vector.broadcast %cst_61 : f32 to vector<8x128xf32>
    %141 = arith.addf %139, %140 : vector<8x128xf32>
    %142 = vector.extract_strided_slice %125 {offsets = [0, 256], sizes = [8, 128], strides = [1, 1]} : vector<8x512xf32> to vector<8x128xf32>
    %143 = math.tanh %142 : vector<8x128xf32>
    %144 = vector.extract_strided_slice %125 {offsets = [0, 384], sizes = [8, 128], strides = [1, 1]} : vector<8x512xf32> to vector<8x128xf32>
    %cst_62 = arith.constant 5.000000e-01 : f32
    %145 = vector.broadcast %cst_62 : f32 to vector<8x128xf32>
    %146 = arith.mulf %145, %144 : vector<8x128xf32>
    %147 = math.tanh %146 : vector<8x128xf32>
    %cst_63 = arith.constant 5.000000e-01 : f32
    %148 = vector.broadcast %cst_63 : f32 to vector<8x128xf32>
    %149 = arith.mulf %148, %147 : vector<8x128xf32>
    %cst_64 = arith.constant 5.000000e-01 : f32
    %150 = vector.broadcast %cst_64 : f32 to vector<8x128xf32>
    %151 = arith.addf %149, %150 : vector<8x128xf32>
    %152 = arith.mulf %141, %86 : vector<8x128xf32>
    %153 = arith.mulf %133, %143 : vector<8x128xf32>
    %154 = arith.addf %152, %153 : vector<8x128xf32>
    %155 = math.tanh %154 : vector<8x128xf32>
    %156 = arith.mulf %151, %155 : vector<8x128xf32>
    %157 = vector.extract_strided_slice %8 {offsets = [16, 0], sizes = [8, 512], strides = [1, 1]} : vector<64x512xf32> to vector<8x512xf32>
    %cst_65 = arith.constant dense<0.000000e+00> : vector<8x512xf32>
    %158 = tpu.matmul %122, %15, %cst_65 {dimension_numbers = #tpu.dot_dimension_numbers<[1], [0], [0], [1], [0, 0, 1, 1], [], []>} : vector<8x128xf32>, vector<128x512xf32>, vector<8x512xf32> -> vector<8x512xf32>
    %159 = arith.addf %157, %158 : vector<8x512xf32>
    %160 = vector.extract_strided_slice %159 {offsets = [0, 0], sizes = [8, 128], strides = [1, 1]} : vector<8x512xf32> to vector<8x128xf32>
    %cst_66 = arith.constant 5.000000e-01 : f32
    %161 = vector.broadcast %cst_66 : f32 to vector<8x128xf32>
    %162 = arith.mulf %161, %160 : vector<8x128xf32>
    %163 = math.tanh %162 : vector<8x128xf32>
    %cst_67 = arith.constant 5.000000e-01 : f32
    %164 = vector.broadcast %cst_67 : f32 to vector<8x128xf32>
    %165 = arith.mulf %164, %163 : vector<8x128xf32>
    %cst_68 = arith.constant 5.000000e-01 : f32
    %166 = vector.broadcast %cst_68 : f32 to vector<8x128xf32>
    %167 = arith.addf %165, %166 : vector<8x128xf32>
    %168 = vector.extract_strided_slice %159 {offsets = [0, 128], sizes = [8, 128], strides = [1, 1]} : vector<8x512xf32> to vector<8x128xf32>
    %cst_69 = arith.constant 5.000000e-01 : f32
    %169 = vector.broadcast %cst_69 : f32 to vector<8x128xf32>
    %170 = arith.mulf %169, %168 : vector<8x128xf32>
    %171 = math.tanh %170 : vector<8x128xf32>
    %cst_70 = arith.constant 5.000000e-01 : f32
    %172 = vector.broadcast %cst_70 : f32 to vector<8x128xf32>
    %173 = arith.mulf %172, %171 : vector<8x128xf32>
    %cst_71 = arith.constant 5.000000e-01 : f32
    %174 = vector.broadcast %cst_71 : f32 to vector<8x128xf32>
    %175 = arith.addf %173, %174 : vector<8x128xf32>
    %176 = vector.extract_strided_slice %159 {offsets = [0, 256], sizes = [8, 128], strides = [1, 1]} : vector<8x512xf32> to vector<8x128xf32>
    %177 = math.tanh %176 : vector<8x128xf32>
    %178 = vector.extract_strided_slice %159 {offsets = [0, 384], sizes = [8, 128], strides = [1, 1]} : vector<8x512xf32> to vector<8x128xf32>
    %cst_72 = arith.constant 5.000000e-01 : f32
    %179 = vector.broadcast %cst_72 : f32 to vector<8x128xf32>
    %180 = arith.mulf %179, %178 : vector<8x128xf32>
    %181 = math.tanh %180 : vector<8x128xf32>
    %cst_73 = arith.constant 5.000000e-01 : f32
    %182 = vector.broadcast %cst_73 : f32 to vector<8x128xf32>
    %183 = arith.mulf %182, %181 : vector<8x128xf32>
    %cst_74 = arith.constant 5.000000e-01 : f32
    %184 = vector.broadcast %cst_74 : f32 to vector<8x128xf32>
    %185 = arith.addf %183, %184 : vector<8x128xf32>
    %186 = arith.mulf %175, %120 : vector<8x128xf32>
    %187 = arith.mulf %167, %177 : vector<8x128xf32>
    %188 = arith.addf %186, %187 : vector<8x128xf32>
    %189 = math.tanh %188 : vector<8x128xf32>
    %190 = arith.mulf %185, %189 : vector<8x128xf32>
    %191 = vector.extract_strided_slice %14 {offsets = [40, 0], sizes = [8, 512], strides = [1, 1]} : vector<64x512xf32> to vector<8x512xf32>
    %cst_75 = arith.constant dense<0.000000e+00> : vector<8x512xf32>
    %192 = tpu.matmul %156, %16, %cst_75 {dimension_numbers = #tpu.dot_dimension_numbers<[1], [0], [0], [1], [0, 0, 1, 1], [], []>} : vector<8x128xf32>, vector<128x512xf32>, vector<8x512xf32> -> vector<8x512xf32>
    %193 = arith.addf %191, %192 : vector<8x512xf32>
    %194 = vector.extract_strided_slice %193 {offsets = [0, 0], sizes = [8, 128], strides = [1, 1]} : vector<8x512xf32> to vector<8x128xf32>
    %cst_76 = arith.constant 5.000000e-01 : f32
    %195 = vector.broadcast %cst_76 : f32 to vector<8x128xf32>
    %196 = arith.mulf %195, %194 : vector<8x128xf32>
    %197 = math.tanh %196 : vector<8x128xf32>
    %cst_77 = arith.constant 5.000000e-01 : f32
    %198 = vector.broadcast %cst_77 : f32 to vector<8x128xf32>
    %199 = arith.mulf %198, %197 : vector<8x128xf32>
    %cst_78 = arith.constant 5.000000e-01 : f32
    %200 = vector.broadcast %cst_78 : f32 to vector<8x128xf32>
    %201 = arith.addf %199, %200 : vector<8x128xf32>
    %202 = vector.extract_strided_slice %193 {offsets = [0, 128], sizes = [8, 128], strides = [1, 1]} : vector<8x512xf32> to vector<8x128xf32>
    %cst_79 = arith.constant 5.000000e-01 : f32
    %203 = vector.broadcast %cst_79 : f32 to vector<8x128xf32>
    %204 = arith.mulf %203, %202 : vector<8x128xf32>
    %205 = math.tanh %204 : vector<8x128xf32>
    %cst_80 = arith.constant 5.000000e-01 : f32
    %206 = vector.broadcast %cst_80 : f32 to vector<8x128xf32>
    %207 = arith.mulf %206, %205 : vector<8x128xf32>
    %cst_81 = arith.constant 5.000000e-01 : f32
    %208 = vector.broadcast %cst_81 : f32 to vector<8x128xf32>
    %209 = arith.addf %207, %208 : vector<8x128xf32>
    %210 = vector.extract_strided_slice %193 {offsets = [0, 256], sizes = [8, 128], strides = [1, 1]} : vector<8x512xf32> to vector<8x128xf32>
    %211 = math.tanh %210 : vector<8x128xf32>
    %212 = vector.extract_strided_slice %193 {offsets = [0, 384], sizes = [8, 128], strides = [1, 1]} : vector<8x512xf32> to vector<8x128xf32>
    %cst_82 = arith.constant 5.000000e-01 : f32
    %213 = vector.broadcast %cst_82 : f32 to vector<8x128xf32>
    %214 = arith.mulf %213, %212 : vector<8x128xf32>
    %215 = math.tanh %214 : vector<8x128xf32>
    %cst_83 = arith.constant 5.000000e-01 : f32
    %216 = vector.broadcast %cst_83 : f32 to vector<8x128xf32>
    %217 = arith.mulf %216, %215 : vector<8x128xf32>
    %cst_84 = arith.constant 5.000000e-01 : f32
    %218 = vector.broadcast %cst_84 : f32 to vector<8x128xf32>
    %219 = arith.addf %217, %218 : vector<8x128xf32>
    %220 = arith.mulf %209, %154 : vector<8x128xf32>
    %221 = arith.mulf %201, %211 : vector<8x128xf32>
    %222 = arith.addf %220, %221 : vector<8x128xf32>
    %223 = math.tanh %222 : vector<8x128xf32>
    %224 = arith.mulf %219, %223 : vector<8x128xf32>
    %225 = vector.extract_strided_slice %8 {offsets = [24, 0], sizes = [8, 512], strides = [1, 1]} : vector<64x512xf32> to vector<8x512xf32>
    %cst_85 = arith.constant dense<0.000000e+00> : vector<8x512xf32>
    %226 = tpu.matmul %190, %15, %cst_85 {dimension_numbers = #tpu.dot_dimension_numbers<[1], [0], [0], [1], [0, 0, 1, 1], [], []>} : vector<8x128xf32>, vector<128x512xf32>, vector<8x512xf32> -> vector<8x512xf32>
    %227 = arith.addf %225, %226 : vector<8x512xf32>
    %228 = vector.extract_strided_slice %227 {offsets = [0, 0], sizes = [8, 128], strides = [1, 1]} : vector<8x512xf32> to vector<8x128xf32>
    %cst_86 = arith.constant 5.000000e-01 : f32
    %229 = vector.broadcast %cst_86 : f32 to vector<8x128xf32>
    %230 = arith.mulf %229, %228 : vector<8x128xf32>
    %231 = math.tanh %230 : vector<8x128xf32>
    %cst_87 = arith.constant 5.000000e-01 : f32
    %232 = vector.broadcast %cst_87 : f32 to vector<8x128xf32>
    %233 = arith.mulf %232, %231 : vector<8x128xf32>
    %cst_88 = arith.constant 5.000000e-01 : f32
    %234 = vector.broadcast %cst_88 : f32 to vector<8x128xf32>
    %235 = arith.addf %233, %234 : vector<8x128xf32>
    %236 = vector.extract_strided_slice %227 {offsets = [0, 128], sizes = [8, 128], strides = [1, 1]} : vector<8x512xf32> to vector<8x128xf32>
    %cst_89 = arith.constant 5.000000e-01 : f32
    %237 = vector.broadcast %cst_89 : f32 to vector<8x128xf32>
    %238 = arith.mulf %237, %236 : vector<8x128xf32>
    %239 = math.tanh %238 : vector<8x128xf32>
    %cst_90 = arith.constant 5.000000e-01 : f32
    %240 = vector.broadcast %cst_90 : f32 to vector<8x128xf32>
    %241 = arith.mulf %240, %239 : vector<8x128xf32>
    %cst_91 = arith.constant 5.000000e-01 : f32
    %242 = vector.broadcast %cst_91 : f32 to vector<8x128xf32>
    %243 = arith.addf %241, %242 : vector<8x128xf32>
    %244 = vector.extract_strided_slice %227 {offsets = [0, 256], sizes = [8, 128], strides = [1, 1]} : vector<8x512xf32> to vector<8x128xf32>
    %245 = math.tanh %244 : vector<8x128xf32>
    %246 = vector.extract_strided_slice %227 {offsets = [0, 384], sizes = [8, 128], strides = [1, 1]} : vector<8x512xf32> to vector<8x128xf32>
    %cst_92 = arith.constant 5.000000e-01 : f32
    %247 = vector.broadcast %cst_92 : f32 to vector<8x128xf32>
    %248 = arith.mulf %247, %246 : vector<8x128xf32>
    %249 = math.tanh %248 : vector<8x128xf32>
    %cst_93 = arith.constant 5.000000e-01 : f32
    %250 = vector.broadcast %cst_93 : f32 to vector<8x128xf32>
    %251 = arith.mulf %250, %249 : vector<8x128xf32>
    %cst_94 = arith.constant 5.000000e-01 : f32
    %252 = vector.broadcast %cst_94 : f32 to vector<8x128xf32>
    %253 = arith.addf %251, %252 : vector<8x128xf32>
    %254 = arith.mulf %243, %188 : vector<8x128xf32>
    %255 = arith.mulf %235, %245 : vector<8x128xf32>
    %256 = arith.addf %254, %255 : vector<8x128xf32>
    %257 = math.tanh %256 : vector<8x128xf32>
    %258 = arith.mulf %253, %257 : vector<8x128xf32>
    %259 = vector.extract_strided_slice %14 {offsets = [32, 0], sizes = [8, 512], strides = [1, 1]} : vector<64x512xf32> to vector<8x512xf32>
    %cst_95 = arith.constant dense<0.000000e+00> : vector<8x512xf32>
    %260 = tpu.matmul %224, %16, %cst_95 {dimension_numbers = #tpu.dot_dimension_numbers<[1], [0], [0], [1], [0, 0, 1, 1], [], []>} : vector<8x128xf32>, vector<128x512xf32>, vector<8x512xf32> -> vector<8x512xf32>
    %261 = arith.addf %259, %260 : vector<8x512xf32>
    %262 = vector.extract_strided_slice %261 {offsets = [0, 0], sizes = [8, 128], strides = [1, 1]} : vector<8x512xf32> to vector<8x128xf32>
    %cst_96 = arith.constant 5.000000e-01 : f32
    %263 = vector.broadcast %cst_96 : f32 to vector<8x128xf32>
    %264 = arith.mulf %263, %262 : vector<8x128xf32>
    %265 = math.tanh %264 : vector<8x128xf32>
    %cst_97 = arith.constant 5.000000e-01 : f32
    %266 = vector.broadcast %cst_97 : f32 to vector<8x128xf32>
    %267 = arith.mulf %266, %265 : vector<8x128xf32>
    %cst_98 = arith.constant 5.000000e-01 : f32
    %268 = vector.broadcast %cst_98 : f32 to vector<8x128xf32>
    %269 = arith.addf %267, %268 : vector<8x128xf32>
    %270 = vector.extract_strided_slice %261 {offsets = [0, 128], sizes = [8, 128], strides = [1, 1]} : vector<8x512xf32> to vector<8x128xf32>
    %cst_99 = arith.constant 5.000000e-01 : f32
    %271 = vector.broadcast %cst_99 : f32 to vector<8x128xf32>
    %272 = arith.mulf %271, %270 : vector<8x128xf32>
    %273 = math.tanh %272 : vector<8x128xf32>
    %cst_100 = arith.constant 5.000000e-01 : f32
    %274 = vector.broadcast %cst_100 : f32 to vector<8x128xf32>
    %275 = arith.mulf %274, %273 : vector<8x128xf32>
    %cst_101 = arith.constant 5.000000e-01 : f32
    %276 = vector.broadcast %cst_101 : f32 to vector<8x128xf32>
    %277 = arith.addf %275, %276 : vector<8x128xf32>
    %278 = vector.extract_strided_slice %261 {offsets = [0, 256], sizes = [8, 128], strides = [1, 1]} : vector<8x512xf32> to vector<8x128xf32>
    %279 = math.tanh %278 : vector<8x128xf32>
    %280 = vector.extract_strided_slice %261 {offsets = [0, 384], sizes = [8, 128], strides = [1, 1]} : vector<8x512xf32> to vector<8x128xf32>
    %cst_102 = arith.constant 5.000000e-01 : f32
    %281 = vector.broadcast %cst_102 : f32 to vector<8x128xf32>
    %282 = arith.mulf %281, %280 : vector<8x128xf32>
    %283 = math.tanh %282 : vector<8x128xf32>
    %cst_103 = arith.constant 5.000000e-01 : f32
    %284 = vector.broadcast %cst_103 : f32 to vector<8x128xf32>
    %285 = arith.mulf %284, %283 : vector<8x128xf32>
    %cst_104 = arith.constant 5.000000e-01 : f32
    %286 = vector.broadcast %cst_104 : f32 to vector<8x128xf32>
    %287 = arith.addf %285, %286 : vector<8x128xf32>
    %288 = arith.mulf %277, %222 : vector<8x128xf32>
    %289 = arith.mulf %269, %279 : vector<8x128xf32>
    %290 = arith.addf %288, %289 : vector<8x128xf32>
    %291 = math.tanh %290 : vector<8x128xf32>
    %292 = arith.mulf %287, %291 : vector<8x128xf32>
    %293 = vector.extract_strided_slice %8 {offsets = [32, 0], sizes = [8, 512], strides = [1, 1]} : vector<64x512xf32> to vector<8x512xf32>
    %cst_105 = arith.constant dense<0.000000e+00> : vector<8x512xf32>
    %294 = tpu.matmul %258, %15, %cst_105 {dimension_numbers = #tpu.dot_dimension_numbers<[1], [0], [0], [1], [0, 0, 1, 1], [], []>} : vector<8x128xf32>, vector<128x512xf32>, vector<8x512xf32> -> vector<8x512xf32>
    %295 = arith.addf %293, %294 : vector<8x512xf32>
    %296 = vector.extract_strided_slice %295 {offsets = [0, 0], sizes = [8, 128], strides = [1, 1]} : vector<8x512xf32> to vector<8x128xf32>
    %cst_106 = arith.constant 5.000000e-01 : f32
    %297 = vector.broadcast %cst_106 : f32 to vector<8x128xf32>
    %298 = arith.mulf %297, %296 : vector<8x128xf32>
    %299 = math.tanh %298 : vector<8x128xf32>
    %cst_107 = arith.constant 5.000000e-01 : f32
    %300 = vector.broadcast %cst_107 : f32 to vector<8x128xf32>
    %301 = arith.mulf %300, %299 : vector<8x128xf32>
    %cst_108 = arith.constant 5.000000e-01 : f32
    %302 = vector.broadcast %cst_108 : f32 to vector<8x128xf32>
    %303 = arith.addf %301, %302 : vector<8x128xf32>
    %304 = vector.extract_strided_slice %295 {offsets = [0, 128], sizes = [8, 128], strides = [1, 1]} : vector<8x512xf32> to vector<8x128xf32>
    %cst_109 = arith.constant 5.000000e-01 : f32
    %305 = vector.broadcast %cst_109 : f32 to vector<8x128xf32>
    %306 = arith.mulf %305, %304 : vector<8x128xf32>
    %307 = math.tanh %306 : vector<8x128xf32>
    %cst_110 = arith.constant 5.000000e-01 : f32
    %308 = vector.broadcast %cst_110 : f32 to vector<8x128xf32>
    %309 = arith.mulf %308, %307 : vector<8x128xf32>
    %cst_111 = arith.constant 5.000000e-01 : f32
    %310 = vector.broadcast %cst_111 : f32 to vector<8x128xf32>
    %311 = arith.addf %309, %310 : vector<8x128xf32>
    %312 = vector.extract_strided_slice %295 {offsets = [0, 256], sizes = [8, 128], strides = [1, 1]} : vector<8x512xf32> to vector<8x128xf32>
    %313 = math.tanh %312 : vector<8x128xf32>
    %314 = vector.extract_strided_slice %295 {offsets = [0, 384], sizes = [8, 128], strides = [1, 1]} : vector<8x512xf32> to vector<8x128xf32>
    %cst_112 = arith.constant 5.000000e-01 : f32
    %315 = vector.broadcast %cst_112 : f32 to vector<8x128xf32>
    %316 = arith.mulf %315, %314 : vector<8x128xf32>
    %317 = math.tanh %316 : vector<8x128xf32>
    %cst_113 = arith.constant 5.000000e-01 : f32
    %318 = vector.broadcast %cst_113 : f32 to vector<8x128xf32>
    %319 = arith.mulf %318, %317 : vector<8x128xf32>
    %cst_114 = arith.constant 5.000000e-01 : f32
    %320 = vector.broadcast %cst_114 : f32 to vector<8x128xf32>
    %321 = arith.addf %319, %320 : vector<8x128xf32>
    %322 = arith.mulf %311, %256 : vector<8x128xf32>
    %323 = arith.mulf %303, %313 : vector<8x128xf32>
    %324 = arith.addf %322, %323 : vector<8x128xf32>
    %325 = math.tanh %324 : vector<8x128xf32>
    %326 = arith.mulf %321, %325 : vector<8x128xf32>
    %327 = vector.extract_strided_slice %14 {offsets = [24, 0], sizes = [8, 512], strides = [1, 1]} : vector<64x512xf32> to vector<8x512xf32>
    %cst_115 = arith.constant dense<0.000000e+00> : vector<8x512xf32>
    %328 = tpu.matmul %292, %16, %cst_115 {dimension_numbers = #tpu.dot_dimension_numbers<[1], [0], [0], [1], [0, 0, 1, 1], [], []>} : vector<8x128xf32>, vector<128x512xf32>, vector<8x512xf32> -> vector<8x512xf32>
    %329 = arith.addf %327, %328 : vector<8x512xf32>
    %330 = vector.extract_strided_slice %329 {offsets = [0, 0], sizes = [8, 128], strides = [1, 1]} : vector<8x512xf32> to vector<8x128xf32>
    %cst_116 = arith.constant 5.000000e-01 : f32
    %331 = vector.broadcast %cst_116 : f32 to vector<8x128xf32>
    %332 = arith.mulf %331, %330 : vector<8x128xf32>
    %333 = math.tanh %332 : vector<8x128xf32>
    %cst_117 = arith.constant 5.000000e-01 : f32
    %334 = vector.broadcast %cst_117 : f32 to vector<8x128xf32>
    %335 = arith.mulf %334, %333 : vector<8x128xf32>
    %cst_118 = arith.constant 5.000000e-01 : f32
    %336 = vector.broadcast %cst_118 : f32 to vector<8x128xf32>
    %337 = arith.addf %335, %336 : vector<8x128xf32>
    %338 = vector.extract_strided_slice %329 {offsets = [0, 128], sizes = [8, 128], strides = [1, 1]} : vector<8x512xf32> to vector<8x128xf32>
    %cst_119 = arith.constant 5.000000e-01 : f32
    %339 = vector.broadcast %cst_119 : f32 to vector<8x128xf32>
    %340 = arith.mulf %339, %338 : vector<8x128xf32>
    %341 = math.tanh %340 : vector<8x128xf32>
    %cst_120 = arith.constant 5.000000e-01 : f32
    %342 = vector.broadcast %cst_120 : f32 to vector<8x128xf32>
    %343 = arith.mulf %342, %341 : vector<8x128xf32>
    %cst_121 = arith.constant 5.000000e-01 : f32
    %344 = vector.broadcast %cst_121 : f32 to vector<8x128xf32>
    %345 = arith.addf %343, %344 : vector<8x128xf32>
    %346 = vector.extract_strided_slice %329 {offsets = [0, 256], sizes = [8, 128], strides = [1, 1]} : vector<8x512xf32> to vector<8x128xf32>
    %347 = math.tanh %346 : vector<8x128xf32>
    %348 = vector.extract_strided_slice %329 {offsets = [0, 384], sizes = [8, 128], strides = [1, 1]} : vector<8x512xf32> to vector<8x128xf32>
    %cst_122 = arith.constant 5.000000e-01 : f32
    %349 = vector.broadcast %cst_122 : f32 to vector<8x128xf32>
    %350 = arith.mulf %349, %348 : vector<8x128xf32>
    %351 = math.tanh %350 : vector<8x128xf32>
    %cst_123 = arith.constant 5.000000e-01 : f32
    %352 = vector.broadcast %cst_123 : f32 to vector<8x128xf32>
    %353 = arith.mulf %352, %351 : vector<8x128xf32>
    %cst_124 = arith.constant 5.000000e-01 : f32
    %354 = vector.broadcast %cst_124 : f32 to vector<8x128xf32>
    %355 = arith.addf %353, %354 : vector<8x128xf32>
    %356 = arith.mulf %345, %290 : vector<8x128xf32>
    %357 = arith.mulf %337, %347 : vector<8x128xf32>
    %358 = arith.addf %356, %357 : vector<8x128xf32>
    %359 = math.tanh %358 : vector<8x128xf32>
    %360 = arith.mulf %355, %359 : vector<8x128xf32>
    %361 = vector.extract_strided_slice %8 {offsets = [40, 0], sizes = [8, 512], strides = [1, 1]} : vector<64x512xf32> to vector<8x512xf32>
    %cst_125 = arith.constant dense<0.000000e+00> : vector<8x512xf32>
    %362 = tpu.matmul %326, %15, %cst_125 {dimension_numbers = #tpu.dot_dimension_numbers<[1], [0], [0], [1], [0, 0, 1, 1], [], []>} : vector<8x128xf32>, vector<128x512xf32>, vector<8x512xf32> -> vector<8x512xf32>
    %363 = arith.addf %361, %362 : vector<8x512xf32>
    %364 = vector.extract_strided_slice %363 {offsets = [0, 0], sizes = [8, 128], strides = [1, 1]} : vector<8x512xf32> to vector<8x128xf32>
    %cst_126 = arith.constant 5.000000e-01 : f32
    %365 = vector.broadcast %cst_126 : f32 to vector<8x128xf32>
    %366 = arith.mulf %365, %364 : vector<8x128xf32>
    %367 = math.tanh %366 : vector<8x128xf32>
    %cst_127 = arith.constant 5.000000e-01 : f32
    %368 = vector.broadcast %cst_127 : f32 to vector<8x128xf32>
    %369 = arith.mulf %368, %367 : vector<8x128xf32>
    %cst_128 = arith.constant 5.000000e-01 : f32
    %370 = vector.broadcast %cst_128 : f32 to vector<8x128xf32>
    %371 = arith.addf %369, %370 : vector<8x128xf32>
    %372 = vector.extract_strided_slice %363 {offsets = [0, 128], sizes = [8, 128], strides = [1, 1]} : vector<8x512xf32> to vector<8x128xf32>
    %cst_129 = arith.constant 5.000000e-01 : f32
    %373 = vector.broadcast %cst_129 : f32 to vector<8x128xf32>
    %374 = arith.mulf %373, %372 : vector<8x128xf32>
    %375 = math.tanh %374 : vector<8x128xf32>
    %cst_130 = arith.constant 5.000000e-01 : f32
    %376 = vector.broadcast %cst_130 : f32 to vector<8x128xf32>
    %377 = arith.mulf %376, %375 : vector<8x128xf32>
    %cst_131 = arith.constant 5.000000e-01 : f32
    %378 = vector.broadcast %cst_131 : f32 to vector<8x128xf32>
    %379 = arith.addf %377, %378 : vector<8x128xf32>
    %380 = vector.extract_strided_slice %363 {offsets = [0, 256], sizes = [8, 128], strides = [1, 1]} : vector<8x512xf32> to vector<8x128xf32>
    %381 = math.tanh %380 : vector<8x128xf32>
    %382 = vector.extract_strided_slice %363 {offsets = [0, 384], sizes = [8, 128], strides = [1, 1]} : vector<8x512xf32> to vector<8x128xf32>
    %cst_132 = arith.constant 5.000000e-01 : f32
    %383 = vector.broadcast %cst_132 : f32 to vector<8x128xf32>
    %384 = arith.mulf %383, %382 : vector<8x128xf32>
    %385 = math.tanh %384 : vector<8x128xf32>
    %cst_133 = arith.constant 5.000000e-01 : f32
    %386 = vector.broadcast %cst_133 : f32 to vector<8x128xf32>
    %387 = arith.mulf %386, %385 : vector<8x128xf32>
    %cst_134 = arith.constant 5.000000e-01 : f32
    %388 = vector.broadcast %cst_134 : f32 to vector<8x128xf32>
    %389 = arith.addf %387, %388 : vector<8x128xf32>
    %390 = arith.mulf %379, %324 : vector<8x128xf32>
    %391 = arith.mulf %371, %381 : vector<8x128xf32>
    %392 = arith.addf %390, %391 : vector<8x128xf32>
    %393 = math.tanh %392 : vector<8x128xf32>
    %394 = arith.mulf %389, %393 : vector<8x128xf32>
    %395 = vector.extract_strided_slice %14 {offsets = [16, 0], sizes = [8, 512], strides = [1, 1]} : vector<64x512xf32> to vector<8x512xf32>
    %cst_135 = arith.constant dense<0.000000e+00> : vector<8x512xf32>
    %396 = tpu.matmul %360, %16, %cst_135 {dimension_numbers = #tpu.dot_dimension_numbers<[1], [0], [0], [1], [0, 0, 1, 1], [], []>} : vector<8x128xf32>, vector<128x512xf32>, vector<8x512xf32> -> vector<8x512xf32>
    %397 = arith.addf %395, %396 : vector<8x512xf32>
    %398 = vector.extract_strided_slice %397 {offsets = [0, 0], sizes = [8, 128], strides = [1, 1]} : vector<8x512xf32> to vector<8x128xf32>
    %cst_136 = arith.constant 5.000000e-01 : f32
    %399 = vector.broadcast %cst_136 : f32 to vector<8x128xf32>
    %400 = arith.mulf %399, %398 : vector<8x128xf32>
    %401 = math.tanh %400 : vector<8x128xf32>
    %cst_137 = arith.constant 5.000000e-01 : f32
    %402 = vector.broadcast %cst_137 : f32 to vector<8x128xf32>
    %403 = arith.mulf %402, %401 : vector<8x128xf32>
    %cst_138 = arith.constant 5.000000e-01 : f32
    %404 = vector.broadcast %cst_138 : f32 to vector<8x128xf32>
    %405 = arith.addf %403, %404 : vector<8x128xf32>
    %406 = vector.extract_strided_slice %397 {offsets = [0, 128], sizes = [8, 128], strides = [1, 1]} : vector<8x512xf32> to vector<8x128xf32>
    %cst_139 = arith.constant 5.000000e-01 : f32
    %407 = vector.broadcast %cst_139 : f32 to vector<8x128xf32>
    %408 = arith.mulf %407, %406 : vector<8x128xf32>
    %409 = math.tanh %408 : vector<8x128xf32>
    %cst_140 = arith.constant 5.000000e-01 : f32
    %410 = vector.broadcast %cst_140 : f32 to vector<8x128xf32>
    %411 = arith.mulf %410, %409 : vector<8x128xf32>
    %cst_141 = arith.constant 5.000000e-01 : f32
    %412 = vector.broadcast %cst_141 : f32 to vector<8x128xf32>
    %413 = arith.addf %411, %412 : vector<8x128xf32>
    %414 = vector.extract_strided_slice %397 {offsets = [0, 256], sizes = [8, 128], strides = [1, 1]} : vector<8x512xf32> to vector<8x128xf32>
    %415 = math.tanh %414 : vector<8x128xf32>
    %416 = vector.extract_strided_slice %397 {offsets = [0, 384], sizes = [8, 128], strides = [1, 1]} : vector<8x512xf32> to vector<8x128xf32>
    %cst_142 = arith.constant 5.000000e-01 : f32
    %417 = vector.broadcast %cst_142 : f32 to vector<8x128xf32>
    %418 = arith.mulf %417, %416 : vector<8x128xf32>
    %419 = math.tanh %418 : vector<8x128xf32>
    %cst_143 = arith.constant 5.000000e-01 : f32
    %420 = vector.broadcast %cst_143 : f32 to vector<8x128xf32>
    %421 = arith.mulf %420, %419 : vector<8x128xf32>
    %cst_144 = arith.constant 5.000000e-01 : f32
    %422 = vector.broadcast %cst_144 : f32 to vector<8x128xf32>
    %423 = arith.addf %421, %422 : vector<8x128xf32>
    %424 = arith.mulf %413, %358 : vector<8x128xf32>
    %425 = arith.mulf %405, %415 : vector<8x128xf32>
    %426 = arith.addf %424, %425 : vector<8x128xf32>
    %427 = math.tanh %426 : vector<8x128xf32>
    %428 = arith.mulf %423, %427 : vector<8x128xf32>
    %429 = vector.extract_strided_slice %8 {offsets = [48, 0], sizes = [8, 512], strides = [1, 1]} : vector<64x512xf32> to vector<8x512xf32>
    %cst_145 = arith.constant dense<0.000000e+00> : vector<8x512xf32>
    %430 = tpu.matmul %394, %15, %cst_145 {dimension_numbers = #tpu.dot_dimension_numbers<[1], [0], [0], [1], [0, 0, 1, 1], [], []>} : vector<8x128xf32>, vector<128x512xf32>, vector<8x512xf32> -> vector<8x512xf32>
    %431 = arith.addf %429, %430 : vector<8x512xf32>
    %432 = vector.extract_strided_slice %431 {offsets = [0, 0], sizes = [8, 128], strides = [1, 1]} : vector<8x512xf32> to vector<8x128xf32>
    %cst_146 = arith.constant 5.000000e-01 : f32
    %433 = vector.broadcast %cst_146 : f32 to vector<8x128xf32>
    %434 = arith.mulf %433, %432 : vector<8x128xf32>
    %435 = math.tanh %434 : vector<8x128xf32>
    %cst_147 = arith.constant 5.000000e-01 : f32
    %436 = vector.broadcast %cst_147 : f32 to vector<8x128xf32>
    %437 = arith.mulf %436, %435 : vector<8x128xf32>
    %cst_148 = arith.constant 5.000000e-01 : f32
    %438 = vector.broadcast %cst_148 : f32 to vector<8x128xf32>
    %439 = arith.addf %437, %438 : vector<8x128xf32>
    %440 = vector.extract_strided_slice %431 {offsets = [0, 128], sizes = [8, 128], strides = [1, 1]} : vector<8x512xf32> to vector<8x128xf32>
    %cst_149 = arith.constant 5.000000e-01 : f32
    %441 = vector.broadcast %cst_149 : f32 to vector<8x128xf32>
    %442 = arith.mulf %441, %440 : vector<8x128xf32>
    %443 = math.tanh %442 : vector<8x128xf32>
    %cst_150 = arith.constant 5.000000e-01 : f32
    %444 = vector.broadcast %cst_150 : f32 to vector<8x128xf32>
    %445 = arith.mulf %444, %443 : vector<8x128xf32>
    %cst_151 = arith.constant 5.000000e-01 : f32
    %446 = vector.broadcast %cst_151 : f32 to vector<8x128xf32>
    %447 = arith.addf %445, %446 : vector<8x128xf32>
    %448 = vector.extract_strided_slice %431 {offsets = [0, 256], sizes = [8, 128], strides = [1, 1]} : vector<8x512xf32> to vector<8x128xf32>
    %449 = math.tanh %448 : vector<8x128xf32>
    %450 = vector.extract_strided_slice %431 {offsets = [0, 384], sizes = [8, 128], strides = [1, 1]} : vector<8x512xf32> to vector<8x128xf32>
    %cst_152 = arith.constant 5.000000e-01 : f32
    %451 = vector.broadcast %cst_152 : f32 to vector<8x128xf32>
    %452 = arith.mulf %451, %450 : vector<8x128xf32>
    %453 = math.tanh %452 : vector<8x128xf32>
    %cst_153 = arith.constant 5.000000e-01 : f32
    %454 = vector.broadcast %cst_153 : f32 to vector<8x128xf32>
    %455 = arith.mulf %454, %453 : vector<8x128xf32>
    %cst_154 = arith.constant 5.000000e-01 : f32
    %456 = vector.broadcast %cst_154 : f32 to vector<8x128xf32>
    %457 = arith.addf %455, %456 : vector<8x128xf32>
    %458 = arith.mulf %447, %392 : vector<8x128xf32>
    %459 = arith.mulf %439, %449 : vector<8x128xf32>
    %460 = arith.addf %458, %459 : vector<8x128xf32>
    %461 = math.tanh %460 : vector<8x128xf32>
    %462 = arith.mulf %457, %461 : vector<8x128xf32>
    %463 = vector.extract_strided_slice %14 {offsets = [8, 0], sizes = [8, 512], strides = [1, 1]} : vector<64x512xf32> to vector<8x512xf32>
    %cst_155 = arith.constant dense<0.000000e+00> : vector<8x512xf32>
    %464 = tpu.matmul %428, %16, %cst_155 {dimension_numbers = #tpu.dot_dimension_numbers<[1], [0], [0], [1], [0, 0, 1, 1], [], []>} : vector<8x128xf32>, vector<128x512xf32>, vector<8x512xf32> -> vector<8x512xf32>
    %465 = arith.addf %463, %464 : vector<8x512xf32>
    %466 = vector.extract_strided_slice %465 {offsets = [0, 0], sizes = [8, 128], strides = [1, 1]} : vector<8x512xf32> to vector<8x128xf32>
    %cst_156 = arith.constant 5.000000e-01 : f32
    %467 = vector.broadcast %cst_156 : f32 to vector<8x128xf32>
    %468 = arith.mulf %467, %466 : vector<8x128xf32>
    %469 = math.tanh %468 : vector<8x128xf32>
    %cst_157 = arith.constant 5.000000e-01 : f32
    %470 = vector.broadcast %cst_157 : f32 to vector<8x128xf32>
    %471 = arith.mulf %470, %469 : vector<8x128xf32>
    %cst_158 = arith.constant 5.000000e-01 : f32
    %472 = vector.broadcast %cst_158 : f32 to vector<8x128xf32>
    %473 = arith.addf %471, %472 : vector<8x128xf32>
    %474 = vector.extract_strided_slice %465 {offsets = [0, 128], sizes = [8, 128], strides = [1, 1]} : vector<8x512xf32> to vector<8x128xf32>
    %cst_159 = arith.constant 5.000000e-01 : f32
    %475 = vector.broadcast %cst_159 : f32 to vector<8x128xf32>
    %476 = arith.mulf %475, %474 : vector<8x128xf32>
    %477 = math.tanh %476 : vector<8x128xf32>
    %cst_160 = arith.constant 5.000000e-01 : f32
    %478 = vector.broadcast %cst_160 : f32 to vector<8x128xf32>
    %479 = arith.mulf %478, %477 : vector<8x128xf32>
    %cst_161 = arith.constant 5.000000e-01 : f32
    %480 = vector.broadcast %cst_161 : f32 to vector<8x128xf32>
    %481 = arith.addf %479, %480 : vector<8x128xf32>
    %482 = vector.extract_strided_slice %465 {offsets = [0, 256], sizes = [8, 128], strides = [1, 1]} : vector<8x512xf32> to vector<8x128xf32>
    %483 = math.tanh %482 : vector<8x128xf32>
    %484 = vector.extract_strided_slice %465 {offsets = [0, 384], sizes = [8, 128], strides = [1, 1]} : vector<8x512xf32> to vector<8x128xf32>
    %cst_162 = arith.constant 5.000000e-01 : f32
    %485 = vector.broadcast %cst_162 : f32 to vector<8x128xf32>
    %486 = arith.mulf %485, %484 : vector<8x128xf32>
    %487 = math.tanh %486 : vector<8x128xf32>
    %cst_163 = arith.constant 5.000000e-01 : f32
    %488 = vector.broadcast %cst_163 : f32 to vector<8x128xf32>
    %489 = arith.mulf %488, %487 : vector<8x128xf32>
    %cst_164 = arith.constant 5.000000e-01 : f32
    %490 = vector.broadcast %cst_164 : f32 to vector<8x128xf32>
    %491 = arith.addf %489, %490 : vector<8x128xf32>
    %492 = arith.mulf %481, %426 : vector<8x128xf32>
    %493 = arith.mulf %473, %483 : vector<8x128xf32>
    %494 = arith.addf %492, %493 : vector<8x128xf32>
    %495 = math.tanh %494 : vector<8x128xf32>
    %496 = arith.mulf %491, %495 : vector<8x128xf32>
    %497 = vector.extract_strided_slice %8 {offsets = [56, 0], sizes = [8, 512], strides = [1, 1]} : vector<64x512xf32> to vector<8x512xf32>
    %cst_165 = arith.constant dense<0.000000e+00> : vector<8x512xf32>
    %498 = tpu.matmul %462, %15, %cst_165 {dimension_numbers = #tpu.dot_dimension_numbers<[1], [0], [0], [1], [0, 0, 1, 1], [], []>} : vector<8x128xf32>, vector<128x512xf32>, vector<8x512xf32> -> vector<8x512xf32>
    %499 = arith.addf %497, %498 : vector<8x512xf32>
    %500 = vector.extract_strided_slice %499 {offsets = [0, 0], sizes = [8, 128], strides = [1, 1]} : vector<8x512xf32> to vector<8x128xf32>
    %cst_166 = arith.constant 5.000000e-01 : f32
    %501 = vector.broadcast %cst_166 : f32 to vector<8x128xf32>
    %502 = arith.mulf %501, %500 : vector<8x128xf32>
    %503 = math.tanh %502 : vector<8x128xf32>
    %cst_167 = arith.constant 5.000000e-01 : f32
    %504 = vector.broadcast %cst_167 : f32 to vector<8x128xf32>
    %505 = arith.mulf %504, %503 : vector<8x128xf32>
    %cst_168 = arith.constant 5.000000e-01 : f32
    %506 = vector.broadcast %cst_168 : f32 to vector<8x128xf32>
    %507 = arith.addf %505, %506 : vector<8x128xf32>
    %508 = vector.extract_strided_slice %499 {offsets = [0, 128], sizes = [8, 128], strides = [1, 1]} : vector<8x512xf32> to vector<8x128xf32>
    %cst_169 = arith.constant 5.000000e-01 : f32
    %509 = vector.broadcast %cst_169 : f32 to vector<8x128xf32>
    %510 = arith.mulf %509, %508 : vector<8x128xf32>
    %511 = math.tanh %510 : vector<8x128xf32>
    %cst_170 = arith.constant 5.000000e-01 : f32
    %512 = vector.broadcast %cst_170 : f32 to vector<8x128xf32>
    %513 = arith.mulf %512, %511 : vector<8x128xf32>
    %cst_171 = arith.constant 5.000000e-01 : f32
    %514 = vector.broadcast %cst_171 : f32 to vector<8x128xf32>
    %515 = arith.addf %513, %514 : vector<8x128xf32>
    %516 = vector.extract_strided_slice %499 {offsets = [0, 256], sizes = [8, 128], strides = [1, 1]} : vector<8x512xf32> to vector<8x128xf32>
    %517 = math.tanh %516 : vector<8x128xf32>
    %518 = vector.extract_strided_slice %499 {offsets = [0, 384], sizes = [8, 128], strides = [1, 1]} : vector<8x512xf32> to vector<8x128xf32>
    %cst_172 = arith.constant 5.000000e-01 : f32
    %519 = vector.broadcast %cst_172 : f32 to vector<8x128xf32>
    %520 = arith.mulf %519, %518 : vector<8x128xf32>
    %521 = math.tanh %520 : vector<8x128xf32>
    %cst_173 = arith.constant 5.000000e-01 : f32
    %522 = vector.broadcast %cst_173 : f32 to vector<8x128xf32>
    %523 = arith.mulf %522, %521 : vector<8x128xf32>
    %cst_174 = arith.constant 5.000000e-01 : f32
    %524 = vector.broadcast %cst_174 : f32 to vector<8x128xf32>
    %525 = arith.addf %523, %524 : vector<8x128xf32>
    %526 = arith.mulf %515, %460 : vector<8x128xf32>
    %527 = arith.mulf %507, %517 : vector<8x128xf32>
    %528 = arith.addf %526, %527 : vector<8x128xf32>
    %529 = math.tanh %528 : vector<8x128xf32>
    %530 = arith.mulf %525, %529 : vector<8x128xf32>
    %531 = vector.extract_strided_slice %14 {offsets = [0, 0], sizes = [8, 512], strides = [1, 1]} : vector<64x512xf32> to vector<8x512xf32>
    %cst_175 = arith.constant dense<0.000000e+00> : vector<8x512xf32>
    %532 = tpu.matmul %496, %16, %cst_175 {dimension_numbers = #tpu.dot_dimension_numbers<[1], [0], [0], [1], [0, 0, 1, 1], [], []>} : vector<8x128xf32>, vector<128x512xf32>, vector<8x512xf32> -> vector<8x512xf32>
    %533 = arith.addf %531, %532 : vector<8x512xf32>
    %534 = vector.extract_strided_slice %533 {offsets = [0, 0], sizes = [8, 128], strides = [1, 1]} : vector<8x512xf32> to vector<8x128xf32>
    %cst_176 = arith.constant 5.000000e-01 : f32
    %535 = vector.broadcast %cst_176 : f32 to vector<8x128xf32>
    %536 = arith.mulf %535, %534 : vector<8x128xf32>
    %537 = math.tanh %536 : vector<8x128xf32>
    %cst_177 = arith.constant 5.000000e-01 : f32
    %538 = vector.broadcast %cst_177 : f32 to vector<8x128xf32>
    %539 = arith.mulf %538, %537 : vector<8x128xf32>
    %cst_178 = arith.constant 5.000000e-01 : f32
    %540 = vector.broadcast %cst_178 : f32 to vector<8x128xf32>
    %541 = arith.addf %539, %540 : vector<8x128xf32>
    %542 = vector.extract_strided_slice %533 {offsets = [0, 128], sizes = [8, 128], strides = [1, 1]} : vector<8x512xf32> to vector<8x128xf32>
    %cst_179 = arith.constant 5.000000e-01 : f32
    %543 = vector.broadcast %cst_179 : f32 to vector<8x128xf32>
    %544 = arith.mulf %543, %542 : vector<8x128xf32>
    %545 = math.tanh %544 : vector<8x128xf32>
    %cst_180 = arith.constant 5.000000e-01 : f32
    %546 = vector.broadcast %cst_180 : f32 to vector<8x128xf32>
    %547 = arith.mulf %546, %545 : vector<8x128xf32>
    %cst_181 = arith.constant 5.000000e-01 : f32
    %548 = vector.broadcast %cst_181 : f32 to vector<8x128xf32>
    %549 = arith.addf %547, %548 : vector<8x128xf32>
    %550 = vector.extract_strided_slice %533 {offsets = [0, 256], sizes = [8, 128], strides = [1, 1]} : vector<8x512xf32> to vector<8x128xf32>
    %551 = math.tanh %550 : vector<8x128xf32>
    %552 = vector.extract_strided_slice %533 {offsets = [0, 384], sizes = [8, 128], strides = [1, 1]} : vector<8x512xf32> to vector<8x128xf32>
    %cst_182 = arith.constant 5.000000e-01 : f32
    %553 = vector.broadcast %cst_182 : f32 to vector<8x128xf32>
    %554 = arith.mulf %553, %552 : vector<8x128xf32>
    %555 = math.tanh %554 : vector<8x128xf32>
    %cst_183 = arith.constant 5.000000e-01 : f32
    %556 = vector.broadcast %cst_183 : f32 to vector<8x128xf32>
    %557 = arith.mulf %556, %555 : vector<8x128xf32>
    %cst_184 = arith.constant 5.000000e-01 : f32
    %558 = vector.broadcast %cst_184 : f32 to vector<8x128xf32>
    %559 = arith.addf %557, %558 : vector<8x128xf32>
    %560 = arith.mulf %549, %494 : vector<8x128xf32>
    %561 = arith.mulf %541, %551 : vector<8x128xf32>
    %562 = arith.addf %560, %561 : vector<8x128xf32>
    %563 = math.tanh %562 : vector<8x128xf32>
    %564 = arith.mulf %559, %563 : vector<8x128xf32>
    %c0_185 = arith.constant 0 : index
    %c0_186 = arith.constant 0 : index
    %565 = vector.load %arg15[%c0_185, %c0_186] : memref<8x128xf32, #tpu.memory_space<vmem>>, vector<8x128xf32>
    tpu.vector_store %arg15[%c0_185, %c0_186], %530 {strides = array<i32>} : memref<8x128xf32, #tpu.memory_space<vmem>>, vector<8x128xf32>,
    %c0_187 = arith.constant 0 : index
    %c0_188 = arith.constant 0 : index
    %566 = vector.load %arg16[%c0_187, %c0_188] : memref<8x128xf32, #tpu.memory_space<vmem>>, vector<8x128xf32>
    tpu.vector_store %arg16[%c0_187, %c0_188], %528 {strides = array<i32>} : memref<8x128xf32, #tpu.memory_space<vmem>>, vector<8x128xf32>,
    %c0_189 = arith.constant 0 : index
    %c0_190 = arith.constant 0 : index
    %567 = vector.load %arg17[%c0_189, %c0_190] : memref<8x128xf32, #tpu.memory_space<vmem>>, vector<8x128xf32>
    tpu.vector_store %arg17[%c0_189, %c0_190], %564 {strides = array<i32>} : memref<8x128xf32, #tpu.memory_space<vmem>>, vector<8x128xf32>,
    %c0_191 = arith.constant 0 : index
    %c0_192 = arith.constant 0 : index
    %568 = vector.load %arg18[%c0_191, %c0_192] : memref<8x128xf32, #tpu.memory_space<vmem>>, vector<8x128xf32>
    tpu.vector_store %arg18[%c0_191, %c0_192], %562 {strides = array<i32>} : memref<8x128xf32, #tpu.memory_space<vmem>>, vector<8x128xf32>,
    %c0_i32_193 = arith.constant 0 : i32
    %569 = arith.cmpi eq, %arg0, %c0_i32_193 : i32
    %570 = arith.extui %569 : i1 to i32
    %c0_i32_194 = arith.constant 0 : i32
    %571 = arith.cmpi ne, %570, %c0_i32_194 : i32
    scf.if %571 {
      %c0_195 = arith.constant 0 : index
      %c0_196 = arith.constant 0 : index
      %572 = vector.load %arg9[%c0_195, %c0_196] : memref<128x128xf32, #tpu.memory_space<vmem>>, vector<128x128xf32>
      %cst_197 = arith.constant dense<0.000000e+00> : vector<8x128xf32>
      %573 = tpu.matmul %530, %572, %cst_197 {dimension_numbers = #tpu.dot_dimension_numbers<[1], [0], [0], [1], [0, 0, 1, 1], [], []>} : vector<8x128xf32>, vector<128x128xf32>, vector<8x128xf32> -> vector<8x128xf32>
      %c0_198 = arith.constant 0 : index
      %c0_199 = arith.constant 0 : index
      %574 = vector.load %arg10[%c0_198, %c0_199] : memref<128x128xf32, #tpu.memory_space<vmem>>, vector<128x128xf32>
      %cst_200 = arith.constant dense<0.000000e+00> : vector<8x128xf32>
      %575 = tpu.matmul %564, %574, %cst_200 {dimension_numbers = #tpu.dot_dimension_numbers<[1], [0], [0], [1], [0, 0, 1, 1], [], []>} : vector<8x128xf32>, vector<128x128xf32>, vector<8x128xf32> -> vector<8x128xf32>
      %576 = arith.addf %573, %575 : vector<8x128xf32>
      %c0_201 = arith.constant 0 : index
      %c0_202 = arith.constant 0 : index
      %577 = vector.load %arg11[%c0_201, %c0_202] : memref<1x128xf32, #tpu.memory_space<vmem>>, vector<1x128xf32>
      %578 = vector.broadcast %577 : vector<1x128xf32> to vector<8x128xf32>
      %579 = arith.addf %576, %578 : vector<8x128xf32>
      %cst_203 = arith.constant 0.000000e+00 : f32
      %580 = vector.broadcast %cst_203 : f32 to vector<8x128xf32>
      %581 = arith.maximumf %579, %580 : vector<8x128xf32>
      %c0_204 = arith.constant 0 : index
      %c0_205 = arith.constant 0 : index
      %582 = vector.load %arg12[%c0_204, %c0_205] : memref<128x128xf32, #tpu.memory_space<vmem>>, vector<128x128xf32>
      %cst_206 = arith.constant dense<0.000000e+00> : vector<8x128xf32>
      %583 = tpu.matmul %581, %582, %cst_206 {dimension_numbers = #tpu.dot_dimension_numbers<[1], [0], [0], [1], [0, 0, 1, 1], [], []>} : vector<8x128xf32>, vector<128x128xf32>, vector<8x128xf32> -> vector<8x128xf32>
      %c0_207 = arith.constant 0 : index
      %c0_208 = arith.constant 0 : index
      %584 = vector.load %arg13[%c0_207, %c0_208] : memref<1x128xf32, #tpu.memory_space<vmem>>, vector<1x128xf32>
      %585 = vector.broadcast %584 : vector<1x128xf32> to vector<8x128xf32>
      %586 = arith.addf %583, %585 : vector<8x128xf32>
      %c0_209 = arith.constant 0 : index
      %c0_210 = arith.constant 0 : index
      %587 = vector.load %arg14[%c0_209, %c0_210] : memref<8x128xf32, #tpu.memory_space<vmem>>, vector<8x128xf32>
      tpu.vector_store %arg14[%c0_209, %c0_210], %586 {strides = array<i32>} : memref<8x128xf32, #tpu.memory_space<vmem>>, vector<8x128xf32>,
    } else {
    }
    return
  }
  func.func @transform_0(%arg0: i32) -> (i32, i32) {
    %c0_i32 = arith.constant 0 : i32
    %c0_i32_0 = arith.constant 0 : i32
    return %arg0, %c0_i32 : i32, i32
  }
  func.func @transform_1(%arg0: i32) -> (i32, i32) {
    %c0_i32 = arith.constant 0 : i32
    %0 = arith.subi %c0_i32, %arg0 : i32
    %c0_i32_0 = arith.constant 0 : i32
    %c0_i32_1 = arith.constant 0 : i32
    return %0, %c0_i32_0 : i32, i32
  }
  func.func @transform_2(%arg0: i32) -> (i32, i32) {
    %c0_i32 = arith.constant 0 : i32
    %c0_i32_0 = arith.constant 0 : i32
    %c0_i32_1 = arith.constant 0 : i32
    return %c0_i32, %c0_i32_0 : i32, i32
  }
  func.func @transform_3(%arg0: i32) -> (i32, i32) {
    %c0_i32 = arith.constant 0 : i32
    %c0_i32_0 = arith.constant 0 : i32
    %c0_i32_1 = arith.constant 0 : i32
    return %c0_i32, %c0_i32_0 : i32, i32
  }
  func.func @transform_4(%arg0: i32) -> (i32, i32) {
    %c0_i32 = arith.constant 0 : i32
    %c0_i32_0 = arith.constant 0 : i32
    %c0_i32_1 = arith.constant 0 : i32
    return %c0_i32, %c0_i32_0 : i32, i32
  }
  func.func @transform_5(%arg0: i32) -> (i32, i32) {
    %c0_i32 = arith.constant 0 : i32
    %c0_i32_0 = arith.constant 0 : i32
    %c0_i32_1 = arith.constant 0 : i32
    return %c0_i32, %c0_i32_0 : i32, i32
  }
  func.func @transform_6(%arg0: i32) -> (i32, i32) {
    %c0_i32 = arith.constant 0 : i32
    %c0_i32_0 = arith.constant 0 : i32
    %c0_i32_1 = arith.constant 0 : i32
    return %c0_i32, %c0_i32_0 : i32, i32
  }
  func.func @transform_7(%arg0: i32) -> (i32, i32) {
    %c0_i32 = arith.constant 0 : i32
    %c0_i32_0 = arith.constant 0 : i32
    %c0_i32_1 = arith.constant 0 : i32
    return %c0_i32, %c0_i32_0 : i32, i32
  }
  func.func @transform_8(%arg0: i32) -> (i32, i32) {
    %c0_i32 = arith.constant 0 : i32
    %c0_i32_0 = arith.constant 0 : i32
    %c0_i32_1 = arith.constant 0 : i32
    return %c0_i32, %c0_i32_0 : i32, i32
  }
  func.func @transform_9(%arg0: i32) -> (i32, i32) {
    %c0_i32 = arith.constant 0 : i32
    %c0_i32_0 = arith.constant 0 : i32
    %c0_i32_1 = arith.constant 0 : i32
    return %c0_i32, %c0_i32_0 : i32, i32
  }
  func.func @transform_10(%arg0: i32) -> (i32, i32) {
    %c0_i32 = arith.constant 0 : i32
    %c0_i32_0 = arith.constant 0 : i32
    %c0_i32_1 = arith.constant 0 : i32
    return %c0_i32, %c0_i32_0 : i32, i32
  }
  func.func @transform_11(%arg0: i32) -> (i32, i32) {
    %c0_i32 = arith.constant 0 : i32
    %c0_i32_0 = arith.constant 0 : i32
    %c0_i32_1 = arith.constant 0 : i32
    return %c0_i32, %c0_i32_0 : i32, i32
  }
  func.func @transform_12(%arg0: i32) -> (i32, i32) {
    %c0_i32 = arith.constant 0 : i32
    %c0_i32_0 = arith.constant 0 : i32
    %c0_i32_1 = arith.constant 0 : i32
    return %c0_i32, %c0_i32_0 : i32, i32
  }
  func.func @transform_13(%arg0: i32) -> (i32, i32) {
    %c0_i32 = arith.constant 0 : i32
    %c0_i32_0 = arith.constant 0 : i32
    %c0_i32_1 = arith.constant 0 : i32
    return %c0_i32, %c0_i32_0 : i32, i32
  }
}

</mosaic_0001>

<bundles_post_ra>
// kernel: tpu_custom_call.1
= control target key start
LH: loop header
LB: loop body
LE: loop exit
PB: predicated region body
PF: predicated region fallthrough
CT: control target
= control target key end

     0   :  { %18 = vsyncpa [#allocation7], 0  ;;  %s6919_s0 = inlined_call_operand.hbm [shape: f32[64,128], index: 0, kind: input, shape index: {}]   ;;  %s6920_s1 = inlined_call_operand.hbm [shape: f32[64,128], index: 1, kind: input, shape index: {}]   ;;  %s6921_s2 = inlined_call_operand.hbm [shape: f32[128,512], index: 2, kind: input, shape index: {}]   ;;  %s6922_s3 = inlined_call_operand.hbm [shape: f32[128,512], index: 3, kind: input, shape index: {}]   ;;  %s6923_s4 = inlined_call_operand.vmem [shape: f32[1,512], index: 4, kind: input, shape index: {}]   ;;  %s6924_s5 = inlined_call_operand.hbm [shape: f32[128,512], index: 5, kind: input, shape index: {}]   ;;  %s6925_s6 = inlined_call_operand.hbm [shape: f32[128,512], index: 6, kind: input, shape index: {}]   ;;  %s6926_s7 = inlined_call_operand.vmem [shape: f32[1,512], index: 7, kind: input, shape index: {}]   ;;  %s6927_s8 = inlined_call_operand.hbm [shape: f32[128,128], index: 8, kind: input, shape index: {}]   ;;  %s6928_s9 = inlined_call_operand.hbm [shape: f32[128,128], index: 9, kind: input, shape index: {}]   ;;  %s6929_s10 = inlined_call_operand.vmem [shape: f32[1,128], index: 10, kind: input, shape index: {}]   ;;  %s6930_s11 = inlined_call_operand.hbm [shape: f32[128,128], index: 11, kind: input, shape index: {}]   ;;  %s6931_s12 = inlined_call_operand.vmem [shape: f32[1,128], index: 12, kind: input, shape index: {}]   ;;  %s6932_s13 = inlined_call_operand.hbm [shape: f32[8,128], index: 13, kind: output, shape index: {}]  }
   0x1   :  { %19 = vsyncpa [#allocation10], 0 }
   0x2   :  { %20 = vsyncpa [#allocation13], 0 }
   0x3   :  { %21 = vsyncpa [#allocation16], 0 }
   0x4   :  { %22 = vsyncpa [#allocation19], 0 }
   0x5   :  { %23 = vsyncpa [#allocation8], 0  ;;  %s5799_s25 = smov [#allocation9]   ;;  %s5567_s29 = scalar_lea.hbm %s6920_s1, 1024 }
   0x6   :  { %s45_s26 = sshll.u32 %s5799_s25, 4  ;;  %p5568_p0 = scmp.ne.s32.totalorder %s6920_s1, %s5567_s29  ;;  %s46_s26 = int_to_ptr.vmem [resolvable:$true] %s45_s26 }
   0x7   :  { %p5571_p1 = scmp.lt.u32.totalorder %s5567_s29, %s6920_s1 }
   0x9   :  { %p5573_p2 = pnand %p5571_p1, %p5568_p0 }
   0xb   :  { %5576 = shalt.err (!%p5573_p2)
}
   0xc   :  { %s5577_s17 = scalar_lea.vmem %s46_s26, 1024  ;;  %p5582_p4 = scmp.lt.s32.totalorder %s46_s26, %s46_s26 }
   0xd   :  { %p5578_p3 = scmp.ne.s32.totalorder %s46_s26, %s5577_s17  ;;  %p5583_p5 = scmp.lt.s32.totalorder %s5577_s17, %s5577_s17 }
   0xf   :  { %p5584_p6 = por %p5583_p5, %p5582_p4 }
  0x11   :  { %p5585_p7 = pnand %p5584_p6, %p5578_p3 }
  0x13   :  { %5588 = shalt.err (!%p5585_p7)
}
  0x14   :  { %s5800_s18 = smov 128   ;;  %s5801_s19 = smov 8  }
  0x15   :  { %51 = dma.hbm_to_vmem [thread:$0]  %s6920_s1, 1024, %s46_s26, [#allocation10], %s5800_s18, %s5800_s18, %s5801_s19  }
  0x16   :  { %s5802_s22 = smov [#allocation12]   ;;  %s5803_s24 = smov [#allocation15]  }
  0x17   :  { %s69_s23 = sshll.u32 %s5802_s22, 4  ;;  %s95_s25 = sshll.u32 %s5803_s24, 4  ;;  %s70_s23 = int_to_ptr.vmem [resolvable:$true] %s69_s23  ;;  %s96_s25 = int_to_ptr.vmem [resolvable:$true] %s95_s25 }
  0x18   :  { %s5589_s29 = scalar_lea.hbm %s6922_s3, 8192 }
  0x19   :  { %p5590_p8 = scmp.ne.s32.totalorder %s6922_s3, %s5589_s29  ;;  %p5593_p9 = scmp.lt.u32.totalorder %s5589_s29, %s6922_s3 }
  0x1b   :  { %p5595_p10 = pnand %p5593_p9, %p5590_p8 }
  0x1d   :  { %5598 = shalt.err (!%p5595_p10)
}
  0x1e   :  { %s5599_s1 = scalar_lea.vmem %s70_s23, 8192  ;;  %p5604_p12 = scmp.lt.s32.totalorder %s70_s23, %s70_s23 }
  0x1f   :  { %p5600_p11 = scmp.ne.s32.totalorder %s70_s23, %s5599_s1  ;;  %p5605_p13 = scmp.lt.s32.totalorder %s5599_s1, %s5599_s1 }
  0x21   :  { %p5606_p0 = por %p5605_p13, %p5604_p12 }
  0x23   :  { %p5607_p1 = pnand %p5606_p0, %p5600_p11 }
  0x25   :  { %5610 = shalt.err (!%p5607_p1)
}
  0x26   :  { %s5804_s26 = smov 512   ;;  %s5805_s17 = smov 32  }
  0x27   :  { %75 = dma.hbm_to_vmem [thread:$0]  %s6922_s3, 8192, %s70_s23, [#allocation13], %s5804_s26, %s5804_s26, %s5805_s17  }
  0x28   :  { %s5611_s27 = scalar_lea.hbm %s6925_s6, 8192 }
  0x29   :  { %p5612_p2 = scmp.ne.s32.totalorder %s6925_s6, %s5611_s27  ;;  %p5615_p3 = scmp.lt.u32.totalorder %s5611_s27, %s6925_s6 }
  0x2b   :  { %p5617_p4 = pnand %p5615_p3, %p5612_p2 }
  0x2d   :  { %5620 = shalt.err (!%p5617_p4)
}
  0x2e   :  { %s5621_s15 = scalar_lea.vmem %s96_s25, 8192  ;;  %p5626_p6 = scmp.lt.s32.totalorder %s96_s25, %s96_s25 }
  0x2f   :  { %p5622_p5 = scmp.ne.s32.totalorder %s96_s25, %s5621_s15  ;;  %p5627_p7 = scmp.lt.s32.totalorder %s5621_s15, %s5621_s15 }
  0x31   :  { %p5628_p8 = por %p5627_p7, %p5626_p6 }
  0x33   :  { %p5629_p9 = pnand %p5628_p8, %p5622_p5 }
  0x35   :  { %5632 = shalt.err (!%p5629_p9)
}
  0x36   :  { %101 = dma.hbm_to_vmem [thread:$0]  %s6925_s6, 8192, %s96_s25, [#allocation16], %s5804_s26, %s5804_s26, %s5805_s17  }
  0x37   :  { %s5806_s16 = smov [#allocation18]   ;;  %s5807_s20 = smov [#allocation6]  }
  0x38   :  { %s121_s1 = sshll.u32 %s5806_s16, 4  ;;  %s29_s21 = sshll.u32 %s5807_s20, 4  ;;  %s122_s1 = int_to_ptr.vmem [resolvable:$true] %s121_s1  ;;  %s30_s21 = int_to_ptr.vmem [resolvable:$true] %s29_s21 }
  0x39   :  { %s5633_s27 = scalar_lea.hbm %s6928_s9, 2048 }
  0x3a   :  { %p5634_p10 = scmp.ne.s32.totalorder %s6928_s9, %s5633_s27  ;;  %p5637_p11 = scmp.lt.u32.totalorder %s5633_s27, %s6928_s9 }
  0x3c   :  { %p5639_p12 = pnand %p5637_p11, %p5634_p10 }
  0x3e   :  { %5642 = shalt.err (!%p5639_p12)
}
  0x3f   :  { %s5643_s6 = scalar_lea.vmem %s122_s1, 2048  ;;  %p5648_p0 = scmp.lt.s32.totalorder %s122_s1, %s122_s1 }
  0x40   :  { %p5644_p13 = scmp.ne.s32.totalorder %s122_s1, %s5643_s6  ;;  %p5649_p1 = scmp.lt.s32.totalorder %s5643_s6, %s5643_s6 }
  0x42   :  { %p5650_p2 = por %p5649_p1, %p5648_p0 }
  0x44   :  { %p5651_p3 = pnand %p5650_p2, %p5644_p13 }
  0x46   :  { %5654 = shalt.err (!%p5651_p3)
}
  0x47   :  { %127 = dma.hbm_to_vmem [thread:$0]  %s6928_s9, 2048, %s122_s1, [#allocation19], %s5800_s18, %s5800_s18, %s5801_s19  }
  0x48   :  { %s5655_s16 = scalar_lea.hbm %s6919_s0, 1024 }
  0x49   :  { %p5656_p4 = scmp.ne.s32.totalorder %s6919_s0, %s5655_s16  ;;  %p5659_p5 = scmp.lt.u32.totalorder %s5655_s16, %s6919_s0 }
  0x4b   :  { %p5661_p6 = pnand %p5659_p5, %p5656_p4 }
  0x4d   :  { %5664 = shalt.err (!%p5661_p6)
}
  0x4e   :  { %s5665_s28 = scalar_lea.vmem %s30_s21, 1024  ;;  %p5670_p8 = scmp.lt.s32.totalorder %s30_s21, %s30_s21 }
  0x4f   :  { %p5666_p7 = scmp.ne.s32.totalorder %s30_s21, %s5665_s28  ;;  %p5671_p9 = scmp.lt.s32.totalorder %s5665_s28, %s5665_s28 }
  0x51   :  { %p5672_p10 = por %p5671_p9, %p5670_p8 }
  0x53   :  { %p5673_p11 = pnand %p5672_p10, %p5666_p7 }
  0x55   :  { %5676 = shalt.err (!%p5673_p11)
}
  0x56   :  { %35 = dma.hbm_to_vmem [thread:$0]  %s6919_s0, 1024, %s30_s21, [#allocation7], %s5800_s18, %s5800_s18, %s5801_s19  }
  0x57   :  { %s5808_s29 = smov [#allocation11]   ;;  %s5809_s14 = smov [#allocation14]  }
  0x58   :  { %s57_s30 = sshll.u32 %s5808_s29, 4  ;;  %s83_s6 = sshll.u32 %s5809_s14, 4  ;;  %s58_s30 = int_to_ptr.vmem [resolvable:$true] %s57_s30  ;;  %s84_s6 = int_to_ptr.vmem [resolvable:$true] %s83_s6 }
  0x59   :  { %s5677_s3 = scalar_lea.hbm %s6921_s2, 8192 }
  0x5a   :  { %p5678_p12 = scmp.ne.s32.totalorder %s6921_s2, %s5677_s3  ;;  %p5681_p13 = scmp.lt.u32.totalorder %s5677_s3, %s6921_s2 }
  0x5c   :  { %p5683_p0 = pnand %p5681_p13, %p5678_p12 }
  0x5e   :  { %5686 = shalt.err (!%p5683_p0)
}
  0x5f   :  { %s5687_s0 = scalar_lea.vmem %s58_s30, 8192  ;;  %p5692_p2 = scmp.lt.s32.totalorder %s58_s30, %s58_s30 }
  0x60   :  { %p5688_p1 = scmp.ne.s32.totalorder %s58_s30, %s5687_s0  ;;  %p5693_p3 = scmp.lt.s32.totalorder %s5687_s0, %s5687_s0 }
  0x62   :  { %p5694_p4 = por %p5693_p3, %p5692_p2 }
  0x64   :  { %p5695_p5 = pnand %p5694_p4, %p5688_p1 }
  0x66   :  { %5698 = shalt.err (!%p5695_p5)
}
  0x67   :  { %63 = dma.hbm_to_vmem [thread:$0]  %s6921_s2, 8192, %s58_s30, [#allocation10], %s5804_s26, %s5804_s26, %s5805_s17  }
  0x68   :  { %s5699_s9 = scalar_lea.hbm %s6924_s5, 8192 }
  0x69   :  { %p5700_p6 = scmp.ne.s32.totalorder %s6924_s5, %s5699_s9  ;;  %p5703_p7 = scmp.lt.u32.totalorder %s5699_s9, %s6924_s5 }
  0x6b   :  { %p5705_p8 = pnand %p5703_p7, %p5700_p6 }
  0x6d   :  { %5708 = shalt.err (!%p5705_p8)
}
  0x6e   :  { %s5709_s15 = scalar_lea.vmem %s84_s6, 8192  ;;  %p5714_p10 = scmp.lt.s32.totalorder %s84_s6, %s84_s6 }
  0x6f   :  { %p5710_p9 = scmp.ne.s32.totalorder %s84_s6, %s5709_s15  ;;  %p5715_p11 = scmp.lt.s32.totalorder %s5709_s15, %s5709_s15 }
  0x71   :  { %p5716_p12 = por %p5715_p11, %p5714_p10 }
  0x73   :  { %p5717_p13 = pnand %p5716_p12, %p5710_p9 }
  0x75   :  { %5720 = shalt.err (!%p5717_p13)
}
  0x76   :  { %89 = dma.hbm_to_vmem [thread:$0]  %s6924_s5, 8192, %s84_s6, [#allocation13], %s5804_s26, %s5804_s26, %s5805_s17  }
  0x77   :  { %s5810_s3 = smov [#allocation17]   ;;  %s5811_s16 = smov [#allocation20]  }
  0x78   :  { %s109_s23 = sshll.u32 %s5810_s3, 4  ;;  %s135_s20 = sshll.u32 %s5811_s16, 4  ;;  %s110_s23 = int_to_ptr.vmem [resolvable:$true] %s109_s23  ;;  %s136_s20 = int_to_ptr.vmem [resolvable:$true] %s135_s20 }
  0x79   :  { %s5721_s21 = scalar_lea.hbm %s6927_s8, 2048 }
  0x7a   :  { %p5722_p0 = scmp.ne.s32.totalorder %s6927_s8, %s5721_s21  ;;  %p5725_p1 = scmp.lt.u32.totalorder %s5721_s21, %s6927_s8 }
  0x7c   :  { %p5727_p2 = pnand %p5725_p1, %p5722_p0 }
  0x7e   :  { %5730 = shalt.err (!%p5727_p2)
}
  0x7f   :  { %s5731_s5 = scalar_lea.vmem %s110_s23, 2048  ;;  %p5736_p4 = scmp.lt.s32.totalorder %s110_s23, %s110_s23 }
  0x80   :  { %p5732_p3 = scmp.ne.s32.totalorder %s110_s23, %s5731_s5  ;;  %p5737_p5 = scmp.lt.s32.totalorder %s5731_s5, %s5731_s5 }
  0x82   :  { %p5738_p6 = por %p5737_p5, %p5736_p4 }
  0x84   :  { %p5739_p7 = pnand %p5738_p6, %p5732_p3 }
  0x86   :  { %5742 = shalt.err (!%p5739_p7)
}
  0x87   :  { %115 = dma.hbm_to_vmem [thread:$0]  %s6927_s8, 2048, %s110_s23, [#allocation16], %s5800_s18, %s5800_s18, %s5801_s19  }
  0x88   :  { %s5743_s29 = scalar_lea.hbm %s6930_s11, 2048 }
  0x89   :  { %p5744_p8 = scmp.ne.s32.totalorder %s6930_s11, %s5743_s29  ;;  %p5747_p9 = scmp.lt.u32.totalorder %s5743_s29, %s6930_s11 }
  0x8b   :  { %p5749_p10 = pnand %p5747_p9, %p5744_p8 }
  0x8d   :  { %5752 = shalt.err (!%p5749_p10)
}
  0x8e   :  { %s5753_s30 = scalar_lea.vmem %s136_s20, 2048  ;;  %p5758_p12 = scmp.lt.s32.totalorder %s136_s20, %s136_s20 }
  0x8f   :  { %p5754_p11 = scmp.ne.s32.totalorder %s136_s20, %s5753_s30  ;;  %p5759_p13 = scmp.lt.s32.totalorder %s5753_s30, %s5753_s30 }
  0x91   :  { %p5760_p0 = por %p5759_p13, %p5758_p12 }
  0x93   :  { %p5761_p1 = pnand %p5760_p0, %p5754_p11 }
  0x95   :  { %5764 = shalt.err (!%p5761_p1)
}
  0x96   :  { %141 = dma.hbm_to_vmem [thread:$0]  %s6930_s11, 2048, %s136_s20, [#allocation19], %s5800_s18, %s5800_s18, %s5801_s19  }
  0x97   :  { %5787 = dma.done.wait [#allocation7], 1024  }
  0x98   :  { %5788 = vsyncadd [#allocation7], 4294966272 }
  0x99   :  { %5789 = dma.done.wait [#allocation10], 9216  }
  0x9a   :  { %5790 = vsyncadd [#allocation10], 4294958080 }
  0x9b   :  { %5791 = dma.done.wait [#allocation13], 16384  }
  0x9c   :  { %5792 = vsyncadd [#allocation13], 4294950912 }
  0x9d   :  { %5793 = dma.done.wait [#allocation16], 10240  }
  0x9e   :  { %5794 = vsyncadd [#allocation16], 4294957056 }
  0x9f   :  { %5795 = dma.done.wait [#allocation19], 4096  }
  0xa0   :  { %5796 = vsyncadd [#allocation19], 4294963200  ;;  %v6933_v0 = vmov 0.0   ;;  %v190_v1 = vld [vmem:[#allocation11 + $0x8] sm:$0xff]  ;;  %v192_v3 = vld [vmem:[#allocation11 + $0x18] sm:$0xff]  ;;  %vm5814_vm0 = vmmov 0  }
  0xa1   :  { %339 = vmatprep.mubr.f32.mxu0 %v6933_v0  ;;  %452 = vmatprep.mubr.f32.mxu1 %v6933_v0  ;;  %v194_v2 = vld [vmem:[#allocation11 + $0x28] sm:$0xff]  ;;  %v196_v5 = vld [vmem:[#allocation11 + $0x38] sm:$0xff]  ;;  %v189_v6 = vld [vmem:[#allocation11] sm:$0xff]  ;;  %s5815_s22 = smov [#allocation21]  }
  0xa2   :  { %v4038_v4 = vpack.c.bf16 %v194_v2, %v190_v1  ;;  %v193_v7 = vld [vmem:[#allocation11 + $0x20] sm:$0xff]  ;;  %v4070_v8 = vpack.c.bf16 %v196_v5, %v192_v3  ;;  %v191_v10 = vld [vmem:[#allocation11 + $0x10] sm:$0xff]  ;;  %v198_v12 = vld [vmem:[#allocation11 + $0x48] sm:$0xff]  ;;  %s3865_s0 = sshll.u32 %s5815_s22, 4  ;;  %s3866_s0 = int_to_ptr.vmem [resolvable:$true] %s3865_s0 }
  0xa3   :  { %v4040_v9 = vpack.c.bf16 %v193_v7, %v189_v6  ;;  %v195_v11 = vld [vmem:[#allocation11 + $0x30] sm:$0xff]  ;;  %v202_v14 = vld [vmem:[#allocation11 + $0x68] sm:$0xff]  ;;  %v200_v15 = vld [vmem:[#allocation11 + $0x58] sm:$0xff]  ;;  %s5765_s21 = scalar_lea.vmem %s3866_s0, 128  ;;  %p5770_p3 = scmp.lt.s32.totalorder %s3866_s0, %s3866_s0 }
  0xa4   :  { %4039 = vmatprep.subr.bf16.mxu0 %v4038_v4  ;;  %v4072_v13 = vpack.c.bf16 %v195_v11, %v191_v10  ;;  %v204_v16 = vld [vmem:[#allocation11 + $0x78] sm:$0xff]  ;;  %4071 = vmatprep.subr.bf16.mxu1 %v4070_v8  ;;  %v4042_v17 = vpack.c.bf16 %v202_v14, %v198_v12  ;;  %v197_v19 = vld [vmem:[#allocation11 + $0x40] sm:$0xff]  ;;  %v199_v21 = vld [vmem:[#allocation11 + $0x50] sm:$0xff]  ;;  %p5766_p2 = scmp.ne.s32.totalorder %s3866_s0, %s5765_s21  ;;  %p5771_p4 = scmp.lt.s32.totalorder %s5765_s21, %s5765_s21 }
  0xa5   :  { %4041 = vmatpush1.bf16.msra.mxu0 %v4040_v9  ;;  %v4074_v18 = vpack.c.bf16 %v204_v16, %v200_v15  ;;  %v201_v20 = vld [vmem:[#allocation11 + $0x60] sm:$0xff]  ;;  %v203_v23 = vld [vmem:[#allocation11 + $0x70] sm:$0xff]  ;;  %v206_v24 = vld [vmem:[#allocation11 + $0x88] sm:$0xff] }
  0xa6   :  { %4073 = vmatpush1.bf16.msra.mxu1 %v4072_v13  ;;  %v4044_v22 = vpack.c.bf16 %v201_v20, %v197_v19  ;;  %v210_v25 = vld [vmem:[#allocation11 + $0xa8] sm:$0xff]  ;;  %4043 = vmatprep.subr.bf16.mxu0 %v4042_v17  ;;  %v4076_v26 = vpack.c.bf16 %v203_v23, %v199_v21  ;;  %v208_v28 = vld [vmem:[#allocation11 + $0x98] sm:$0xff]  ;;  %v205_v30 = vld [vmem:[#allocation11 + $0x80] sm:$0xff]  ;;  %p5772_p5 = por %p5771_p4, %p5770_p3 }
  0xa7   :  { %4075 = vmatprep.subr.bf16.mxu1 %v4074_v18  ;;  %v4046_v27 = vpack.c.bf16 %v210_v25, %v206_v24  ;;  %v212_v29 = vld [vmem:[#allocation11 + $0xb8] sm:$0xff]  ;;  %v209_v32 = vld [vmem:[#allocation11 + $0xa0] sm:$0xff]  ;;  %v207_v33 = vld [vmem:[#allocation11 + $0x90] sm:$0xff] }
  0xa8   :  { %v4078_v31 = vpack.c.bf16 %v212_v29, %v208_v28  ;;  %v211_v34 = vld [vmem:[#allocation11 + $0xb0] sm:$0xff]  ;;  %v4048_v35 = vpack.c.bf16 %v209_v32, %v205_v30  ;;  %v214_v36 = vld [vmem:[#allocation11 + $0xc8] sm:$0xff]  ;;  %v216_v38 = vld [vmem:[#allocation11 + $0xd8] sm:$0xff]  ;;  %p5773_p6 = pnand %p5772_p5, %p5766_p2 }
  0xa9   :  { %4045 = vmatpush1.bf16.msra.mxu0 %v4044_v22  ;;  %v218_v37 = vld [vmem:[#allocation11 + $0xe8] sm:$0xff]  ;;  %v4080_v39 = vpack.c.bf16 %v211_v34, %v207_v33  ;;  %v220_v41 = vld [vmem:[#allocation11 + $0xf8] sm:$0xff]  ;;  %v213_v42 = vld [vmem:[#allocation11 + $0xc0] sm:$0xff] }
  0xaa   :  { %4077 = vmatpush1.bf16.msra.mxu1 %v4076_v26  ;;  %4047 = vmatprep.subr.bf16.mxu0 %v4046_v27  ;;  %v4050_v40 = vpack.c.bf16 %v218_v37, %v214_v36  ;;  %v217_v43 = vld [vmem:[#allocation11 + $0xe0] sm:$0xff]  ;;  %v4082_v44 = vpack.c.bf16 %v220_v41, %v216_v38  ;;  %v215_v45 = vld [vmem:[#allocation11 + $0xd0] sm:$0xff]  ;;  %v222_v47 = vld [vmem:[#allocation11 + $0x108] sm:$0xff] }
  0xab   :  { %4079 = vmatprep.subr.bf16.mxu1 %v4078_v31  ;;  %v219_v46 = vld [vmem:[#allocation11 + $0xf0] sm:$0xff]  ;;  %v226_v48 = vld [vmem:[#allocation11 + $0x128] sm:$0xff]  ;;  %v224_v49 = vld [vmem:[#allocation11 + $0x118] sm:$0xff]  ;;  %v4052_v51 = vpack.c.bf16 %v217_v43, %v213_v42 }
  0xac   :  { %v228_v50 = vld [vmem:[#allocation11 + $0x138] sm:$0xff]  ;;  %v4084_v52 = vpack.c.bf16 %v219_v46, %v215_v45  ;;  %v4054_v53 = vpack.c.bf16 %v226_v48, %v222_v47  ;;  %v221_v54 = vld [vmem:[#allocation11 + $0x100] sm:$0xff]  ;;  %v223_v56 = vld [vmem:[#allocation11 + $0x110] sm:$0xff] }
  0xad   :  { %4049 = vmatpush1.bf16.msra.mxu0 %v4048_v35  ;;  %v225_v55 = vld [vmem:[#allocation11 + $0x120] sm:$0xff]  ;;  %v4086_v57 = vpack.c.bf16 %v228_v50, %v224_v49  ;;  %v227_v58 = vld [vmem:[#allocation11 + $0x130] sm:$0xff]  ;;  %v230_v59 = vld [vmem:[#allocation11 + $0x148] sm:$0xff] }
  0xae   :  { %4081 = vmatpush1.bf16.msra.mxu1 %v4080_v39  ;;  %4051 = vmatprep.subr.bf16.mxu0 %v4050_v40  ;;  %v234_v60 = vld [vmem:[#allocation11 + $0x168] sm:$0xff]  ;;  %v232_v61 = vld [vmem:[#allocation11 + $0x158] sm:$0xff]  ;;  %v4056_v63 = vpack.c.bf16 %v225_v55, %v221_v54  ;;  %v4088_v1 = vpack.c.bf16 %v227_v58, %v223_v56  ;;  %v229_v3 = vld [vmem:[#allocation11 + $0x140] sm:$0xff] }
  0xaf   :  { %4083 = vmatprep.subr.bf16.mxu1 %v4082_v44  ;;  %v236_v62 = vld [vmem:[#allocation11 + $0x178] sm:$0xff]  ;;  %v4058_v2 = vpack.c.bf16 %v234_v60, %v230_v59  ;;  %v233_v4 = vld [vmem:[#allocation11 + $0x160] sm:$0xff]  ;;  %v231_v5 = vld [vmem:[#allocation11 + $0x150] sm:$0xff] }
  0xb0   :  { %v4090_v6 = vpack.c.bf16 %v236_v62, %v232_v61  ;;  %v235_v7 = vld [vmem:[#allocation11 + $0x170] sm:$0xff]  ;;  %v238_v8 = vld [vmem:[#allocation11 + $0x188] sm:$0xff]  ;;  %v240_v10 = vld [vmem:[#allocation11 + $0x198] sm:$0xff]  ;;  %v4060_v12 = vpack.c.bf16 %v233_v4, %v229_v3 }
  0xb1   :  { %4053 = vmatpush1.bf16.msra.mxu0 %v4052_v51  ;;  %v242_v9 = vld [vmem:[#allocation11 + $0x1a8] sm:$0xff]  ;;  %v244_v11 = vld [vmem:[#allocation11 + $0x1b8] sm:$0xff]  ;;  %v4092_v13 = vpack.c.bf16 %v235_v7, %v231_v5  ;;  %v237_v15 = vld [vmem:[#allocation11 + $0x180] sm:$0xff] }
  0xb2   :  { %4085 = vmatpush1.bf16.msra.mxu1 %v4084_v52  ;;  %4055 = vmatprep.subr.bf16.mxu0 %v4054_v53  ;;  %v4062_v14 = vpack.c.bf16 %v242_v9, %v238_v8  ;;  %v241_v16 = vld [vmem:[#allocation11 + $0x1a0] sm:$0xff]  ;;  %v239_v17 = vld [vmem:[#allocation11 + $0x190] sm:$0xff]  ;;  %v4094_v18 = vpack.c.bf16 %v244_v11, %v240_v10  ;;  %v246_v20 = vld [vmem:[#allocation11 + $0x1c8] sm:$0xff] }
  0xb3   :  { %4087 = vmatprep.subr.bf16.mxu1 %v4086_v57  ;;  %v243_v19 = vld [vmem:[#allocation11 + $0x1b0] sm:$0xff]  ;;  %v250_v21 = vld [vmem:[#allocation11 + $0x1e8] sm:$0xff]  ;;  %v248_v22 = vld [vmem:[#allocation11 + $0x1d8] sm:$0xff]  ;;  %v4064_v24 = vpack.c.bf16 %v241_v16, %v237_v15 }
  0xb4   :  { %v252_v23 = vld [vmem:[#allocation11 + $0x1f8] sm:$0xff]  ;;  %v4096_v25 = vpack.c.bf16 %v243_v19, %v239_v17  ;;  %v4066_v26 = vpack.c.bf16 %v250_v21, %v246_v20  ;;  %v245_v27 = vld [vmem:[#allocation11 + $0x1c0] sm:$0xff]  ;;  %v247_v29 = vld [vmem:[#allocation11 + $0x1d0] sm:$0xff] }
  0xb5   :  { %4057 = vmatpush1.bf16.msra.mxu0 %v4056_v63  ;;  %v249_v28 = vld [vmem:[#allocation11 + $0x1e0] sm:$0xff]  ;;  %v4098_v30 = vpack.c.bf16 %v252_v23, %v248_v22  ;;  %v251_v31 = vld [vmem:[#allocation11 + $0x1f0] sm:$0xff]  ;;  %v510_v32 = vld [vmem:[#allocation14 + $0x8] sm:$0xff] }
  0xb6   :  { %4089 = vmatpush1.bf16.msra.mxu1 %v4088_v1  ;;  %4059 = vmatprep.subr.bf16.mxu0 %v4058_v2  ;;  %v514_v33 = vld [vmem:[#allocation14 + $0x28] sm:$0xff]  ;;  %v512_v34 = vld [vmem:[#allocation14 + $0x18] sm:$0xff]  ;;  %v4068_v36 = vpack.c.bf16 %v249_v28, %v245_v27  ;;  %v4100_v37 = vpack.c.bf16 %v251_v31, %v247_v29  ;;  %v509_v39 = vld [vmem:[#allocation14] sm:$0xff] }
  0xb7   :  { %4091 = vmatprep.subr.bf16.mxu1 %v4090_v6  ;;  %v516_v35 = vld [vmem:[#allocation14 + $0x38] sm:$0xff]  ;;  %v4102_v38 = vpack.c.bf16 %v514_v33, %v510_v32  ;;  %v513_v40 = vld [vmem:[#allocation14 + $0x20] sm:$0xff]  ;;  %v511_v42 = vld [vmem:[#allocation14 + $0x10] sm:$0xff] }
  0xb8   :  { %v4134_v41 = vpack.c.bf16 %v516_v35, %v512_v34  ;;  %v515_v43 = vld [vmem:[#allocation14 + $0x30] sm:$0xff]  ;;  %v518_v44 = vld [vmem:[#allocation14 + $0x48] sm:$0xff]  ;;  %v181_v46 = vld [vmem:[#allocation6] sm:$0xff]  ;;  %v4104_v47 = vpack.c.bf16 %v513_v40, %v509_v39 }
  0xb9   :  { %4061 = vmatpush1.bf16.msra.mxu0 %v4060_v12  ;;  %v522_v45 = vld [vmem:[#allocation14 + $0x68] sm:$0xff]  ;;  %v520_v48 = vld [vmem:[#allocation14 + $0x58] sm:$0xff]  ;;  %v4136_v50 = vpack.c.bf16 %v515_v43, %v511_v42  ;;  %v517_v51 = vld [vmem:[#allocation14 + $0x40] sm:$0xff] }
  0xba   :  { %4093 = vmatpush1.bf16.msra.mxu1 %v4092_v13  ;;  %4063 = vmatprep.subr.bf16.mxu0 %v4062_v14  ;;  %v524_v49 = vld [vmem:[#allocation14 + $0x78] sm:$0xff]  ;;  %v521_v52 = vld [vmem:[#allocation14 + $0x60] sm:$0xff]  ;;  %v4106_v53 = vpack.c.bf16 %v522_v45, %v518_v44  ;;  %v519_v54 = vld [vmem:[#allocation14 + $0x50] sm:$0xff] }
  0xbb   :  { %4095 = vmatprep.subr.bf16.mxu1 %v4094_v18  ;;  %v523_v55 = vld [vmem:[#allocation14 + $0x70] sm:$0xff]  ;;  %v4138_v56 = vpack.c.bf16 %v524_v49, %v520_v48  ;;  %v526_v57 = vld [vmem:[#allocation14 + $0x88] sm:$0xff]  ;;  %v4108_v60 = vpack.c.bf16 %v521_v52, %v517_v51  ;;  %v528_v61 = vld [vmem:[#allocation14 + $0x98] sm:$0xff] }
  0xbc   :  { %v530_v58 = vld [vmem:[#allocation14 + $0xa8] sm:$0xff]  ;;  %v532_v62 = vld [vmem:[#allocation14 + $0xb8] sm:$0xff]  ;;  %v4140_v63 = vpack.c.bf16 %v523_v55, %v519_v54  ;;  %v525_v1 = vld [vmem:[#allocation14 + $0x80] sm:$0xff] }
  0xbd   :  { %4065 = vmatpush1.bf16.msra.mxu0 %v4064_v24  ;;  %v182_v59 = vld [vmem:[#allocation6 + $0x8] sm:$0xff]  ;;  %v529_v2 = vld [vmem:[#allocation14 + $0xa0] sm:$0xff]  ;;  %v4110_v3 = vpack.c.bf16 %v530_v58, %v526_v57  ;;  %v527_v4 = vld [vmem:[#allocation14 + $0x90] sm:$0xff]  ;;  %v4142_v6 = vpack.c.bf16 %v532_v62, %v528_v61 }
  0xbe   :  { %4097 = vmatpush1.bf16.msra.mxu1 %v4096_v25  ;;  %4067 = vmatprep.subr.bf16.mxu0 %v4066_v26  ;;  %v531_v5 = vld [vmem:[#allocation14 + $0xb0] sm:$0xff]  ;;  %v534_v7 = vld [vmem:[#allocation14 + $0xc8] sm:$0xff]  ;;  %v4112_v10 = vpack.c.bf16 %v529_v2, %v525_v1  ;;  %v536_v11 = vld [vmem:[#allocation14 + $0xd8] sm:$0xff] }
  0xbf   :  { %4099 = vmatprep.subr.bf16.mxu1 %v4098_v30  ;;  %v538_v8 = vld [vmem:[#allocation14 + $0xe8] sm:$0xff]  ;;  %v183_v9 = vld [vmem:[#allocation6 + $0x10] sm:$0xff]  ;;  %v540_v12 = vld [vmem:[#allocation14 + $0xf8] sm:$0xff]  ;;  %v4144_v13 = vpack.c.bf16 %v531_v5, %v527_v4 }
  0xc0   :  { %v533_v14 = vld [vmem:[#allocation14 + $0xc0] sm:$0xff]  ;;  %v4114_v16 = vpack.c.bf16 %v538_v8, %v534_v7  ;;  %v535_v17 = vld [vmem:[#allocation14 + $0xd0] sm:$0xff]  ;;  %v4146_v19 = vpack.c.bf16 %v540_v12, %v536_v11  ;;  %v542_v20 = vld [vmem:[#allocation14 + $0x108] sm:$0xff] }
  0xc1   :  { %4069 = vmatpush1.bf16.msra.mxu0 %v4068_v36  ;;  %v537_v15 = vld [vmem:[#allocation14 + $0xe0] sm:$0xff]  ;;  %v539_v18 = vld [vmem:[#allocation14 + $0xf0] sm:$0xff]  ;;  %v546_v21 = vld [vmem:[#allocation14 + $0x128] sm:$0xff] }
  0xc2   :  { %4101 = vmatpush1.bf16.msra.mxu1 %v4100_v37  ;;  %4103 = vmatprep.subr.bf16.mxu0 %v4102_v38  ;;  %v184_v22 = vld [vmem:[#allocation6 + $0x18] sm:$0xff]  ;;  %v4116_v23 = vpack.c.bf16 %v537_v15, %v533_v14  ;;  %v4148_v26 = vpack.c.bf16 %v539_v18, %v535_v17  ;;  %v541_v27 = vld [vmem:[#allocation14 + $0x100] sm:$0xff]  ;;  %v4118_v29 = vpack.c.bf16 %v546_v21, %v542_v20  ;;  %v543_v30 = vld [vmem:[#allocation14 + $0x110] sm:$0xff] }
  0xc3   :  { %4135 = vmatprep.subr.bf16.mxu1 %v4134_v41  ;;  %v544_v24 = vld [vmem:[#allocation14 + $0x118] sm:$0xff]  ;;  %v545_v28 = vld [vmem:[#allocation14 + $0x120] sm:$0xff]  ;;  %v547_v31 = vld [vmem:[#allocation14 + $0x130] sm:$0xff] }
  0xc4   :  { %340 = vmatmul.mubr.f32.vlgmr.msra.gmra.mrb[0].mxu0 %v181_v46  ;;  %v548_v25 = vld [vmem:[#allocation14 + $0x138] sm:$0xff]  ;;  %v550_v33 = vld [vmem:[#allocation14 + $0x148] sm:$0xff]  ;;  %v185_v35 = vld [vmem:[#allocation6 + $0x20] sm:$0xff]  ;;  %v4120_v36 = vpack.c.bf16 %v545_v28, %v541_v27  ;;  %v4152_v39 = vpack.c.bf16 %v547_v31, %v543_v30 }
  0xc5   :  { %453 = vmatmul.mubr.f32.vlgmr.msra.gmra.mrb[0].mxu1 %v181_v46  ;;  %4105 = vmatpush1.bf16.msra.mxu0 %v4104_v47  ;;  %v4150_v32 = vpack.c.bf16 %v548_v25, %v544_v24  ;;  %v554_v34 = vld [vmem:[#allocation14 + $0x168] sm:$0xff]  ;;  %v552_v37 = vld [vmem:[#allocation14 + $0x158] sm:$0xff]  ;;  %v549_v40 = vld [vmem:[#allocation14 + $0x140] sm:$0xff] }
  0xc6   :  { %4137 = vmatpush1.bf16.msra.mxu1 %v4136_v50  ;;  %345 = vmatprep.mubr.f32.mxu0 %v6933_v0  ;;  %v556_v38 = vld [vmem:[#allocation14 + $0x178] sm:$0xff]  ;;  %v553_v41 = vld [vmem:[#allocation14 + $0x160] sm:$0xff]  ;;  %v4122_v42 = vpack.c.bf16 %v554_v34, %v550_v33  ;;  %v551_v43 = vld [vmem:[#allocation14 + $0x150] sm:$0xff] }
  0xc7   :  { %458 = vmatprep.mubr.f32.mxu1 %v6933_v0  ;;  %4107 = vmatprep.subr.bf16.mxu0 %v4106_v53  ;;  %v555_v44 = vld [vmem:[#allocation14 + $0x170] sm:$0xff]  ;;  %v4154_v45 = vpack.c.bf16 %v556_v38, %v552_v37  ;;  %v558_v46 = vld [vmem:[#allocation14 + $0x188] sm:$0xff]  ;;  %v4124_v49 = vpack.c.bf16 %v553_v41, %v549_v40  ;;  %v560_v50 = vld [vmem:[#allocation14 + $0x198] sm:$0xff] }
  0xc8   :  { %346 = vmatmul.mubr.f32.gmra.mrb[2].mxu0 %v182_v59  ;;  %4139 = vmatprep.subr.bf16.mxu1 %v4138_v56  ;;  %v562_v47 = vld [vmem:[#allocation14 + $0x1a8] sm:$0xff]  ;;  %v564_v51 = vld [vmem:[#allocation14 + $0x1b8] sm:$0xff]  ;;  %v4156_v52 = vpack.c.bf16 %v555_v44, %v551_v43  ;;  %v557_v53 = vld [vmem:[#allocation14 + $0x180] sm:$0xff] }
  0xc9   :  { %459 = vmatmul.mubr.f32.gmra.mrb[2].mxu1 %v182_v59  ;;  %4109 = vmatpush1.bf16.msra.mxu0 %v4108_v60  ;;  %v186_v48 = vld [vmem:[#allocation6 + $0x28] sm:$0xff]  ;;  %v561_v54 = vld [vmem:[#allocation14 + $0x1a0] sm:$0xff]  ;;  %v4126_v55 = vpack.c.bf16 %v562_v47, %v558_v46  ;;  %v559_v56 = vld [vmem:[#allocation14 + $0x190] sm:$0xff]  ;;  %v4158_v58 = vpack.c.bf16 %v564_v51, %v560_v50 }
  0xca   :  { %4141 = vmatpush1.bf16.msra.mxu1 %v4140_v63  ;;  %351 = vmatprep.mubr.f32.mxu0 %v6933_v0  ;;  %v563_v57 = vld [vmem:[#allocation14 + $0x1b0] sm:$0xff]  ;;  %v566_v59 = vld [vmem:[#allocation14 + $0x1c8] sm:$0xff]  ;;  %v4128_v62 = vpack.c.bf16 %v561_v54, %v557_v53  ;;  %v568_v63 = vld [vmem:[#allocation14 + $0x1d8] sm:$0xff] }
  0xcb   :  { %464 = vmatprep.mubr.f32.mxu1 %v6933_v0  ;;  %4111 = vmatprep.subr.bf16.mxu0 %v4110_v3  ;;  %v570_v60 = vld [vmem:[#allocation14 + $0x1e8] sm:$0xff]  ;;  %v187_v61 = vld [vmem:[#allocation6 + $0x30] sm:$0xff]  ;;  %v572_v1 = vld [vmem:[#allocation14 + $0x1f8] sm:$0xff]  ;;  %v4160_v2 = vpack.c.bf16 %v563_v57, %v559_v56 }
  0xcc   :  { %352 = vmatmul.mubr.f32.gmra.mrb[4].mxu0 %v183_v9  ;;  %4143 = vmatprep.subr.bf16.mxu1 %v4142_v6  ;;  %v565_v3 = vld [vmem:[#allocation14 + $0x1c0] sm:$0xff]  ;;  %v4130_v5 = vpack.c.bf16 %v570_v60, %v566_v59  ;;  %v567_v6 = vld [vmem:[#allocation14 + $0x1d0] sm:$0xff]  ;;  %v4162_v8 = vpack.c.bf16 %v572_v1, %v568_v63  ;;  %v188_v11 = vld [vmem:[#allocation6 + $0x38] sm:$0xff] }
  0xcd   :  { %465 = vmatmul.mubr.f32.gmra.mrb[4].mxu1 %v183_v9  ;;  %4113 = vmatpush1.bf16.msra.mxu0 %v4112_v10  ;;  %v569_v4 = vld [vmem:[#allocation14 + $0x1e0] sm:$0xff]  ;;  %v571_v7 = vld [vmem:[#allocation14 + $0x1f0] sm:$0xff]  ;;  %v822_v9 = vld [vmem:[#allocation12 + $0x8] sm:$0xff] }
  0xce   :  { %4145 = vmatpush1.bf16.msra.mxu1 %v4144_v13  ;;  %357 = vmatprep.mubr.f32.mxu0 %v6933_v0  ;;  %v826_v10 = vld [vmem:[#allocation12 + $0x28] sm:$0xff]  ;;  %v4132_v12 = vpack.c.bf16 %v569_v4, %v565_v3  ;;  %v824_v13 = vld [vmem:[#allocation12 + $0x18] sm:$0xff]  ;;  %v4164_v15 = vpack.c.bf16 %v571_v7, %v567_v6  ;;  %v825_v17 = vld [vmem:[#allocation12 + $0x20] sm:$0xff] }
  0xcf   :  { %470 = vmatprep.mubr.f32.mxu1 %v6933_v0  ;;  %4115 = vmatprep.subr.bf16.mxu0 %v4114_v16  ;;  %v828_v14 = vld [vmem:[#allocation12 + $0x38] sm:$0xff]  ;;  %v821_v16 = vld [vmem:[#allocation12] sm:$0xff]  ;;  %v6037_v18 = vpack.c.bf16 %v826_v10, %v822_v9  ;;  %v827_v20 = vld [vmem:[#allocation12 + $0x30] sm:$0xff] }
  0xd0   :  { %358 = vmatmul.mubr.f32.gmra.mrb[6].mxu0 %v184_v22  ;;  %4147 = vmatprep.subr.bf16.mxu1 %v4146_v19  ;;  %v823_v19 = vld [vmem:[#allocation12 + $0x10] sm:$0xff]  ;;  %v6039_v21 = vpack.c.bf16 %v828_v14, %v824_v13  ;;  %v501_v24 = vld [vmem:[#allocation9] sm:$0xff]  ;;  %v6041_v25 = vpack.c.bf16 %v825_v17, %v821_v16  ;;  %v836_v27 = vld [vmem:[#allocation12 + $0x78] sm:$0xff] }
  0xd1   :  { %471 = vmatmul.mubr.f32.gmra.mrb[6].mxu1 %v184_v22  ;;  %4117 = vmatpush1.bf16.msra.mxu0 %v4116_v23  ;;  %v830_v22 = vld [vmem:[#allocation12 + $0x48] sm:$0xff]  ;;  %v6044_v28 = vpack.c.bf16 %v827_v20, %v823_v19  ;;  %v833_v30 = vld [vmem:[#allocation12 + $0x60] sm:$0xff]  ;;  %v835_v33 = vld [vmem:[#allocation12 + $0x70] sm:$0xff] }
  0xd2   :  { %4149 = vmatpush1.bf16.msra.mxu1 %v4148_v26  ;;  %363 = vmatprep.mubr.f32.mxu0 %v6933_v0  ;;  %v834_v23 = vld [vmem:[#allocation12 + $0x68] sm:$0xff]  ;;  %v832_v26 = vld [vmem:[#allocation12 + $0x58] sm:$0xff]  ;;  %v841_v43 = vld [vmem:[#allocation12 + $0xa0] sm:$0xff] }
  0xd3   :  { %476 = vmatprep.mubr.f32.mxu1 %v6933_v0  ;;  %4119 = vmatprep.subr.bf16.mxu0 %v4118_v29  ;;  %v829_v29 = vld [vmem:[#allocation12 + $0x40] sm:$0xff]  ;;  %v6048_v31 = vpack.c.bf16 %v834_v23, %v830_v22  ;;  %v6051_v34 = vpack.c.bf16 %v836_v27, %v832_v26  ;;  %v502_v37 = vld [vmem:[#allocation9 + $0x8] sm:$0xff]  ;;  %v844_v40 = vld [vmem:[#allocation12 + $0xb8] sm:$0xff] }
  0xd4   :  { %364 = vmatmul.mubr.f32.gmra.mrb[8].mxu0 %v185_v35  ;;  %4151 = vmatprep.subr.bf16.mxu1 %v4150_v32  ;;  %v831_v32 = vld [vmem:[#allocation12 + $0x50] sm:$0xff]  ;;  %v6054_v38 = vpack.c.bf16 %v833_v30, %v829_v29  ;;  %v852_v53 = vld [vmem:[#allocation12 + $0xf8] sm:$0xff]  ;;  %v849_v56 = vld [vmem:[#allocation12 + $0xe0] sm:$0xff] }
  0xd5   :  { %477 = vmatmul.mubr.f32.gmra.mrb[8].mxu1 %v185_v35  ;;  %4121 = vmatpush1.bf16.msra.mxu0 %v4120_v36  ;;  %v838_v35 = vld [vmem:[#allocation12 + $0x88] sm:$0xff]  ;;  %v6058_v41 = vpack.c.bf16 %v835_v33, %v831_v32  ;;  %v843_v46 = vld [vmem:[#allocation12 + $0xb0] sm:$0xff]  ;;  %v504_v63 = vld [vmem:[#allocation9 + $0x18] sm:$0xff] }
  0xd6   :  { %4153 = vmatpush1.bf16.msra.mxu1 %v4152_v39  ;;  %369 = vmatprep.mubr.f32.mxu0 %v6933_v0  ;;  %v842_v36 = vld [vmem:[#allocation12 + $0xa8] sm:$0xff]  ;;  %7016 = vst [vmem:[#allocation28_spill] sm:$0xff] %v6054_v38  ;;  %v840_v39 = vld [vmem:[#allocation12 + $0x98] sm:$0xff]  ;;  %v503_v50 = vld [vmem:[#allocation9 + $0x10] sm:$0xff] }
  0xd7   :  { %482 = vmatprep.mubr.f32.mxu1 %v6933_v0  ;;  %4123 = vmatprep.subr.bf16.mxu0 %v4122_v42  ;;  %7017 = vst [vmem:[#allocation29_spill] sm:$0xff] %v6058_v41  ;;  %v837_v42 = vld [vmem:[#allocation12 + $0x80] sm:$0xff]  ;;  %v6062_v44 = vpack.c.bf16 %v842_v36, %v838_v35  ;;  %v6065_v47 = vpack.c.bf16 %v844_v40, %v840_v39  ;;  %v851_v59 = vld [vmem:[#allocation12 + $0xf0] sm:$0xff]  ;;  %v860_v3 = vld [vmem:[#allocation12 + $0x138] sm:$0xff] }
  0xd8   :  { %370 = vmatmul.mubr.f32.gmra.mrb[10].mxu0 %v186_v48  ;;  %4155 = vmatprep.subr.bf16.mxu1 %v4154_v45  ;;  %v839_v45 = vld [vmem:[#allocation12 + $0x90] sm:$0xff]  ;;  %v6068_v51 = vpack.c.bf16 %v841_v43, %v837_v42  ;;  %v857_v6 = vld [vmem:[#allocation12 + $0x120] sm:$0xff]  ;;  %v868_v16 = vld [vmem:[#allocation12 + $0x178] sm:$0xff] }
  0xd9   :  { %483 = vmatmul.mubr.f32.gmra.mrb[10].mxu1 %v186_v48  ;;  %4125 = vmatpush1.bf16.msra.mxu0 %v4124_v49  ;;  %7018 = vst [vmem:[#allocation30_spill] sm:$0xff] %v6062_v44  ;;  %7019 = vst [vmem:[#allocation31_spill] sm:$0xff] %v6065_v47  ;;  %v846_v48 = vld [vmem:[#allocation12 + $0xc8] sm:$0xff]  ;;  %v6072_v54 = vpack.c.bf16 %v843_v46, %v839_v45  ;;  %v859_v9 = vld [vmem:[#allocation12 + $0x130] sm:$0xff] }
  0xda   :  { %4157 = vmatpush1.bf16.msra.mxu1 %v4156_v52  ;;  %375 = vmatprep.mubr.f32.mxu0 %v6933_v0  ;;  %v850_v49 = vld [vmem:[#allocation12 + $0xe8] sm:$0xff]  ;;  %7020 = vst [vmem:[#allocation32_spill] sm:$0xff] %v6068_v51  ;;  %v848_v52 = vld [vmem:[#allocation12 + $0xd8] sm:$0xff]  ;;  %v505_v13 = vld [vmem:[#allocation9 + $0x20] sm:$0xff] }
  0xdb   :  { %488 = vmatprep.mubr.f32.mxu1 %v6933_v0  ;;  %4127 = vmatprep.subr.bf16.mxu0 %v4126_v55  ;;  %7021 = vst [vmem:[#allocation33_spill] sm:$0xff] %v6072_v54  ;;  %v845_v55 = vld [vmem:[#allocation12 + $0xc0] sm:$0xff]  ;;  %v6076_v57 = vpack.c.bf16 %v850_v49, %v846_v48  ;;  %v6079_v60 = vpack.c.bf16 %v852_v53, %v848_v52  ;;  %v863_v23 = vld [vmem:[#allocation12 + $0x150] sm:$0xff]  ;;  %v870_v27 = vld [vmem:[#allocation12 + $0x188] sm:$0xff] }
  0xdc   :  { %376 = vmatmul.mubr.f32.gmra.mrb[12].mxu0 %v187_v61  ;;  %4159 = vmatprep.subr.bf16.mxu1 %v4158_v58  ;;  %v847_v58 = vld [vmem:[#allocation12 + $0xd0] sm:$0xff]  ;;  %v6082_v1 = vpack.c.bf16 %v849_v56, %v845_v55  ;;  %v861_v19 = vld [vmem:[#allocation12 + $0x140] sm:$0xff]  ;;  %v874_v29 = vld [vmem:[#allocation12 + $0x1a8] sm:$0xff] }
  0xdd   :  { %489 = vmatmul.mubr.f32.gmra.mrb[12].mxu1 %v187_v61  ;;  %4129 = vmatpush1.bf16.msra.mxu0 %v4128_v62  ;;  %7022 = vst [vmem:[#allocation34_spill] sm:$0xff] %v6076_v57  ;;  %7023 = vst [vmem:[#allocation35_spill] sm:$0xff] %v6079_v60  ;;  %v854_v61 = vld [vmem:[#allocation12 + $0x108] sm:$0xff]  ;;  %v6086_v4 = vpack.c.bf16 %v851_v59, %v847_v58  ;;  %v865_v20 = vld [vmem:[#allocation12 + $0x160] sm:$0xff]  ;;  %v6118_v40 = vpack.c.bf16 %v874_v29, %v870_v27 }
  0xde   :  { %4161 = vmatpush1.bf16.msra.mxu1 %v4160_v2  ;;  %381 = vmatprep.mubr.f32.mxu0 %v6933_v0  ;;  %v858_v62 = vld [vmem:[#allocation12 + $0x128] sm:$0xff]  ;;  %7024 = vst [vmem:[#allocation36_spill] sm:$0xff] %v6082_v1  ;;  %v856_v2 = vld [vmem:[#allocation12 + $0x118] sm:$0xff]  ;;  %v6110_v32 = vpack.c.bf16 %v865_v20, %v861_v19  ;;  %v873_v39 = vld [vmem:[#allocation12 + $0x1a0] sm:$0xff] }
  0xdf   :  { %494 = vmatprep.mubr.f32.mxu1 %v6933_v0  ;;  %4131 = vmatprep.subr.bf16.mxu0 %v4130_v5  ;;  %7025 = vst [vmem:[#allocation37_spill] sm:$0xff] %v6086_v4  ;;  %v853_v5 = vld [vmem:[#allocation12 + $0x100] sm:$0xff]  ;;  %v6090_v7 = vpack.c.bf16 %v858_v62, %v854_v61  ;;  %v6093_v10 = vpack.c.bf16 %v860_v3, %v856_v2  ;;  %v506_v30 = vld [vmem:[#allocation9 + $0x28] sm:$0xff]  ;;  %v872_v33 = vld [vmem:[#allocation12 + $0x198] sm:$0xff] }
  0xe0   :  { %382 = vmatmul.mubr.f32.gmra.mrb[14].mxu0 %v188_v11  ;;  %4163 = vmatprep.subr.bf16.mxu1 %v4162_v8  ;;  %v855_v8 = vld [vmem:[#allocation12 + $0x110] sm:$0xff]  ;;  %v6096_v14 = vpack.c.bf16 %v857_v6, %v853_v5  ;;  %7032 = vst [vmem:[#allocation44_spill] sm:$0xff] %v6110_v32  ;;  %v876_v35 = vld [vmem:[#allocation12 + $0x1b8] sm:$0xff]  ;;  %7034 = vst [vmem:[#allocation46_spill] sm:$0xff] %v6118_v40 }
  0xe1   :  { %495 = vmatmul.mubr.f32.gmra.mrb[14].mxu1 %v188_v11  ;;  %4133 = vmatpush1.bf16.msra.mxu0 %v4132_v12  ;;  %7026 = vst [vmem:[#allocation38_spill] sm:$0xff] %v6090_v7  ;;  %7027 = vst [vmem:[#allocation39_spill] sm:$0xff] %v6093_v10  ;;  %v862_v11 = vld [vmem:[#allocation12 + $0x148] sm:$0xff]  ;;  %v6100_v17 = vpack.c.bf16 %v859_v9, %v855_v8  ;;  %v871_v42 = vld [vmem:[#allocation12 + $0x190] sm:$0xff]  ;;  %v6121_v45 = vpack.c.bf16 %v876_v35, %v872_v33 }
  0xe2   :  { %4165 = vmatpush1.bf16.msra.mxu1 %v4164_v15  ;;  %659 = vmatprep.mubr.f32.mxu0 %v6933_v0  ;;  %v866_v12 = vld [vmem:[#allocation12 + $0x168] sm:$0xff]  ;;  %7028 = vst [vmem:[#allocation40_spill] sm:$0xff] %v6096_v14  ;;  %v864_v15 = vld [vmem:[#allocation12 + $0x158] sm:$0xff]  ;;  %v875_v43 = vld [vmem:[#allocation12 + $0x1b0] sm:$0xff] }
  0xe3   :  { %772 = vmatprep.mubr.f32.mxu1 %v6933_v0  ;;  %4167 = vmatprep.subr.bf16.mxu0 %v6037_v18  ;;  %7029 = vst [vmem:[#allocation41_spill] sm:$0xff] %v6100_v17  ;;  %v6104_v22 = vpack.c.bf16 %v866_v12, %v862_v11  ;;  %v6107_v26 = vpack.c.bf16 %v868_v16, %v864_v15  ;;  %7035 = vst [vmem:[#allocation47_spill] sm:$0xff] %v6121_v45  ;;  %v878_v46 = vld [vmem:[#allocation12 + $0x1c8] sm:$0xff]  ;;  %v507_v49 = vld [vmem:[#allocation9 + $0x30] sm:$0xff] }
  0xe4   :  { %660 = vmatmul.mubr.f32.vlgmr.msra.gmra.mrb[16].mxu0 %v501_v24  ;;  %4199 = vmatprep.subr.bf16.mxu1 %v6039_v21  ;;  %v882_v48 = vld [vmem:[#allocation12 + $0x1e8] sm:$0xff]  ;;  %v880_v52 = vld [vmem:[#allocation12 + $0x1d8] sm:$0xff]  ;;  %v6128_v55 = vpack.c.bf16 %v875_v43, %v871_v42  ;;  %v877_v56 = vld [vmem:[#allocation12 + $0x1c0] sm:$0xff] }
  0xe5   :  { %773 = vmatmul.mubr.f32.vlgmr.msra.gmra.mrb[16].mxu1 %v501_v24  ;;  %4169 = vmatpush1.bf16.msra.mxu0 %v6041_v25  ;;  %7030 = vst [vmem:[#allocation42_spill] sm:$0xff] %v6104_v22  ;;  %v867_v24 = vld [vmem:[#allocation12 + $0x170] sm:$0xff]  ;;  %7031 = vst [vmem:[#allocation43_spill] sm:$0xff] %v6107_v26  ;;  %v884_v53 = vld [vmem:[#allocation12 + $0x1f8] sm:$0xff]  ;;  %v6132_v59 = vpack.c.bf16 %v882_v48, %v878_v46 }
  0xe6   :  { %4201 = vmatpush1.bf16.msra.mxu1 %v6044_v28  ;;  %665 = vmatprep.mubr.f32.mxu0 %v6933_v0  ;;  %v6114_v36 = vpack.c.bf16 %v867_v24, %v863_v23  ;;  %7037 = vst [vmem:[#allocation49_spill] sm:$0xff] %v6128_v55  ;;  %v881_v58 = vld [vmem:[#allocation12 + $0x1e0] sm:$0xff]  ;;  %v879_v61 = vld [vmem:[#allocation12 + $0x1d0] sm:$0xff]  ;;  %v886_v2 = vld [vmem:[#allocation15 + $0x8] sm:$0xff] }
  0xe7   :  { %778 = vmatprep.mubr.f32.mxu1 %v6933_v0  ;;  %4171 = vmatprep.subr.bf16.mxu0 %v6048_v31  ;;  %7038 = vst [vmem:[#allocation50_spill] sm:$0xff] %v6132_v59  ;;  %v883_v62 = vld [vmem:[#allocation12 + $0x1f0] sm:$0xff]  ;;  %v890_v3 = vld [vmem:[#allocation15 + $0x28] sm:$0xff]  ;;  %v508_v5 = vld [vmem:[#allocation9 + $0x38] sm:$0xff]  ;;  %v6138_v6 = vpack.c.bf16 %v881_v58, %v877_v56 }
  0xe8   :  { %666 = vmatmul.mubr.f32.gmra.mrb[18].mxu0 %v502_v37  ;;  %4203 = vmatprep.subr.bf16.mxu1 %v6051_v34  ;;  %7033 = vst [vmem:[#allocation45_spill] sm:$0xff] %v6114_v36  ;;  %v888_v8 = vld [vmem:[#allocation15 + $0x18] sm:$0xff]  ;;  %v6142_v11 = vpack.c.bf16 %v883_v62, %v879_v61  ;;  %v885_v12 = vld [vmem:[#allocation15] sm:$0xff]  ;;  %v887_v15 = vld [vmem:[#allocation15 + $0x10] sm:$0xff]  ;;  %v6146_v16 = vpack.c.bf16 %v890_v3, %v886_v2 }
  0xe9   :  { %779 = vmatmul.mubr.f32.gmra.mrb[18].mxu1 %v502_v37  ;;  %4173 = vmatpush1.bf16.msra.mxu0 %v6054_v38  ;;  %v869_v37 = vld [vmem:[#allocation12 + $0x180] sm:$0xff]  ;;  %7040 = vst [vmem:[#allocation52_spill] sm:$0xff] %v6138_v6  ;;  %v892_v9 = vld [vmem:[#allocation15 + $0x38] sm:$0xff]  ;;  %v891_v19 = vld [vmem:[#allocation15 + $0x30] sm:$0xff] }
  0xea   :  { %4205 = vmatpush1.bf16.msra.mxu1 %v6058_v41  ;;  %671 = vmatprep.mubr.f32.mxu0 %v6933_v0  ;;  %7041 = vst [vmem:[#allocation53_spill] sm:$0xff] %v6142_v11  ;;  %7042 = vst [vmem:[#allocation54_spill] sm:$0xff] %v6146_v16  ;;  %v894_v20 = vld [vmem:[#allocation15 + $0x48] sm:$0xff]  ;;  %v6149_v24 = vpack.c.bf16 %v892_v9, %v888_v8  ;;  %v896_v27 = vld [vmem:[#allocation15 + $0x58] sm:$0xff]  ;;  %v6156_v33 = vpack.c.bf16 %v891_v19, %v887_v15 }
  0xeb   :  { %784 = vmatprep.mubr.f32.mxu1 %v6933_v0  ;;  %4175 = vmatprep.subr.bf16.mxu0 %v6062_v44  ;;  %v898_v23 = vld [vmem:[#allocation15 + $0x68] sm:$0xff]  ;;  %v900_v29 = vld [vmem:[#allocation15 + $0x78] sm:$0xff]  ;;  %v895_v42 = vld [vmem:[#allocation15 + $0x50] sm:$0xff] }
  0xec   :  { %672 = vmatmul.mubr.f32.gmra.mrb[20].mxu0 %v503_v50  ;;  %4207 = vmatprep.subr.bf16.mxu1 %v6065_v47  ;;  %7043 = vst [vmem:[#allocation55_spill] sm:$0xff] %v6149_v24  ;;  %v6158_v35 = vpack.c.bf16 %v898_v23, %v894_v20  ;;  %v6162_v43 = vpack.c.bf16 %v900_v29, %v896_v27  ;;  %v899_v46 = vld [vmem:[#allocation15 + $0x70] sm:$0xff]  ;;  %v902_v48 = vld [vmem:[#allocation15 + $0x88] sm:$0xff]  ;;  %v901_v62 = vld [vmem:[#allocation15 + $0x80] sm:$0xff] }
  0xed   :  { %785 = vmatmul.mubr.f32.gmra.mrb[20].mxu1 %v503_v50  ;;  %4177 = vmatpush1.bf16.msra.mxu0 %v6068_v51  ;;  %v6124_v50 = vpack.c.bf16 %v873_v39, %v869_v37  ;;  %v893_v37 = vld [vmem:[#allocation15 + $0x40] sm:$0xff]  ;;  %v6172_v58 = vpack.c.bf16 %v899_v46, %v895_v42  ;;  %v903_v3 = vld [vmem:[#allocation15 + $0x90] sm:$0xff]  ;;  %v910_v9 = vld [vmem:[#allocation15 + $0xc8] sm:$0xff] }
  0xee   :  { %4209 = vmatpush1.bf16.msra.mxu1 %v6072_v54  ;;  %677 = vmatprep.mubr.f32.mxu0 %v6933_v0  ;;  %v897_v39 = vld [vmem:[#allocation15 + $0x60] sm:$0xff]  ;;  %v907_v8 = vld [vmem:[#allocation15 + $0xb0] sm:$0xff]  ;;  %v916_v15 = vld [vmem:[#allocation15 + $0xf8] sm:$0xff] }
  0xef   :  { %790 = vmatprep.mubr.f32.mxu1 %v6933_v0  ;;  %4179 = vmatprep.subr.bf16.mxu0 %v6076_v57  ;;  %7036 = vst [vmem:[#allocation48_spill] sm:$0xff] %v6124_v50  ;;  %v6168_v56 = vpack.c.bf16 %v897_v39, %v893_v37  ;;  %v905_v2 = vld [vmem:[#allocation15 + $0xa0] sm:$0xff]  ;;  %v6186_v20 = vpack.c.bf16 %v907_v8, %v903_v3  ;;  %v911_v37 = vld [vmem:[#allocation15 + $0xd0] sm:$0xff]  ;;  %v918_v46 = vld [vmem:[#allocation15 + $0x108] sm:$0xff] }
  0xf0   :  { %678 = vmatmul.mubr.f32.gmra.mrb[22].mxu0 %v504_v63  ;;  %4211 = vmatprep.subr.bf16.mxu1 %v6079_v60  ;;  %v6182_v19 = vpack.c.bf16 %v905_v2, %v901_v62  ;;  %v909_v27 = vld [vmem:[#allocation15 + $0xc0] sm:$0xff]  ;;  %v915_v42 = vld [vmem:[#allocation15 + $0xf0] sm:$0xff] }
  0xf1   :  { %791 = vmatmul.mubr.f32.gmra.mrb[22].mxu1 %v504_v63  ;;  %4181 = vmatpush1.bf16.msra.mxu0 %v6082_v1  ;;  %v6135_v63 = vpack.c.bf16 %v884_v53, %v880_v52  ;;  %v904_v52 = vld [vmem:[#allocation15 + $0x98] sm:$0xff]  ;;  %7044 = vst [vmem:[#allocation56_spill] sm:$0xff] %v6186_v20  ;;  %v913_v29 = vld [vmem:[#allocation15 + $0xe0] sm:$0xff]  ;;  %v6198_v62 = vpack.c.bf16 %v915_v42, %v911_v37 }
  0xf2   :  { %4213 = vmatpush1.bf16.msra.mxu1 %v6086_v4  ;;  %683 = vmatprep.mubr.f32.mxu0 %v6933_v0  ;;  %v908_v53 = vld [vmem:[#allocation15 + $0xb8] sm:$0xff]  ;;  %v917_v3 = vld [vmem:[#allocation15 + $0x100] sm:$0xff] }
  0xf3   :  { %796 = vmatprep.mubr.f32.mxu1 %v6933_v0  ;;  %4183 = vmatprep.subr.bf16.mxu0 %v6090_v7  ;;  %7039 = vst [vmem:[#allocation51_spill] sm:$0xff] %v6135_v63  ;;  %7048 = vst [vmem:[#allocation60_spill] sm:$0xff] %v6198_v62  ;;  %v921_v8 = vld [vmem:[#allocation15 + $0x120] sm:$0xff] }
  0xf4   :  { %684 = vmatmul.mubr.f32.gmra.mrb[24].mxu0 %v505_v13  ;;  %4215 = vmatprep.subr.bf16.mxu1 %v6093_v10 }
  0xf5   :  { %797 = vmatmul.mubr.f32.gmra.mrb[24].mxu1 %v505_v13  ;;  %4185 = vmatpush1.bf16.msra.mxu0 %v6096_v14  ;;  %v889_v13 = vld [vmem:[#allocation15 + $0x20] sm:$0xff] }
  0xf6   :  { %4217 = vmatpush1.bf16.msra.mxu1 %v6100_v17  ;;  %689 = vmatprep.mubr.f32.mxu0 %v6933_v0 }
  0xf7   :  { %802 = vmatprep.mubr.f32.mxu1 %v6933_v0  ;;  %4187 = vmatprep.subr.bf16.mxu0 %v6104_v22 }
  0xf8   :  { %690 = vmatmul.mubr.f32.gmra.mrb[26].mxu0 %v506_v30  ;;  %4219 = vmatprep.subr.bf16.mxu1 %v6107_v26 }
  0xf9   :  { %803 = vmatmul.mubr.f32.gmra.mrb[26].mxu1 %v506_v30  ;;  %4189 = vmatpush1.bf16.msra.mxu0 %v6110_v32  ;;  %v6152_v30 = vpack.c.bf16 %v889_v13, %v885_v12  ;;  %v914_v12 = vld [vmem:[#allocation15 + $0xe8] sm:$0xff]  ;;  %v912_v13 = vld [vmem:[#allocation15 + $0xd8] sm:$0xff] }
  0xfa   :  { %4221 = vmatpush1.bf16.msra.mxu1 %v6114_v36  ;;  %695 = vmatprep.mubr.f32.mxu0 %v6933_v0  ;;  %v6188_v23 = vpack.c.bf16 %v914_v12, %v910_v9  ;;  %v6191_v39 = vpack.c.bf16 %v916_v15, %v912_v13  ;;  %v919_v9 = vld [vmem:[#allocation15 + $0x110] sm:$0xff]  ;;  %v926_v15 = vld [vmem:[#allocation15 + $0x148] sm:$0xff] }
  0xfb   :  { %808 = vmatprep.mubr.f32.mxu1 %v6933_v0  ;;  %4191 = vmatprep.subr.bf16.mxu0 %v6118_v40  ;;  %v923_v13 = vld [vmem:[#allocation15 + $0x130] sm:$0xff] }
  0xfc   :  { %696 = vmatmul.mubr.f32.gmra.mrb[28].mxu0 %v507_v49  ;;  %4223 = vmatprep.subr.bf16.mxu1 %v6121_v45  ;;  %7045 = vst [vmem:[#allocation57_spill] sm:$0xff] %v6188_v23  ;;  %7046 = vst [vmem:[#allocation58_spill] sm:$0xff] %v6191_v39  ;;  %v6210_v37 = vpack.c.bf16 %v923_v13, %v919_v9  ;;  %v933_v13 = vld [vmem:[#allocation15 + $0x180] sm:$0xff] }
  0xfd   :  { %809 = vmatmul.mubr.f32.gmra.mrb[28].mxu1 %v507_v49  ;;  %4193 = vmatpush1.bf16.msra.mxu0 %v6124_v50  ;;  %v906_v49 = vld [vmem:[#allocation15 + $0xa8] sm:$0xff] }
  0xfe   :  { %4225 = vmatpush1.bf16.msra.mxu1 %v6128_v55  ;;  %701 = vmatprep.mubr.f32.mxu0 %v6933_v0  ;;  %v6174_v61 = vpack.c.bf16 %v906_v49, %v902_v48  ;;  %v922_v48 = vld [vmem:[#allocation15 + $0x128] sm:$0xff]  ;;  %v920_v49 = vld [vmem:[#allocation15 + $0x118] sm:$0xff]  ;;  %7052 = vst [vmem:[#allocation64_spill] sm:$0xff] %v6210_v37 }
  0xff   :  { %814 = vmatprep.mubr.f32.mxu1 %v6933_v0  ;;  %4195 = vmatprep.subr.bf16.mxu0 %v6132_v59  ;;  %v6200_v2 = vpack.c.bf16 %v922_v48, %v918_v46  ;;  %v925_v46 = vld [vmem:[#allocation15 + $0x140] sm:$0xff] }
 0x100   :  { %702 = vmatmul.mubr.f32.gmra.mrb[30].mxu0 %v508_v5  ;;  %4227 = vmatprep.subr.bf16.mxu1 %v6135_v63  ;;  %v929_v48 = vld [vmem:[#allocation15 + $0x160] sm:$0xff] }
 0x101   :  { %815 = vmatmul.mubr.f32.gmra.mrb[30].mxu1 %v508_v5  ;;  %4197 = vmatpush1.bf16.msra.mxu0 %v6138_v6  ;;  %v6177_v5 = vpack.c.bf16 %v908_v53, %v904_v52  ;;  %v924_v52 = vld [vmem:[#allocation15 + $0x138] sm:$0xff]  ;;  %v6194_v53 = vpack.c.bf16 %v913_v29, %v909_v27  ;;  %7049 = vst [vmem:[#allocation61_spill] sm:$0xff] %v6200_v2 }
 0x102   :  { %4229 = vmatpush1.bf16.msra.mxu1 %v6142_v11  ;;  %1017 = vmatprep.mubr.f32.mxu0 %v6933_v0  ;;  %v6203_v12 = vpack.c.bf16 %v924_v52, %v920_v49  ;;  %v928_v27 = vld [vmem:[#allocation15 + $0x158] sm:$0xff]  ;;  %v927_v49 = vld [vmem:[#allocation15 + $0x150] sm:$0xff] }
 0x103   :  { %1088 = vmatprep.mubr.f32.mxu1 %v6933_v0  ;;  %4231 = vmatprep.subr.bf16.mxu0 %v6146_v16  ;;  %7047 = vst [vmem:[#allocation59_spill] sm:$0xff] %v6194_v53  ;;  %v932_v29 = vld [vmem:[#allocation15 + $0x178] sm:$0xff] }
 0x104   :  { %1018 = vmatmul.mubr.f32.vlgmr.msra.gmra.mrb[0].mxu0 %v6933_v0  ;;  %4263 = vmatprep.subr.bf16.mxu1 %v6149_v24  ;;  %7050 = vst [vmem:[#allocation62_spill] sm:$0xff] %v6203_v12  ;;  %v6215_v52 = vpack.c.bf16 %v932_v29, %v928_v27  ;;  %v935_v27 = vld [vmem:[#allocation15 + $0x190] sm:$0xff] }
 0x105   :  { %1089 = vmatmul.mubr.f32.vlgmr.msra.gmra.mrb[0].mxu1 %v6933_v0  ;;  %4233 = vmatpush1.bf16.msra.mxu0 %v6152_v30 }
 0x106   :  { %4265 = vmatpush1.bf16.msra.mxu1 %v6156_v33  ;;  %4235 = vmatprep.subr.bf16.mxu0 %v6158_v35  ;;  %7053 = vst [vmem:[#allocation65_spill] sm:$0xff] %v6215_v52 }
 0x107   :  { %4267 = vmatprep.subr.bf16.mxu1 %v6162_v43  ;;  %1181 = vmatprep.mubr.f32.mxu0 %v6933_v0 }
 0x108   :  { %1252 = vmatprep.mubr.f32.mxu1 %v6933_v0  ;;  %v930_v0 = vld [vmem:[#allocation15 + $0x168] sm:$0xff] }
 0x109   :  { %4237 = vmatpush1.bf16.msra.mxu0 %v6168_v56  ;;  %v6212_v42 = vpack.c.bf16 %v930_v0, %v926_v15  ;;  %v937_v15 = vld [vmem:[#allocation15 + $0x1a0] sm:$0xff] }
 0x10a   :  { %4269 = vmatpush1.bf16.msra.mxu1 %v6172_v58  ;;  %4239 = vmatprep.subr.bf16.mxu0 %v6174_v61 }
 0x10b   :  { %4271 = vmatprep.subr.bf16.mxu1 %v6177_v5 }
 0x10d   :  { %4241 = vmatpush1.bf16.msra.mxu0 %v6182_v19 }
 0x10e   :  { %4273 = vmatpush1.bf16.msra.mxu1 %v6186_v20  ;;  %4243 = vmatprep.subr.bf16.mxu0 %v6188_v23  ;;  %v6206_v20 = vpack.c.bf16 %v921_v8, %v917_v3  ;;  %v934_v23 = vld [vmem:[#allocation15 + $0x188] sm:$0xff]  ;;  %v936_v3 = vld [vmem:[#allocation15 + $0x198] sm:$0xff] }
 0x10f   :  { %4275 = vmatprep.subr.bf16.mxu1 %v6191_v39  ;;  %v931_v39 = vld [vmem:[#allocation15 + $0x170] sm:$0xff]  ;;  %v940_v8 = vld [vmem:[#allocation15 + $0x1b8] sm:$0xff] }
 0x110   :  { %7051 = vst [vmem:[#allocation63_spill] sm:$0xff] %v6206_v20  ;;  %v6222_v0 = vpack.c.bf16 %v931_v39, %v927_v49  ;;  %v6227_v29 = vpack.c.bf16 %v940_v8, %v936_v3  ;;  %v945_v49 = vld [vmem:[#allocation15 + $0x1e0] sm:$0xff]  ;;  %v943_v8 = vld [vmem:[#allocation15 + $0x1d0] sm:$0xff] }
 0x111   :  { %4245 = vmatpush1.bf16.msra.mxu0 %v6194_v53  ;;  %v938_v53 = vld [vmem:[#allocation15 + $0x1a8] sm:$0xff] }
 0x112   :  { %4277 = vmatpush1.bf16.msra.mxu1 %v6198_v62  ;;  %4247 = vmatprep.subr.bf16.mxu0 %v6200_v2  ;;  %v6218_v62 = vpack.c.bf16 %v929_v48, %v925_v46  ;;  %v6224_v9 = vpack.c.bf16 %v938_v53, %v934_v23  ;;  %v942_v2 = vld [vmem:[#allocation15 + $0x1c8] sm:$0xff]  ;;  %v944_v46 = vld [vmem:[#allocation15 + $0x1d8] sm:$0xff]  ;;  %v941_v53 = vld [vmem:[#allocation15 + $0x1c0] sm:$0xff] }
 0x113   :  { %4279 = vmatprep.subr.bf16.mxu1 %v6203_v12  ;;  %v939_v12 = vld [vmem:[#allocation15 + $0x1b0] sm:$0xff]  ;;  %v948_v48 = vld [vmem:[#allocation15 + $0x1f8] sm:$0xff] }
 0x114   :  { %v6234_v23 = vpack.c.bf16 %v939_v12, %v935_v27  ;;  %v6239_v3 = vpack.c.bf16 %v948_v48, %v944_v46  ;;  %v253_v27 = vld [vmem:[%s6923_s4] sm:$0xf] }
 0x115   :  { %4249 = vmatpush1.bf16.msra.mxu0 %v6206_v20  ;;  %v946_v20 = vld [vmem:[#allocation15 + $0x1e8] sm:$0xff] }
 0x116   :  { %4281 = vmatpush1.bf16.msra.mxu1 %v6210_v37  ;;  %4251 = vmatprep.subr.bf16.mxu0 %v6212_v42  ;;  %v6230_v37 = vpack.c.bf16 %v937_v15, %v933_v13  ;;  %v6236_v39 = vpack.c.bf16 %v946_v20, %v942_v2  ;;  %v6242_v13 = vpack.c.bf16 %v945_v49, %v941_v53  ;;  %v7054_v20 = vmov 0.0  }
 0x117   :  { %4283 = vmatprep.subr.bf16.mxu1 %v6215_v52  ;;  %v947_v52 = vld [vmem:[#allocation15 + $0x1f0] sm:$0xff]  ;;  %v255_v2 = vlaneseq }
 0x118   :  { %v6246_v12 = vpack.c.bf16 %v947_v52, %v943_v8 }
 0x119   :  { %4253 = vmatpush1.bf16.msra.mxu0 %v6218_v62  ;;  %v256_v52 = vshrl.u32 %v255_v2, 7 }
 0x11a   :  { %4285 = vmatpush1.bf16.msra.mxu1 %v6222_v0  ;;  %4255 = vmatprep.subr.bf16.mxu0 %v6224_v9 }
 0x11b   :  { %4287 = vmatprep.subr.bf16.mxu1 %v6227_v29  ;;  %v257_v15 = vsub.s32 0, %v256_v52  ;;  %v261_v46 = vsub.s32 1, %v256_v52  ;;  %v265_v53 = vsub.s32 2, %v256_v52 }
 0x11d   :  { %4257 = vmatpush1.bf16.msra.mxu0 %v6230_v37  ;;  %v6292_v48 = vrot.slane %v253_v27, %v257_v15  ;;  %v6294_v49 = vrot.slane %v253_v27, %v261_v46 }
 0x11e   :  { %4289 = vmatpush1.bf16.msra.mxu1 %v6234_v23  ;;  %4259 = vmatprep.subr.bf16.mxu0 %v6236_v39 }
 0x11f   :  { %4291 = vmatprep.subr.bf16.mxu1 %v6239_v3  ;;  %7055 = vst [vmem:[#allocation66_spill] sm:$0xff] %v6292_v48  ;;  %7056 = vst [vmem:[#allocation67_spill] sm:$0xff] %v6294_v49 }
 0x121   :  { %4261 = vmatpush1.bf16.msra.mxu0 %v6242_v13 }
 0x122   :  { %4293 = vmatpush1.bf16.msra.mxu1 %v6246_v12  ;;  %4295 = vmatprep.subr.bf16.mxu0 %v6037_v18 }
 0x123   :  { %4327 = vmatprep.subr.bf16.mxu1 %v6039_v21 }
 0x124   :  { %1182 = vmatmul.mubr.f32.vlgmr.msra.gmra.mrb[30].mxu0 %v7054_v20 }
 0x125   :  { %1253 = vmatmul.mubr.f32.vlgmr.msra.gmra.mrb[30].mxu1 %v7054_v20  ;;  %4297 = vmatpush1.bf16.msra.mxu0 %v6041_v25 }
 0x126   :  { %4329 = vmatpush1.bf16.msra.mxu1 %v6044_v28  ;;  %4299 = vmatprep.subr.bf16.mxu0 %v6048_v31 }
 0x127   :  { %4331 = vmatprep.subr.bf16.mxu1 %v6051_v34  ;;  %1345 = vmatprep.mubr.f32.mxu0 %v7054_v20 }
 0x128   :  { %1416 = vmatprep.mubr.f32.mxu1 %v7054_v20 }
 0x129   :  { %4301 = vmatpush1.bf16.msra.mxu0 %v6054_v38 }
 0x12a   :  { %4333 = vmatpush1.bf16.msra.mxu1 %v6058_v41  ;;  %4303 = vmatprep.subr.bf16.mxu0 %v6062_v44 }
 0x12b   :  { %4335 = vmatprep.subr.bf16.mxu1 %v6065_v47 }
 0x12d   :  { %4305 = vmatpush1.bf16.msra.mxu0 %v6068_v51 }
 0x12e   :  { %4337 = vmatpush1.bf16.msra.mxu1 %v6072_v54  ;;  %4307 = vmatprep.subr.bf16.mxu0 %v6076_v57 }
 0x12f   :  { %4339 = vmatprep.subr.bf16.mxu1 %v6079_v60 }
 0x131   :  { %4309 = vmatpush1.bf16.msra.mxu0 %v6082_v1 }
 0x132   :  { %4341 = vmatpush1.bf16.msra.mxu1 %v6086_v4  ;;  %4311 = vmatprep.subr.bf16.mxu0 %v6090_v7 }
 0x133   :  { %4343 = vmatprep.subr.bf16.mxu1 %v6093_v10 }
 0x135   :  { %4313 = vmatpush1.bf16.msra.mxu0 %v6096_v14 }
 0x136   :  { %4345 = vmatpush1.bf16.msra.mxu1 %v6100_v17  ;;  %4315 = vmatprep.subr.bf16.mxu0 %v6104_v22 }
 0x137   :  { %4347 = vmatprep.subr.bf16.mxu1 %v6107_v26 }
 0x139   :  { %4317 = vmatpush1.bf16.msra.mxu0 %v6110_v32 }
 0x13a   :  { %4349 = vmatpush1.bf16.msra.mxu1 %v6114_v36  ;;  %4319 = vmatprep.subr.bf16.mxu0 %v6118_v40 }
 0x13b   :  { %4351 = vmatprep.subr.bf16.mxu1 %v6121_v45 }
 0x13d   :  { %4321 = vmatpush1.bf16.msra.mxu0 %v6124_v50 }
 0x13e   :  { %4353 = vmatpush1.bf16.msra.mxu1 %v6128_v55  ;;  %4323 = vmatprep.subr.bf16.mxu0 %v6132_v59 }
 0x13f   :  { %4355 = vmatprep.subr.bf16.mxu1 %v6135_v63  ;;  %v269_v63 = vsub.s32 3, %v256_v52 }
 0x141   :  { %4325 = vmatpush1.bf16.msra.mxu0 %v6138_v6  ;;  %v6297_v6 = vrot.slane %v253_v27, %v265_v53  ;;  %v6301_v40 = vrot.slane %v253_v27, %v269_v63 }
 0x142   :  { %4357 = vmatpush1.bf16.msra.mxu1 %v6142_v11  ;;  %4359 = vmatprep.subr.bf16.mxu0 %v6146_v16 }
 0x143   :  { %4391 = vmatprep.subr.bf16.mxu1 %v6149_v24 }
 0x1d7   :  { %v1019_v8 = vpop.f32.mrb[0].mxu0 }
 0x1d8   :  { %v5262_v11 = vadd.f32 %v1019_v8, %v6292_v48  ;;  %v1090_v16 = vpop.f32.mrb[0].mxu1  ;;  %v1021_v24 = vpop.f32.mrb[1].mxu0 }
 0x1d9   :  { %v5263_v2 = vadd.f32 %v1021_v24, %v6294_v49  ;;  %v1092_v59 = vpop.f32.mrb[1].mxu1  ;;  %v5278_v45 = vadd.f32 %v1090_v16, %v6297_v6 }
 0x1da   :  { %v1099_v55 = vmul.f32 0.5, %v5262_v11  ;;  %v5279_v36 = vadd.f32 %v1092_v59, %v6301_v40 }
 0x1db   :  { %v1103_v50 = vmul.f32 0.5, %v5263_v2 }
 0x1dc   :  { %5407 = vtanh.f32 %v1099_v55  ;;  %v1108_v8 = vmul.f32 0.5, %v5279_v36 }
 0x1dd   :  { %5409 = vtanh.f32 %v1103_v50 }
 0x1de   :  { %5411 = vtanh.f32 %v5278_v45  ;;  %v573_v45 = vld [vmem:[%s6926_s7] sm:$0xf] }
 0x1df   :  { %5413 = vtanh.f32 %v1108_v8  ;;  %v6310_v36 = vrot.slane %v573_v45, %v257_v15  ;;  %v6312_v16 = vrot.slane %v573_v45, %v261_v46  ;;  %v6319_v46 = vrot.slane %v573_v45, %v269_v63 }
 0x1e6   :  { %v5408_v48 = vpop.eup %5407 }
 0x1e7   :  { %v5410_v32 = vpop.eup %5409  ;;  %v1101_v26 = vmul.f32 0.5, %v5408_v48 }
 0x1e8   :  { %v1105_v22 = vmul.f32 0.5, %v5410_v32  ;;  %v5412_v24 = vpop.eup %5411 }
 0x1e9   :  { %v1102_v52 = vadd.f32 0.5, %v1101_v26  ;;  %v5414_v50 = vpop.eup %5413 }
 0x1ea   :  { %v1106_v49 = vadd.f32 0.5, %v1105_v22  ;;  %v1110_v59 = vmul.f32 0.5, %v5414_v50  ;;  %v6315_v22 = vrot.slane %v573_v45, %v265_v53  ;;  %v7058_v45 = vld [vmem:[#allocation56_spill] sm:$0xff] }
 0x1eb   :  { %v1113_v11 = vmul.f32 %v5412_v24, %v1102_v52 }
 0x1ec   :  { %v1112_v2 = vmul.f32 0.0, %v1106_v49  ;;  %v1111_v49 = vadd.f32 0.5, %v1110_v59 }
 0x1ee   :  { %v6304_v55 = vadd.f32 %v1113_v11, %v1112_v2 }
 0x1f0   :  { %7057 = vst [vmem:[#allocation68_spill] sm:$0xff] %v6304_v55  ;;  %5415 = vtanh.f32 %v6304_v55 }
 0x1f7   :  { %v1183_v32 = vpop.f32.mrb[30].mxu0 }
 0x1f8   :  { %v5308_v26 = vadd.f32 %v1183_v32, %v6310_v36  ;;  %v1254_v27 = vpop.f32.mrb[30].mxu1  ;;  %v1185_v48 = vpop.f32.mrb[31].mxu0  ;;  %v7059_v32 = vld [vmem:[#allocation57_spill] sm:$0xff] }
 0x1f9   :  { %v5309_v8 = vadd.f32 %v1185_v48, %v6312_v16  ;;  %v1256_v52 = vpop.f32.mrb[31].mxu1  ;;  %v5324_v15 = vadd.f32 %v1254_v27, %v6315_v22 }
 0x1fa   :  { %v5416_v24 = vpop.eup %5415  ;;  %v1263_v11 = vmul.f32 0.5, %v5308_v26  ;;  %v5325_v53 = vadd.f32 %v1256_v52, %v6319_v46  ;;  %v7060_v26 = vld [vmem:[#allocation58_spill] sm:$0xff]  ;;  %v7061_v52 = vld [vmem:[#allocation59_spill] sm:$0xff] }
 0x1fb   :  { %v1116_v2 = vmul.f32 %v5416_v24, %v1111_v49  ;;  %v1267_v55 = vmul.f32 0.5, %v5309_v8  ;;  %v7062_v24 = vld [vmem:[#allocation60_spill] sm:$0xff] }
 0x1fc   :  { %5417 = vtanh.f32 %v1263_v11  ;;  %v1272_v63 = vmul.f32 0.5, %v5325_v53 }
 0x1fd   :  { %5419 = vtanh.f32 %v1267_v55  ;;  %1346 = vmatmul.mubr.f32.vlgmr.msra.gmra.mrb[2].mxu0 %v1116_v2  ;;  %1417 = vmatmul.mubr.f32.vlgmr.msra.gmra.mrb[2].mxu1 %v1116_v2  ;;  %v7063_v2 = vld [vmem:[#allocation61_spill] sm:$0xff] }
 0x1fe   :  { %4361 = vmatpush1.bf16.msra.mxu0 %v6152_v30  ;;  %4393 = vmatpush1.bf16.msra.mxu1 %v6156_v33  ;;  %5421 = vtanh.f32 %v5324_v15  ;;  %v7064_v15 = vld [vmem:[#allocation62_spill] sm:$0xff] }
 0x1ff   :  { %4363 = vmatprep.subr.bf16.mxu0 %v6158_v35  ;;  %4395 = vmatprep.subr.bf16.mxu1 %v6162_v43  ;;  %5423 = vtanh.f32 %v1272_v63  ;;  %v7067_v63 = vld [vmem:[#allocation65_spill] sm:$0xff] }
 0x200   :  { %1509 = vmatprep.mubr.f32.mxu0 %v7054_v20  ;;  %1580 = vmatprep.mubr.f32.mxu1 %v7054_v20 }
 0x202   :  { %4365 = vmatpush1.bf16.msra.mxu0 %v6168_v56  ;;  %4397 = vmatpush1.bf16.msra.mxu1 %v6172_v58 }
 0x203   :  { %4367 = vmatprep.subr.bf16.mxu0 %v6174_v61  ;;  %4399 = vmatprep.subr.bf16.mxu1 %v6177_v5 }
 0x206   :  { %v5418_v55 = vpop.eup %5417  ;;  %4369 = vmatpush1.bf16.msra.mxu0 %v6182_v19  ;;  %4401 = vmatpush1.bf16.msra.mxu1 %v7058_v45 }
 0x207   :  { %v5420_v50 = vpop.eup %5419  ;;  %v1265_v59 = vmul.f32 0.5, %v5418_v55  ;;  %4371 = vmatprep.subr.bf16.mxu0 %v7059_v32  ;;  %4403 = vmatprep.subr.bf16.mxu1 %v7060_v26  ;;  %v7065_v32 = vld [vmem:[#allocation63_spill] sm:$0xff]  ;;  %v7066_v26 = vld [vmem:[#allocation64_spill] sm:$0xff] }
 0x208   :  { %v1269_v27 = vmul.f32 0.5, %v5420_v50  ;;  %v5422_v49 = vpop.eup %5421 }
 0x209   :  { %v1266_v48 = vadd.f32 0.5, %v1265_v59  ;;  %v5424_v50 = vpop.eup %5423 }
 0x20a   :  { %v1270_v8 = vadd.f32 0.5, %v1269_v27  ;;  %4373 = vmatpush1.bf16.msra.mxu0 %v7061_v52  ;;  %4405 = vmatpush1.bf16.msra.mxu1 %v7062_v24  ;;  %v1274_v59 = vmul.f32 0.5, %v5424_v50  ;;  %v7071_v50 = vld [vmem:[#allocation45_spill] sm:$0xff] }
 0x20b   :  { %v1277_v11 = vmul.f32 %v5422_v49, %v1266_v48  ;;  %4375 = vmatprep.subr.bf16.mxu0 %v7063_v2  ;;  %4407 = vmatprep.subr.bf16.mxu1 %v7064_v15 }
 0x20c   :  { %v1276_v53 = vmul.f32 0.0, %v1270_v8  ;;  %v1275_v27 = vadd.f32 0.5, %v1274_v59  ;;  %v7068_v8 = vld [vmem:[#allocation42_spill] sm:$0xff] }
 0x20d   :  { %v7072_v59 = vld [vmem:[#allocation46_spill] sm:$0xff] }
 0x20e   :  { %v6340_v55 = vadd.f32 %v1277_v11, %v1276_v53  ;;  %4377 = vmatpush1.bf16.msra.mxu0 %v7065_v32  ;;  %4409 = vmatpush1.bf16.msra.mxu1 %v7066_v26  ;;  %v7069_v11 = vld [vmem:[#allocation43_spill] sm:$0xff]  ;;  %v7070_v53 = vld [vmem:[#allocation44_spill] sm:$0xff] }
 0x20f   :  { %4379 = vmatprep.subr.bf16.mxu0 %v6212_v42  ;;  %4411 = vmatprep.subr.bf16.mxu1 %v7067_v63 }
 0x210   :  { %5425 = vtanh.f32 %v6340_v55 }
 0x212   :  { %4381 = vmatpush1.bf16.msra.mxu0 %v6218_v62  ;;  %4413 = vmatpush1.bf16.msra.mxu1 %v6222_v0 }
 0x213   :  { %4383 = vmatprep.subr.bf16.mxu0 %v6224_v9  ;;  %4415 = vmatprep.subr.bf16.mxu1 %v6227_v29 }
 0x216   :  { %4385 = vmatpush1.bf16.msra.mxu0 %v6230_v37  ;;  %4417 = vmatpush1.bf16.msra.mxu1 %v6234_v23 }
 0x217   :  { %4387 = vmatprep.subr.bf16.mxu0 %v6236_v39  ;;  %4419 = vmatprep.subr.bf16.mxu1 %v6239_v3 }
 0x21a   :  { %v5426_v48 = vpop.eup %5425  ;;  %4389 = vmatpush1.bf16.msra.mxu0 %v6242_v13  ;;  %4421 = vmatpush1.bf16.msra.mxu1 %v6246_v12 }
 0x21b   :  { %v1280_v49 = vmul.f32 %v5426_v48, %v1275_v27  ;;  %4423 = vmatprep.subr.bf16.mxu0 %v6037_v18  ;;  %4455 = vmatprep.subr.bf16.mxu1 %v6039_v21  ;;  %v7073_v27 = vld [vmem:[#allocation47_spill] sm:$0xff]  ;;  %v7074_v48 = vld [vmem:[#allocation48_spill] sm:$0xff] }
 0x21d   :  { %1510 = vmatmul.mubr.f32.vlgmr.msra.gmra.mrb[28].mxu0 %v1280_v49  ;;  %1581 = vmatmul.mubr.f32.vlgmr.msra.gmra.mrb[28].mxu1 %v1280_v49  ;;  %v7075_v49 = vld [vmem:[#allocation49_spill] sm:$0xff] }
 0x21e   :  { %4425 = vmatpush1.bf16.msra.mxu0 %v6041_v25  ;;  %4457 = vmatpush1.bf16.msra.mxu1 %v6044_v28 }
 0x21f   :  { %4427 = vmatprep.subr.bf16.mxu0 %v6048_v31  ;;  %4459 = vmatprep.subr.bf16.mxu1 %v6051_v34 }
 0x220   :  { %1673 = vmatprep.mubr.f32.mxu0 %v7054_v20  ;;  %1744 = vmatprep.mubr.f32.mxu1 %v7054_v20 }
 0x222   :  { %4429 = vmatpush1.bf16.msra.mxu0 %v6054_v38  ;;  %4461 = vmatpush1.bf16.msra.mxu1 %v6058_v41 }
 0x223   :  { %4431 = vmatprep.subr.bf16.mxu0 %v6062_v44  ;;  %4463 = vmatprep.subr.bf16.mxu1 %v6065_v47 }
 0x226   :  { %4433 = vmatpush1.bf16.msra.mxu0 %v6068_v51  ;;  %4465 = vmatpush1.bf16.msra.mxu1 %v6072_v54 }
 0x227   :  { %4435 = vmatprep.subr.bf16.mxu0 %v6076_v57  ;;  %4467 = vmatprep.subr.bf16.mxu1 %v6079_v60 }
 0x22a   :  { %4437 = vmatpush1.bf16.msra.mxu0 %v6082_v1  ;;  %4469 = vmatpush1.bf16.msra.mxu1 %v6086_v4  ;;  %v7083_v1 = vld [vmem:[#allocation67_spill] sm:$0xff] }
 0x22b   :  { %4439 = vmatprep.subr.bf16.mxu0 %v6090_v7  ;;  %4471 = vmatprep.subr.bf16.mxu1 %v6093_v10  ;;  %v7076_v10 = vld [vmem:[#allocation50_spill] sm:$0xff] }
 0x22c   :  { %v7082_v7 = vld [vmem:[#allocation66_spill] sm:$0xff] }
 0x22e   :  { %4441 = vmatpush1.bf16.msra.mxu0 %v6096_v14  ;;  %4473 = vmatpush1.bf16.msra.mxu1 %v6100_v17  ;;  %v7077_v14 = vld [vmem:[#allocation51_spill] sm:$0xff]  ;;  %v7078_v17 = vld [vmem:[#allocation52_spill] sm:$0xff] }
 0x22f   :  { %4443 = vmatprep.subr.bf16.mxu0 %v7068_v8  ;;  %4475 = vmatprep.subr.bf16.mxu1 %v7069_v11  ;;  %v7079_v8 = vld [vmem:[#allocation53_spill] sm:$0xff]  ;;  %v7080_v11 = vld [vmem:[#allocation54_spill] sm:$0xff] }
 0x232   :  { %4445 = vmatpush1.bf16.msra.mxu0 %v7070_v53  ;;  %4477 = vmatpush1.bf16.msra.mxu1 %v7071_v50  ;;  %v7081_v53 = vld [vmem:[#allocation55_spill] sm:$0xff] }
 0x233   :  { %4447 = vmatprep.subr.bf16.mxu0 %v7072_v59  ;;  %4479 = vmatprep.subr.bf16.mxu1 %v7073_v27 }
 0x236   :  { %4449 = vmatpush1.bf16.msra.mxu0 %v7074_v48  ;;  %4481 = vmatpush1.bf16.msra.mxu1 %v7075_v49 }
 0x237   :  { %4451 = vmatprep.subr.bf16.mxu0 %v7076_v10  ;;  %4483 = vmatprep.subr.bf16.mxu1 %v7077_v14 }
 0x23a   :  { %4453 = vmatpush1.bf16.msra.mxu0 %v7078_v17  ;;  %4485 = vmatpush1.bf16.msra.mxu1 %v7079_v8 }
 0x23b   :  { %4487 = vmatprep.subr.bf16.mxu0 %v7080_v11  ;;  %4519 = vmatprep.subr.bf16.mxu1 %v7081_v53 }
 0x2d0   :  { %v1347_v50 = vpop.f32.mrb[2].mxu0  ;;  %v1418_v59 = vpop.f32.mrb[2].mxu1 }
 0x2d1   :  { %v5264_v27 = vadd.f32 %v1347_v50, %v7082_v7  ;;  %v1349_v4 = vpop.f32.mrb[3].mxu0  ;;  %v1420_v48 = vpop.f32.mrb[3].mxu1  ;;  %v5280_v14 = vadd.f32 %v1418_v59, %v6297_v6 }
 0x2d2   :  { %v5265_v49 = vadd.f32 %v1349_v4, %v7083_v1  ;;  %v5281_v8 = vadd.f32 %v1420_v48, %v6301_v40  ;;  %v7084_v4 = vld [vmem:[#allocation68_spill] sm:$0xff] }
 0x2d3   :  { %v1427_v60 = vmul.f32 0.5, %v5264_v27 }
 0x2d4   :  { %v1431_v10 = vmul.f32 0.5, %v5265_v49  ;;  %v1436_v11 = vmul.f32 0.5, %v5281_v8 }
 0x2d5   :  { %5427 = vtanh.f32 %v1427_v60 }
 0x2d6   :  { %5429 = vtanh.f32 %v1431_v10 }
 0x2d7   :  { %5431 = vtanh.f32 %v5280_v14 }
 0x2d8   :  { %5433 = vtanh.f32 %v1436_v11 }
 0x2df   :  { %v5428_v17 = vpop.eup %5427 }
 0x2e0   :  { %v5430_v53 = vpop.eup %5429  ;;  %v1429_v57 = vmul.f32 0.5, %v5428_v17 }
 0x2e1   :  { %v1433_v54 = vmul.f32 0.5, %v5430_v53  ;;  %v5432_v7 = vpop.eup %5431 }
 0x2e2   :  { %v1430_v50 = vadd.f32 0.5, %v1429_v57  ;;  %v5434_v60 = vpop.eup %5433 }
 0x2e3   :  { %v1434_v51 = vadd.f32 0.5, %v1433_v54  ;;  %v1438_v10 = vmul.f32 0.5, %v5434_v60 }
 0x2e4   :  { %v1441_v47 = vmul.f32 %v5432_v7, %v1430_v50 }
 0x2e5   :  { %v1440_v27 = vmul.f32 %v1434_v51, %v7084_v4  ;;  %v1439_v53 = vadd.f32 0.5, %v1438_v10 }
 0x2e7   :  { %v6398_v49 = vadd.f32 %v1441_v47, %v1440_v27 }
 0x2e9   :  { %5435 = vtanh.f32 %v6398_v49 }
 0x2f0   :  { %v1511_v14 = vpop.f32.mrb[28].mxu0  ;;  %v1582_v59 = vpop.f32.mrb[28].mxu1 }
 0x2f1   :  { %v5306_v8 = vadd.f32 %v1511_v14, %v6310_v36  ;;  %v1513_v48 = vpop.f32.mrb[29].mxu0  ;;  %v1584_v17 = vpop.f32.mrb[29].mxu1  ;;  %v5322_v47 = vadd.f32 %v1582_v59, %v6315_v22  ;;  %v7085_v14 = vld [vmem:[#allocation57_spill] sm:$0xff]  ;;  %v7086_v59 = vld [vmem:[#allocation58_spill] sm:$0xff] }
 0x2f2   :  { %v5307_v57 = vadd.f32 %v1513_v48, %v6312_v16  ;;  %v5323_v51 = vadd.f32 %v1584_v17, %v6319_v46 }
 0x2f3   :  { %v5436_v11 = vpop.eup %5435  ;;  %v1591_v54 = vmul.f32 0.5, %v5306_v8 }
 0x2f4   :  { %v1444_v7 = vmul.f32 %v5436_v11, %v1439_v53  ;;  %v1595_v50 = vmul.f32 0.5, %v5307_v57  ;;  %v1600_v4 = vmul.f32 0.5, %v5323_v51 }
 0x2f5   :  { %5437 = vtanh.f32 %v1591_v54 }
 0x2f6   :  { %5439 = vtanh.f32 %v1595_v50  ;;  %1674 = vmatmul.mubr.f32.vlgmr.msra.gmra.mrb[4].mxu0 %v1444_v7  ;;  %1745 = vmatmul.mubr.f32.vlgmr.msra.gmra.mrb[4].mxu1 %v1444_v7 }
 0x2f7   :  { %4489 = vmatpush1.bf16.msra.mxu0 %v6152_v30  ;;  %4521 = vmatpush1.bf16.msra.mxu1 %v6156_v33  ;;  %5441 = vtanh.f32 %v5322_v47 }
 0x2f8   :  { %4491 = vmatprep.subr.bf16.mxu0 %v6158_v35  ;;  %4523 = vmatprep.subr.bf16.mxu1 %v6162_v43  ;;  %5443 = vtanh.f32 %v1600_v4  ;;  %v7087_v4 = vld [vmem:[#allocation31_spill] sm:$0xff] }
 0x2f9   :  { %1837 = vmatprep.mubr.f32.mxu0 %v7054_v20  ;;  %1908 = vmatprep.mubr.f32.mxu1 %v7054_v20 }
 0x2fb   :  { %4493 = vmatpush1.bf16.msra.mxu0 %v6168_v56  ;;  %4525 = vmatpush1.bf16.msra.mxu1 %v6172_v58 }
 0x2fc   :  { %4495 = vmatprep.subr.bf16.mxu0 %v6174_v61  ;;  %4527 = vmatprep.subr.bf16.mxu1 %v6177_v5 }
 0x2ff   :  { %v5438_v27 = vpop.eup %5437  ;;  %4497 = vmatpush1.bf16.msra.mxu0 %v6182_v19  ;;  %4529 = vmatpush1.bf16.msra.mxu1 %v7058_v45 }
 0x300   :  { %v5440_v60 = vpop.eup %5439  ;;  %v1593_v10 = vmul.f32 0.5, %v5438_v27  ;;  %4499 = vmatprep.subr.bf16.mxu0 %v7085_v14  ;;  %4531 = vmatprep.subr.bf16.mxu1 %v7086_v59  ;;  %v7088_v27 = vld [vmem:[#allocation32_spill] sm:$0xff] }
 0x301   :  { %v1597_v8 = vmul.f32 0.5, %v5440_v60  ;;  %v5442_v17 = vpop.eup %5441  ;;  %v7089_v60 = vld [vmem:[#allocation33_spill] sm:$0xff] }
 0x302   :  { %v1594_v48 = vadd.f32 0.5, %v1593_v10  ;;  %v5444_v7 = vpop.eup %5443  ;;  %v7090_v10 = vld [vmem:[#allocation34_spill] sm:$0xff] }
 0x303   :  { %v1598_v53 = vadd.f32 0.5, %v1597_v8  ;;  %4501 = vmatpush1.bf16.msra.mxu0 %v7061_v52  ;;  %4533 = vmatpush1.bf16.msra.mxu1 %v7062_v24  ;;  %v7091_v8 = vld [vmem:[#allocation35_spill] sm:$0xff] }
 0x304   :  { %v1605_v57 = vmul.f32 %v5442_v17, %v1594_v48  ;;  %4503 = vmatprep.subr.bf16.mxu0 %v7063_v2  ;;  %4535 = vmatprep.subr.bf16.mxu1 %v7064_v15  ;;  %v7092_v48 = vld [vmem:[#allocation36_spill] sm:$0xff]  ;;  %v7093_v17 = vld [vmem:[#allocation37_spill] sm:$0xff] }
 0x305   :  { %v1604_v11 = vmul.f32 %v1598_v53, %v6340_v55  ;;  %v1602_v55 = vmul.f32 0.5, %v5444_v7  ;;  %v7094_v53 = vld [vmem:[#allocation38_spill] sm:$0xff]  ;;  %v7097_v7 = vld [vmem:[#allocation41_spill] sm:$0xff] }
 0x307   :  { %v6424_v54 = vadd.f32 %v1605_v57, %v1604_v11  ;;  %4505 = vmatpush1.bf16.msra.mxu0 %v7065_v32  ;;  %4537 = vmatpush1.bf16.msra.mxu1 %v7066_v26  ;;  %v1603_v50 = vadd.f32 0.5, %v1602_v55  ;;  %v7095_v57 = vld [vmem:[#allocation39_spill] sm:$0xff]  ;;  %v7096_v11 = vld [vmem:[#allocation40_spill] sm:$0xff]  ;;  %v7098_v55 = vld [vmem:[#allocation42_spill] sm:$0xff] }
 0x308   :  { %4507 = vmatprep.subr.bf16.mxu0 %v6212_v42  ;;  %4539 = vmatprep.subr.bf16.mxu1 %v7067_v63 }
 0x309   :  { %5445 = vtanh.f32 %v6424_v54 }
 0x30b   :  { %4509 = vmatpush1.bf16.msra.mxu0 %v6218_v62  ;;  %4541 = vmatpush1.bf16.msra.mxu1 %v6222_v0 }
 0x30c   :  { %4511 = vmatprep.subr.bf16.mxu0 %v6224_v9  ;;  %4543 = vmatprep.subr.bf16.mxu1 %v6227_v29 }
 0x30f   :  { %4513 = vmatpush1.bf16.msra.mxu0 %v6230_v37  ;;  %4545 = vmatpush1.bf16.msra.mxu1 %v6234_v23 }
 0x310   :  { %4515 = vmatprep.subr.bf16.mxu0 %v6236_v39  ;;  %4547 = vmatprep.subr.bf16.mxu1 %v6239_v3 }
 0x313   :  { %v5446_v47 = vpop.eup %5445  ;;  %4517 = vmatpush1.bf16.msra.mxu0 %v6242_v13  ;;  %4549 = vmatpush1.bf16.msra.mxu1 %v6246_v12 }
 0x314   :  { %v1608_v51 = vmul.f32 %v5446_v47, %v1603_v50  ;;  %4551 = vmatprep.subr.bf16.mxu0 %v6037_v18  ;;  %4583 = vmatprep.subr.bf16.mxu1 %v6039_v21  ;;  %v7099_v50 = vld [vmem:[#allocation43_spill] sm:$0xff]  ;;  %v7100_v47 = vld [vmem:[#allocation44_spill] sm:$0xff] }
 0x316   :  { %1838 = vmatmul.mubr.f32.vlgmr.msra.gmra.mrb[26].mxu0 %v1608_v51  ;;  %1909 = vmatmul.mubr.f32.vlgmr.msra.gmra.mrb[26].mxu1 %v1608_v51  ;;  %v7101_v51 = vld [vmem:[#allocation45_spill] sm:$0xff] }
 0x317   :  { %4553 = vmatpush1.bf16.msra.mxu0 %v6041_v25  ;;  %4585 = vmatpush1.bf16.msra.mxu1 %v6044_v28 }
 0x318   :  { %4555 = vmatprep.subr.bf16.mxu0 %v6048_v31  ;;  %4587 = vmatprep.subr.bf16.mxu1 %v6051_v34 }
 0x319   :  { %2001 = vmatprep.mubr.f32.mxu0 %v7054_v20  ;;  %2072 = vmatprep.mubr.f32.mxu1 %v7054_v20 }
 0x31b   :  { %4557 = vmatpush1.bf16.msra.mxu0 %v6054_v38  ;;  %4589 = vmatpush1.bf16.msra.mxu1 %v6058_v41 }
 0x31c   :  { %4559 = vmatprep.subr.bf16.mxu0 %v6062_v44  ;;  %4591 = vmatprep.subr.bf16.mxu1 %v7087_v4 }
 0x31f   :  { %4561 = vmatpush1.bf16.msra.mxu0 %v7088_v27  ;;  %4593 = vmatpush1.bf16.msra.mxu1 %v7089_v60 }
 0x320   :  { %4563 = vmatprep.subr.bf16.mxu0 %v7090_v10  ;;  %4595 = vmatprep.subr.bf16.mxu1 %v7091_v8  ;;  %v7102_v8 = vld [vmem:[#allocation46_spill] sm:$0xff] }
 0x321   :  { %v7112_v10 = vld [vmem:[#allocation66_spill] sm:$0xff] }
 0x323   :  { %4565 = vmatpush1.bf16.msra.mxu0 %v7092_v48  ;;  %4597 = vmatpush1.bf16.msra.mxu1 %v7093_v17  ;;  %v7103_v48 = vld [vmem:[#allocation47_spill] sm:$0xff]  ;;  %v7104_v17 = vld [vmem:[#allocation48_spill] sm:$0xff] }
 0x324   :  { %4567 = vmatprep.subr.bf16.mxu0 %v7094_v53  ;;  %4599 = vmatprep.subr.bf16.mxu1 %v7095_v57  ;;  %v7105_v53 = vld [vmem:[#allocation49_spill] sm:$0xff]  ;;  %v7106_v57 = vld [vmem:[#allocation50_spill] sm:$0xff] }
 0x327   :  { %4569 = vmatpush1.bf16.msra.mxu0 %v7096_v11  ;;  %4601 = vmatpush1.bf16.msra.mxu1 %v7097_v7  ;;  %v7107_v11 = vld [vmem:[#allocation51_spill] sm:$0xff]  ;;  %v7108_v7 = vld [vmem:[#allocation52_spill] sm:$0xff] }
 0x328   :  { %4571 = vmatprep.subr.bf16.mxu0 %v7098_v55  ;;  %4603 = vmatprep.subr.bf16.mxu1 %v7099_v50  ;;  %v7109_v55 = vld [vmem:[#allocation53_spill] sm:$0xff]  ;;  %v7110_v50 = vld [vmem:[#allocation54_spill] sm:$0xff] }
 0x32b   :  { %4573 = vmatpush1.bf16.msra.mxu0 %v7100_v47  ;;  %4605 = vmatpush1.bf16.msra.mxu1 %v7101_v51  ;;  %v7111_v47 = vld [vmem:[#allocation55_spill] sm:$0xff] }
 0x32c   :  { %4575 = vmatprep.subr.bf16.mxu0 %v7102_v8  ;;  %4607 = vmatprep.subr.bf16.mxu1 %v7103_v48 }
 0x32f   :  { %4577 = vmatpush1.bf16.msra.mxu0 %v7104_v17  ;;  %4609 = vmatpush1.bf16.msra.mxu1 %v7105_v53 }
 0x330   :  { %4579 = vmatprep.subr.bf16.mxu0 %v7106_v57  ;;  %4611 = vmatprep.subr.bf16.mxu1 %v7107_v11 }
 0x333   :  { %4581 = vmatpush1.bf16.msra.mxu0 %v7108_v7  ;;  %4613 = vmatpush1.bf16.msra.mxu1 %v7109_v55 }
 0x334   :  { %4615 = vmatprep.subr.bf16.mxu0 %v7110_v50  ;;  %4647 = vmatprep.subr.bf16.mxu1 %v7111_v47 }
 0x3c9   :  { %v1675_v51 = vpop.f32.mrb[4].mxu0  ;;  %v1746_v8 = vpop.f32.mrb[4].mxu1 }
 0x3ca   :  { %v5266_v48 = vadd.f32 %v1675_v51, %v7112_v10  ;;  %v1677_v60 = vpop.f32.mrb[5].mxu0  ;;  %v1748_v17 = vpop.f32.mrb[5].mxu1  ;;  %v5282_v11 = vadd.f32 %v1746_v8, %v6297_v6 }
 0x3cb   :  { %v5267_v53 = vadd.f32 %v1677_v60, %v7083_v1  ;;  %v5283_v55 = vadd.f32 %v1748_v17, %v6301_v40 }
 0x3cc   :  { %v1755_v27 = vmul.f32 0.5, %v5266_v48 }
 0x3cd   :  { %v1759_v57 = vmul.f32 0.5, %v5267_v53  ;;  %v1764_v50 = vmul.f32 0.5, %v5283_v55 }
 0x3ce   :  { %5447 = vtanh.f32 %v1755_v27 }
 0x3cf   :  { %5449 = vtanh.f32 %v1759_v57 }
 0x3d0   :  { %5451 = vtanh.f32 %v5282_v11 }
 0x3d1   :  { %5453 = vtanh.f32 %v1764_v50 }
 0x3d8   :  { %v5448_v7 = vpop.eup %5447 }
 0x3d9   :  { %v5450_v47 = vpop.eup %5449  ;;  %v1757_v4 = vmul.f32 0.5, %v5448_v7 }
 0x3da   :  { %v1761_v44 = vmul.f32 0.5, %v5450_v47  ;;  %v5452_v10 = vpop.eup %5451 }
 0x3db   :  { %v1758_v51 = vadd.f32 0.5, %v1757_v4  ;;  %v5454_v27 = vpop.eup %5453 }
 0x3dc   :  { %v1762_v41 = vadd.f32 0.5, %v1761_v44  ;;  %v1766_v8 = vmul.f32 0.5, %v5454_v27 }
 0x3dd   :  { %v1769_v38 = vmul.f32 %v5452_v10, %v1758_v51 }
 0x3de   :  { %v1768_v60 = vmul.f32 %v1762_v41, %v6398_v49  ;;  %v1767_v55 = vadd.f32 0.5, %v1766_v8 }
 0x3e0   :  { %v6482_v48 = vadd.f32 %v1769_v38, %v1768_v60 }
 0x3e2   :  { %5455 = vtanh.f32 %v6482_v48 }
 0x3e9   :  { %v1839_v53 = vpop.f32.mrb[26].mxu0  ;;  %v1910_v17 = vpop.f32.mrb[26].mxu1 }
 0x3ea   :  { %v5304_v57 = vadd.f32 %v1839_v53, %v6310_v36  ;;  %v1841_v11 = vpop.f32.mrb[27].mxu0  ;;  %v1912_v7 = vpop.f32.mrb[27].mxu1  ;;  %v5320_v38 = vadd.f32 %v1910_v17, %v6315_v22 }
 0x3eb   :  { %v5305_v4 = vadd.f32 %v1841_v11, %v6312_v16  ;;  %v5321_v41 = vadd.f32 %v1912_v7, %v6319_v46 }
 0x3ec   :  { %v5456_v50 = vpop.eup %5455  ;;  %v1919_v44 = vmul.f32 0.5, %v5304_v57 }
 0x3ed   :  { %v1772_v10 = vmul.f32 %v5456_v50, %v1767_v55  ;;  %v1923_v47 = vmul.f32 0.5, %v5305_v4  ;;  %v1928_v49 = vmul.f32 0.5, %v5321_v41  ;;  %v7115_v41 = vld [vmem:[#allocation30_spill] sm:$0xff] }
 0x3ee   :  { %5457 = vtanh.f32 %v1919_v44 }
 0x3ef   :  { %5459 = vtanh.f32 %v1923_v47  ;;  %2002 = vmatmul.mubr.f32.vlgmr.msra.gmra.mrb[6].mxu0 %v1772_v10  ;;  %2073 = vmatmul.mubr.f32.vlgmr.msra.gmra.mrb[6].mxu1 %v1772_v10  ;;  %v7113_v47 = vld [vmem:[#allocation28_spill] sm:$0xff] }
 0x3f0   :  { %4617 = vmatpush1.bf16.msra.mxu0 %v6152_v30  ;;  %4649 = vmatpush1.bf16.msra.mxu1 %v6156_v33  ;;  %5461 = vtanh.f32 %v5320_v38  ;;  %v7114_v38 = vld [vmem:[#allocation29_spill] sm:$0xff] }
 0x3f1   :  { %4619 = vmatprep.subr.bf16.mxu0 %v6158_v35  ;;  %4651 = vmatprep.subr.bf16.mxu1 %v6162_v43  ;;  %5463 = vtanh.f32 %v1928_v49  ;;  %v7116_v49 = vld [vmem:[#allocation31_spill] sm:$0xff] }
 0x3f2   :  { %2165 = vmatprep.mubr.f32.mxu0 %v7054_v20  ;;  %2236 = vmatprep.mubr.f32.mxu1 %v7054_v20 }
 0x3f4   :  { %4621 = vmatpush1.bf16.msra.mxu0 %v6168_v56  ;;  %4653 = vmatpush1.bf16.msra.mxu1 %v6172_v58 }
 0x3f5   :  { %4623 = vmatprep.subr.bf16.mxu0 %v6174_v61  ;;  %4655 = vmatprep.subr.bf16.mxu1 %v6177_v5 }
 0x3f8   :  { %v5458_v51 = vpop.eup %5457  ;;  %4625 = vmatpush1.bf16.msra.mxu0 %v6182_v19  ;;  %4657 = vmatpush1.bf16.msra.mxu1 %v7058_v45 }
 0x3f9   :  { %v5460_v60 = vpop.eup %5459  ;;  %v1921_v27 = vmul.f32 0.5, %v5458_v51  ;;  %4627 = vmatprep.subr.bf16.mxu0 %v7085_v14  ;;  %4659 = vmatprep.subr.bf16.mxu1 %v7086_v59  ;;  %v7117_v51 = vld [vmem:[#allocation32_spill] sm:$0xff] }
 0x3fa   :  { %v1925_v8 = vmul.f32 0.5, %v5460_v60  ;;  %v5462_v17 = vpop.eup %5461  ;;  %v7118_v60 = vld [vmem:[#allocation33_spill] sm:$0xff] }
 0x3fb   :  { %v1922_v53 = vadd.f32 0.5, %v1921_v27  ;;  %v5464_v4 = vpop.eup %5463  ;;  %v7119_v27 = vld [vmem:[#allocation34_spill] sm:$0xff] }
 0x3fc   :  { %v1926_v57 = vadd.f32 0.5, %v1925_v8  ;;  %4629 = vmatpush1.bf16.msra.mxu0 %v7061_v52  ;;  %4661 = vmatpush1.bf16.msra.mxu1 %v7062_v24  ;;  %v7120_v8 = vld [vmem:[#allocation35_spill] sm:$0xff] }
 0x3fd   :  { %v1933_v11 = vmul.f32 %v5462_v17, %v1922_v53  ;;  %4631 = vmatprep.subr.bf16.mxu0 %v7063_v2  ;;  %4663 = vmatprep.subr.bf16.mxu1 %v7064_v15  ;;  %v7121_v53 = vld [vmem:[#allocation36_spill] sm:$0xff]  ;;  %v7122_v17 = vld [vmem:[#allocation37_spill] sm:$0xff] }
 0x3fe   :  { %v1932_v7 = vmul.f32 %v1926_v57, %v6424_v54  ;;  %v1930_v54 = vmul.f32 0.5, %v5464_v4  ;;  %v7123_v57 = vld [vmem:[#allocation38_spill] sm:$0xff]  ;;  %v7126_v4 = vld [vmem:[#allocation41_spill] sm:$0xff] }
 0x400   :  { %v6508_v55 = vadd.f32 %v1933_v11, %v1932_v7  ;;  %4633 = vmatpush1.bf16.msra.mxu0 %v7065_v32  ;;  %4665 = vmatpush1.bf16.msra.mxu1 %v7066_v26  ;;  %v1931_v50 = vadd.f32 0.5, %v1930_v54  ;;  %v7124_v11 = vld [vmem:[#allocation39_spill] sm:$0xff]  ;;  %v7125_v7 = vld [vmem:[#allocation40_spill] sm:$0xff]  ;;  %v7127_v54 = vld [vmem:[#allocation42_spill] sm:$0xff] }
 0x401   :  { %4635 = vmatprep.subr.bf16.mxu0 %v6212_v42  ;;  %4667 = vmatprep.subr.bf16.mxu1 %v7067_v63 }
 0x402   :  { %5465 = vtanh.f32 %v6508_v55 }
 0x404   :  { %4637 = vmatpush1.bf16.msra.mxu0 %v6218_v62  ;;  %4669 = vmatpush1.bf16.msra.mxu1 %v6222_v0 }
 0x405   :  { %4639 = vmatprep.subr.bf16.mxu0 %v6224_v9  ;;  %4671 = vmatprep.subr.bf16.mxu1 %v6227_v29 }
 0x408   :  { %4641 = vmatpush1.bf16.msra.mxu0 %v6230_v37  ;;  %4673 = vmatpush1.bf16.msra.mxu1 %v6234_v23 }
 0x409   :  { %4643 = vmatprep.subr.bf16.mxu0 %v6236_v39  ;;  %4675 = vmatprep.subr.bf16.mxu1 %v6239_v3 }
 0x40c   :  { %v5466_v44 = vpop.eup %5465  ;;  %4645 = vmatpush1.bf16.msra.mxu0 %v6242_v13  ;;  %4677 = vmatpush1.bf16.msra.mxu1 %v6246_v12 }
 0x40d   :  { %v1936_v10 = vmul.f32 %v5466_v44, %v1931_v50  ;;  %4679 = vmatprep.subr.bf16.mxu0 %v6037_v18  ;;  %4711 = vmatprep.subr.bf16.mxu1 %v6039_v21  ;;  %v7128_v50 = vld [vmem:[#allocation43_spill] sm:$0xff]  ;;  %v7129_v44 = vld [vmem:[#allocation44_spill] sm:$0xff] }
 0x40f   :  { %2166 = vmatmul.mubr.f32.vlgmr.msra.gmra.mrb[24].mxu0 %v1936_v10  ;;  %2237 = vmatmul.mubr.f32.vlgmr.msra.gmra.mrb[24].mxu1 %v1936_v10  ;;  %v7130_v10 = vld [vmem:[#allocation45_spill] sm:$0xff] }
 0x410   :  { %4681 = vmatpush1.bf16.msra.mxu0 %v6041_v25  ;;  %4713 = vmatpush1.bf16.msra.mxu1 %v6044_v28 }
 0x411   :  { %4683 = vmatprep.subr.bf16.mxu0 %v6048_v31  ;;  %4715 = vmatprep.subr.bf16.mxu1 %v6051_v34 }
 0x412   :  { %2329 = vmatprep.mubr.f32.mxu0 %v7054_v20  ;;  %2400 = vmatprep.mubr.f32.mxu1 %v7054_v20 }
 0x414   :  { %4685 = vmatpush1.bf16.msra.mxu0 %v7113_v47  ;;  %4717 = vmatpush1.bf16.msra.mxu1 %v7114_v38 }
 0x415   :  { %4687 = vmatprep.subr.bf16.mxu0 %v7115_v41  ;;  %4719 = vmatprep.subr.bf16.mxu1 %v7116_v49 }
 0x418   :  { %4689 = vmatpush1.bf16.msra.mxu0 %v7117_v51  ;;  %4721 = vmatpush1.bf16.msra.mxu1 %v7118_v60 }
 0x419   :  { %4691 = vmatprep.subr.bf16.mxu0 %v7119_v27  ;;  %4723 = vmatprep.subr.bf16.mxu1 %v7120_v8  ;;  %v7131_v8 = vld [vmem:[#allocation46_spill] sm:$0xff] }
 0x41a   :  { %v7141_v27 = vld [vmem:[#allocation66_spill] sm:$0xff] }
 0x41c   :  { %4693 = vmatpush1.bf16.msra.mxu0 %v7121_v53  ;;  %4725 = vmatpush1.bf16.msra.mxu1 %v7122_v17  ;;  %v7132_v53 = vld [vmem:[#allocation47_spill] sm:$0xff]  ;;  %v7133_v17 = vld [vmem:[#allocation48_spill] sm:$0xff] }
 0x41d   :  { %4695 = vmatprep.subr.bf16.mxu0 %v7123_v57  ;;  %4727 = vmatprep.subr.bf16.mxu1 %v7124_v11  ;;  %v7134_v57 = vld [vmem:[#allocation49_spill] sm:$0xff]  ;;  %v7135_v11 = vld [vmem:[#allocation50_spill] sm:$0xff] }
 0x420   :  { %4697 = vmatpush1.bf16.msra.mxu0 %v7125_v7  ;;  %4729 = vmatpush1.bf16.msra.mxu1 %v7126_v4  ;;  %v7136_v7 = vld [vmem:[#allocation51_spill] sm:$0xff]  ;;  %v7137_v4 = vld [vmem:[#allocation52_spill] sm:$0xff] }
 0x421   :  { %4699 = vmatprep.subr.bf16.mxu0 %v7127_v54  ;;  %4731 = vmatprep.subr.bf16.mxu1 %v7128_v50  ;;  %v7138_v54 = vld [vmem:[#allocation53_spill] sm:$0xff]  ;;  %v7139_v50 = vld [vmem:[#allocation54_spill] sm:$0xff] }
 0x424   :  { %4701 = vmatpush1.bf16.msra.mxu0 %v7129_v44  ;;  %4733 = vmatpush1.bf16.msra.mxu1 %v7130_v10  ;;  %v7140_v44 = vld [vmem:[#allocation55_spill] sm:$0xff] }
 0x425   :  { %4703 = vmatprep.subr.bf16.mxu0 %v7131_v8  ;;  %4735 = vmatprep.subr.bf16.mxu1 %v7132_v53 }
 0x428   :  { %4705 = vmatpush1.bf16.msra.mxu0 %v7133_v17  ;;  %4737 = vmatpush1.bf16.msra.mxu1 %v7134_v57 }
 0x429   :  { %4707 = vmatprep.subr.bf16.mxu0 %v7135_v11  ;;  %4739 = vmatprep.subr.bf16.mxu1 %v7136_v7 }
 0x42c   :  { %4709 = vmatpush1.bf16.msra.mxu0 %v7137_v4  ;;  %4741 = vmatpush1.bf16.msra.mxu1 %v7138_v54 }
 0x42d   :  { %4743 = vmatprep.subr.bf16.mxu0 %v7139_v50  ;;  %4775 = vmatprep.subr.bf16.mxu1 %v7140_v44 }
 0x4c2   :  { %v2003_v10 = vpop.f32.mrb[6].mxu0  ;;  %v2074_v8 = vpop.f32.mrb[6].mxu1 }
 0x4c3   :  { %v5268_v53 = vadd.f32 %v2003_v10, %v7141_v27  ;;  %v2005_v60 = vpop.f32.mrb[7].mxu0  ;;  %v2076_v17 = vpop.f32.mrb[7].mxu1  ;;  %v5284_v7 = vadd.f32 %v2074_v8, %v6297_v6 }
 0x4c4   :  { %v5269_v57 = vadd.f32 %v2005_v60, %v7083_v1  ;;  %v5285_v54 = vadd.f32 %v2076_v17, %v6301_v40 }
 0x4c5   :  { %v2083_v51 = vmul.f32 0.5, %v5268_v53 }
 0x4c6   :  { %v2087_v11 = vmul.f32 0.5, %v5269_v57  ;;  %v2092_v50 = vmul.f32 0.5, %v5285_v54 }
 0x4c7   :  { %5467 = vtanh.f32 %v2083_v51 }
 0x4c8   :  { %5469 = vtanh.f32 %v2087_v11 }
 0x4c9   :  { %5471 = vtanh.f32 %v5284_v7 }
 0x4ca   :  { %5473 = vtanh.f32 %v2092_v50 }
 0x4d1   :  { %v5468_v4 = vpop.eup %5467 }
 0x4d2   :  { %v5470_v44 = vpop.eup %5469  ;;  %v2085_v49 = vmul.f32 0.5, %v5468_v4 }
 0x4d3   :  { %v2089_v41 = vmul.f32 0.5, %v5470_v44  ;;  %v5472_v27 = vpop.eup %5471 }
 0x4d4   :  { %v2086_v10 = vadd.f32 0.5, %v2085_v49  ;;  %v5474_v51 = vpop.eup %5473 }
 0x4d5   :  { %v2090_v38 = vadd.f32 0.5, %v2089_v41  ;;  %v2094_v8 = vmul.f32 0.5, %v5474_v51 }
 0x4d6   :  { %v2097_v47 = vmul.f32 %v5472_v27, %v2086_v10 }
 0x4d7   :  { %v2096_v60 = vmul.f32 %v2090_v38, %v6482_v48  ;;  %v2095_v54 = vadd.f32 0.5, %v2094_v8 }
 0x4d9   :  { %v6566_v53 = vadd.f32 %v2097_v47, %v2096_v60 }
 0x4db   :  { %5475 = vtanh.f32 %v6566_v53 }
 0x4e2   :  { %v2167_v57 = vpop.f32.mrb[24].mxu0  ;;  %v2238_v17 = vpop.f32.mrb[24].mxu1 }
 0x4e3   :  { %v5302_v11 = vadd.f32 %v2167_v57, %v6310_v36  ;;  %v2169_v7 = vpop.f32.mrb[25].mxu0  ;;  %v2240_v4 = vpop.f32.mrb[25].mxu1  ;;  %v5318_v48 = vadd.f32 %v2238_v17, %v6315_v22 }
 0x4e4   :  { %v5303_v49 = vadd.f32 %v2169_v7, %v6312_v16  ;;  %v5319_v47 = vadd.f32 %v2240_v4, %v6319_v46 }
 0x4e5   :  { %v5476_v50 = vpop.eup %5475  ;;  %v2247_v41 = vmul.f32 0.5, %v5302_v11 }
 0x4e6   :  { %v2100_v27 = vmul.f32 %v5476_v50, %v2095_v54  ;;  %v2251_v44 = vmul.f32 0.5, %v5303_v49  ;;  %v2256_v38 = vmul.f32 0.5, %v5319_v47  ;;  %v7144_v47 = vld [vmem:[#allocation30_spill] sm:$0xff] }
 0x4e7   :  { %5477 = vtanh.f32 %v2247_v41 }
 0x4e8   :  { %5479 = vtanh.f32 %v2251_v44  ;;  %2330 = vmatmul.mubr.f32.vlgmr.msra.gmra.mrb[8].mxu0 %v2100_v27  ;;  %2401 = vmatmul.mubr.f32.vlgmr.msra.gmra.mrb[8].mxu1 %v2100_v27  ;;  %v7142_v44 = vld [vmem:[#allocation28_spill] sm:$0xff] }
 0x4e9   :  { %4745 = vmatpush1.bf16.msra.mxu0 %v6152_v30  ;;  %4777 = vmatpush1.bf16.msra.mxu1 %v6156_v33  ;;  %5481 = vtanh.f32 %v5318_v48  ;;  %v7143_v48 = vld [vmem:[#allocation29_spill] sm:$0xff] }
 0x4ea   :  { %4747 = vmatprep.subr.bf16.mxu0 %v6158_v35  ;;  %4779 = vmatprep.subr.bf16.mxu1 %v6162_v43  ;;  %5483 = vtanh.f32 %v2256_v38  ;;  %v7145_v38 = vld [vmem:[#allocation31_spill] sm:$0xff] }
 0x4eb   :  { %2493 = vmatprep.mubr.f32.mxu0 %v7054_v20  ;;  %2564 = vmatprep.mubr.f32.mxu1 %v7054_v20 }
 0x4ed   :  { %4749 = vmatpush1.bf16.msra.mxu0 %v6168_v56  ;;  %4781 = vmatpush1.bf16.msra.mxu1 %v6172_v58 }
 0x4ee   :  { %4751 = vmatprep.subr.bf16.mxu0 %v6174_v61  ;;  %4783 = vmatprep.subr.bf16.mxu1 %v6177_v5 }
 0x4f1   :  { %v5478_v10 = vpop.eup %5477  ;;  %4753 = vmatpush1.bf16.msra.mxu0 %v6182_v19  ;;  %4785 = vmatpush1.bf16.msra.mxu1 %v7058_v45 }
 0x4f2   :  { %v5480_v60 = vpop.eup %5479  ;;  %v2249_v51 = vmul.f32 0.5, %v5478_v10  ;;  %4755 = vmatprep.subr.bf16.mxu0 %v7085_v14  ;;  %4787 = vmatprep.subr.bf16.mxu1 %v7086_v59  ;;  %v7146_v10 = vld [vmem:[#allocation32_spill] sm:$0xff] }
 0x4f3   :  { %v2253_v8 = vmul.f32 0.5, %v5480_v60  ;;  %v5482_v17 = vpop.eup %5481  ;;  %v7147_v60 = vld [vmem:[#allocation33_spill] sm:$0xff] }
 0x4f4   :  { %v2250_v57 = vadd.f32 0.5, %v2249_v51  ;;  %v5484_v49 = vpop.eup %5483  ;;  %v7148_v51 = vld [vmem:[#allocation34_spill] sm:$0xff] }
 0x4f5   :  { %v2254_v11 = vadd.f32 0.5, %v2253_v8  ;;  %4757 = vmatpush1.bf16.msra.mxu0 %v7061_v52  ;;  %4789 = vmatpush1.bf16.msra.mxu1 %v7062_v24  ;;  %v7149_v8 = vld [vmem:[#allocation35_spill] sm:$0xff] }
 0x4f6   :  { %v2261_v7 = vmul.f32 %v5482_v17, %v2250_v57  ;;  %4759 = vmatprep.subr.bf16.mxu0 %v7063_v2  ;;  %4791 = vmatprep.subr.bf16.mxu1 %v7064_v15  ;;  %v7150_v57 = vld [vmem:[#allocation36_spill] sm:$0xff]  ;;  %v7151_v17 = vld [vmem:[#allocation37_spill] sm:$0xff] }
 0x4f7   :  { %v2260_v4 = vmul.f32 %v2254_v11, %v6508_v55  ;;  %v2258_v55 = vmul.f32 0.5, %v5484_v49  ;;  %v7152_v11 = vld [vmem:[#allocation38_spill] sm:$0xff]  ;;  %v7155_v49 = vld [vmem:[#allocation41_spill] sm:$0xff] }
 0x4f9   :  { %v6592_v54 = vadd.f32 %v2261_v7, %v2260_v4  ;;  %4761 = vmatpush1.bf16.msra.mxu0 %v7065_v32  ;;  %4793 = vmatpush1.bf16.msra.mxu1 %v7066_v26  ;;  %v2259_v50 = vadd.f32 0.5, %v2258_v55  ;;  %v7153_v7 = vld [vmem:[#allocation39_spill] sm:$0xff]  ;;  %v7154_v4 = vld [vmem:[#allocation40_spill] sm:$0xff]  ;;  %v7156_v55 = vld [vmem:[#allocation42_spill] sm:$0xff] }
 0x4fa   :  { %4763 = vmatprep.subr.bf16.mxu0 %v6212_v42  ;;  %4795 = vmatprep.subr.bf16.mxu1 %v7067_v63 }
 0x4fb   :  { %5485 = vtanh.f32 %v6592_v54 }
 0x4fd   :  { %4765 = vmatpush1.bf16.msra.mxu0 %v6218_v62  ;;  %4797 = vmatpush1.bf16.msra.mxu1 %v6222_v0 }
 0x4fe   :  { %4767 = vmatprep.subr.bf16.mxu0 %v6224_v9  ;;  %4799 = vmatprep.subr.bf16.mxu1 %v6227_v29 }
 0x501   :  { %4769 = vmatpush1.bf16.msra.mxu0 %v6230_v37  ;;  %4801 = vmatpush1.bf16.msra.mxu1 %v6234_v23 }
 0x502   :  { %4771 = vmatprep.subr.bf16.mxu0 %v6236_v39  ;;  %4803 = vmatprep.subr.bf16.mxu1 %v6239_v3 }
 0x505   :  { %v5486_v41 = vpop.eup %5485  ;;  %4773 = vmatpush1.bf16.msra.mxu0 %v6242_v13  ;;  %4805 = vmatpush1.bf16.msra.mxu1 %v6246_v12 }
 0x506   :  { %v2264_v27 = vmul.f32 %v5486_v41, %v2259_v50  ;;  %4807 = vmatprep.subr.bf16.mxu0 %v6037_v18  ;;  %4839 = vmatprep.subr.bf16.mxu1 %v6039_v21  ;;  %v7157_v50 = vld [vmem:[#allocation43_spill] sm:$0xff]  ;;  %v7158_v41 = vld [vmem:[#allocation44_spill] sm:$0xff] }
 0x508   :  { %2494 = vmatmul.mubr.f32.vlgmr.msra.gmra.mrb[22].mxu0 %v2264_v27  ;;  %2565 = vmatmul.mubr.f32.vlgmr.msra.gmra.mrb[22].mxu1 %v2264_v27  ;;  %v7159_v27 = vld [vmem:[#allocation45_spill] sm:$0xff] }
 0x509   :  { %4809 = vmatpush1.bf16.msra.mxu0 %v6041_v25  ;;  %4841 = vmatpush1.bf16.msra.mxu1 %v6044_v28 }
 0x50a   :  { %4811 = vmatprep.subr.bf16.mxu0 %v6048_v31  ;;  %4843 = vmatprep.subr.bf16.mxu1 %v6051_v34 }
 0x50b   :  { %2657 = vmatprep.mubr.f32.mxu0 %v7054_v20  ;;  %2728 = vmatprep.mubr.f32.mxu1 %v7054_v20 }
 0x50d   :  { %4813 = vmatpush1.bf16.msra.mxu0 %v7142_v44  ;;  %4845 = vmatpush1.bf16.msra.mxu1 %v7143_v48 }
 0x50e   :  { %4815 = vmatprep.subr.bf16.mxu0 %v7144_v47  ;;  %4847 = vmatprep.subr.bf16.mxu1 %v7145_v38 }
 0x511   :  { %4817 = vmatpush1.bf16.msra.mxu0 %v7146_v10  ;;  %4849 = vmatpush1.bf16.msra.mxu1 %v7147_v60 }
 0x512   :  { %4819 = vmatprep.subr.bf16.mxu0 %v7148_v51  ;;  %4851 = vmatprep.subr.bf16.mxu1 %v7149_v8  ;;  %v7160_v8 = vld [vmem:[#allocation46_spill] sm:$0xff] }
 0x513   :  { %v7170_v51 = vld [vmem:[#allocation66_spill] sm:$0xff] }
 0x515   :  { %4821 = vmatpush1.bf16.msra.mxu0 %v7150_v57  ;;  %4853 = vmatpush1.bf16.msra.mxu1 %v7151_v17  ;;  %v7161_v57 = vld [vmem:[#allocation47_spill] sm:$0xff]  ;;  %v7162_v17 = vld [vmem:[#allocation48_spill] sm:$0xff] }
 0x516   :  { %4823 = vmatprep.subr.bf16.mxu0 %v7152_v11  ;;  %4855 = vmatprep.subr.bf16.mxu1 %v7153_v7  ;;  %v7163_v11 = vld [vmem:[#allocation49_spill] sm:$0xff]  ;;  %v7164_v7 = vld [vmem:[#allocation50_spill] sm:$0xff] }
 0x519   :  { %4825 = vmatpush1.bf16.msra.mxu0 %v7154_v4  ;;  %4857 = vmatpush1.bf16.msra.mxu1 %v7155_v49  ;;  %v7165_v4 = vld [vmem:[#allocation51_spill] sm:$0xff]  ;;  %v7166_v49 = vld [vmem:[#allocation52_spill] sm:$0xff] }
 0x51a   :  { %4827 = vmatprep.subr.bf16.mxu0 %v7156_v55  ;;  %4859 = vmatprep.subr.bf16.mxu1 %v7157_v50  ;;  %v7167_v55 = vld [vmem:[#allocation53_spill] sm:$0xff]  ;;  %v7168_v50 = vld [vmem:[#allocation54_spill] sm:$0xff] }
 0x51d   :  { %4829 = vmatpush1.bf16.msra.mxu0 %v7158_v41  ;;  %4861 = vmatpush1.bf16.msra.mxu1 %v7159_v27  ;;  %v7169_v41 = vld [vmem:[#allocation55_spill] sm:$0xff] }
 0x51e   :  { %4831 = vmatprep.subr.bf16.mxu0 %v7160_v8  ;;  %4863 = vmatprep.subr.bf16.mxu1 %v7161_v57 }
 0x521   :  { %4833 = vmatpush1.bf16.msra.mxu0 %v7162_v17  ;;  %4865 = vmatpush1.bf16.msra.mxu1 %v7163_v11 }
 0x522   :  { %4835 = vmatprep.subr.bf16.mxu0 %v7164_v7  ;;  %4867 = vmatprep.subr.bf16.mxu1 %v7165_v4 }
 0x525   :  { %4837 = vmatpush1.bf16.msra.mxu0 %v7166_v49  ;;  %4869 = vmatpush1.bf16.msra.mxu1 %v7167_v55 }
 0x526   :  { %4871 = vmatprep.subr.bf16.mxu0 %v7168_v50  ;;  %4903 = vmatprep.subr.bf16.mxu1 %v7169_v41 }
 0x5bb   :  { %v2331_v27 = vpop.f32.mrb[8].mxu0  ;;  %v2402_v8 = vpop.f32.mrb[8].mxu1 }
 0x5bc   :  { %v5270_v57 = vadd.f32 %v2331_v27, %v7170_v51  ;;  %v2333_v60 = vpop.f32.mrb[9].mxu0  ;;  %v2404_v17 = vpop.f32.mrb[9].mxu1  ;;  %v5286_v4 = vadd.f32 %v2402_v8, %v6297_v6 }
 0x5bd   :  { %v5271_v11 = vadd.f32 %v2333_v60, %v7083_v1  ;;  %v5287_v55 = vadd.f32 %v2404_v17, %v6301_v40 }
 0x5be   :  { %v2411_v10 = vmul.f32 0.5, %v5270_v57 }
 0x5bf   :  { %v2415_v7 = vmul.f32 0.5, %v5271_v11  ;;  %v2420_v50 = vmul.f32 0.5, %v5287_v55 }
 0x5c0   :  { %5487 = vtanh.f32 %v2411_v10 }
 0x5c1   :  { %5489 = vtanh.f32 %v2415_v7 }
 0x5c2   :  { %5491 = vtanh.f32 %v5286_v4 }
 0x5c3   :  { %5493 = vtanh.f32 %v2420_v50 }
 0x5ca   :  { %v5488_v49 = vpop.eup %5487 }
 0x5cb   :  { %v5490_v41 = vpop.eup %5489  ;;  %v2413_v38 = vmul.f32 0.5, %v5488_v49 }
 0x5cc   :  { %v2417_v47 = vmul.f32 0.5, %v5490_v41  ;;  %v5492_v51 = vpop.eup %5491 }
 0x5cd   :  { %v2414_v27 = vadd.f32 0.5, %v2413_v38  ;;  %v5494_v10 = vpop.eup %5493 }
 0x5ce   :  { %v2418_v48 = vadd.f32 0.5, %v2417_v47  ;;  %v2422_v8 = vmul.f32 0.5, %v5494_v10 }
 0x5cf   :  { %v2425_v44 = vmul.f32 %v5492_v51, %v2414_v27 }
 0x5d0   :  { %v2424_v60 = vmul.f32 %v2418_v48, %v6566_v53  ;;  %v2423_v55 = vadd.f32 0.5, %v2422_v8 }
 0x5d2   :  { %v6650_v57 = vadd.f32 %v2425_v44, %v2424_v60 }
 0x5d4   :  { %5495 = vtanh.f32 %v6650_v57 }
 0x5db   :  { %v2495_v11 = vpop.f32.mrb[22].mxu0  ;;  %v2566_v17 = vpop.f32.mrb[22].mxu1 }
 0x5dc   :  { %v5300_v7 = vadd.f32 %v2495_v11, %v6310_v36  ;;  %v2497_v4 = vpop.f32.mrb[23].mxu0  ;;  %v2568_v49 = vpop.f32.mrb[23].mxu1  ;;  %v5316_v53 = vadd.f32 %v2566_v17, %v6315_v22 }
 0x5dd   :  { %v5301_v38 = vadd.f32 %v2497_v4, %v6312_v16  ;;  %v5317_v44 = vadd.f32 %v2568_v49, %v6319_v46 }
 0x5de   :  { %v5496_v50 = vpop.eup %5495  ;;  %v2575_v47 = vmul.f32 0.5, %v5300_v7 }
 0x5df   :  { %v2428_v51 = vmul.f32 %v5496_v50, %v2423_v55  ;;  %v2579_v41 = vmul.f32 0.5, %v5301_v38  ;;  %v2584_v48 = vmul.f32 0.5, %v5317_v44  ;;  %v7173_v44 = vld [vmem:[#allocation30_spill] sm:$0xff] }
 0x5e0   :  { %5497 = vtanh.f32 %v2575_v47 }
 0x5e1   :  { %5499 = vtanh.f32 %v2579_v41  ;;  %2658 = vmatmul.mubr.f32.vlgmr.msra.gmra.mrb[10].mxu0 %v2428_v51  ;;  %2729 = vmatmul.mubr.f32.vlgmr.msra.gmra.mrb[10].mxu1 %v2428_v51  ;;  %v7171_v41 = vld [vmem:[#allocation28_spill] sm:$0xff] }
 0x5e2   :  { %4873 = vmatpush1.bf16.msra.mxu0 %v6152_v30  ;;  %4905 = vmatpush1.bf16.msra.mxu1 %v6156_v33  ;;  %5501 = vtanh.f32 %v5316_v53  ;;  %v7172_v53 = vld [vmem:[#allocation29_spill] sm:$0xff] }
 0x5e3   :  { %4875 = vmatprep.subr.bf16.mxu0 %v6158_v35  ;;  %4907 = vmatprep.subr.bf16.mxu1 %v6162_v43  ;;  %5503 = vtanh.f32 %v2584_v48  ;;  %v7174_v48 = vld [vmem:[#allocation31_spill] sm:$0xff] }
 0x5e4   :  { %2821 = vmatprep.mubr.f32.mxu0 %v7054_v20  ;;  %2892 = vmatprep.mubr.f32.mxu1 %v7054_v20 }
 0x5e6   :  { %4877 = vmatpush1.bf16.msra.mxu0 %v6168_v56  ;;  %4909 = vmatpush1.bf16.msra.mxu1 %v6172_v58 }
 0x5e7   :  { %4879 = vmatprep.subr.bf16.mxu0 %v6174_v61  ;;  %4911 = vmatprep.subr.bf16.mxu1 %v6177_v5 }
 0x5ea   :  { %v5498_v27 = vpop.eup %5497  ;;  %4881 = vmatpush1.bf16.msra.mxu0 %v6182_v19  ;;  %4913 = vmatpush1.bf16.msra.mxu1 %v7058_v45 }
 0x5eb   :  { %v5500_v60 = vpop.eup %5499  ;;  %v2577_v10 = vmul.f32 0.5, %v5498_v27  ;;  %4883 = vmatprep.subr.bf16.mxu0 %v7085_v14  ;;  %4915 = vmatprep.subr.bf16.mxu1 %v7086_v59  ;;  %v7175_v27 = vld [vmem:[#allocation32_spill] sm:$0xff] }
 0x5ec   :  { %v2581_v8 = vmul.f32 0.5, %v5500_v60  ;;  %v5502_v17 = vpop.eup %5501  ;;  %v7176_v60 = vld [vmem:[#allocation33_spill] sm:$0xff] }
 0x5ed   :  { %v2578_v11 = vadd.f32 0.5, %v2577_v10  ;;  %v5504_v38 = vpop.eup %5503  ;;  %v7177_v10 = vld [vmem:[#allocation34_spill] sm:$0xff] }
 0x5ee   :  { %v2582_v7 = vadd.f32 0.5, %v2581_v8  ;;  %4885 = vmatpush1.bf16.msra.mxu0 %v7061_v52  ;;  %4917 = vmatpush1.bf16.msra.mxu1 %v7062_v24  ;;  %v7178_v8 = vld [vmem:[#allocation35_spill] sm:$0xff] }
 0x5ef   :  { %v2589_v4 = vmul.f32 %v5502_v17, %v2578_v11  ;;  %4887 = vmatprep.subr.bf16.mxu0 %v7063_v2  ;;  %4919 = vmatprep.subr.bf16.mxu1 %v7064_v15  ;;  %v7179_v11 = vld [vmem:[#allocation36_spill] sm:$0xff]  ;;  %v7180_v17 = vld [vmem:[#allocation37_spill] sm:$0xff] }
 0x5f0   :  { %v2588_v49 = vmul.f32 %v2582_v7, %v6592_v54  ;;  %v2586_v54 = vmul.f32 0.5, %v5504_v38  ;;  %v7181_v7 = vld [vmem:[#allocation38_spill] sm:$0xff]  ;;  %v7184_v38 = vld [vmem:[#allocation41_spill] sm:$0xff] }
 0x5f2   :  { %v6676_v55 = vadd.f32 %v2589_v4, %v2588_v49  ;;  %4889 = vmatpush1.bf16.msra.mxu0 %v7065_v32  ;;  %4921 = vmatpush1.bf16.msra.mxu1 %v7066_v26  ;;  %v2587_v50 = vadd.f32 0.5, %v2586_v54  ;;  %v7182_v4 = vld [vmem:[#allocation39_spill] sm:$0xff]  ;;  %v7183_v49 = vld [vmem:[#allocation40_spill] sm:$0xff]  ;;  %v7185_v54 = vld [vmem:[#allocation42_spill] sm:$0xff] }
 0x5f3   :  { %4891 = vmatprep.subr.bf16.mxu0 %v6212_v42  ;;  %4923 = vmatprep.subr.bf16.mxu1 %v7067_v63 }
 0x5f4   :  { %5505 = vtanh.f32 %v6676_v55 }
 0x5f6   :  { %4893 = vmatpush1.bf16.msra.mxu0 %v6218_v62  ;;  %4925 = vmatpush1.bf16.msra.mxu1 %v6222_v0 }
 0x5f7   :  { %4895 = vmatprep.subr.bf16.mxu0 %v6224_v9  ;;  %4927 = vmatprep.subr.bf16.mxu1 %v6227_v29 }
 0x5fa   :  { %4897 = vmatpush1.bf16.msra.mxu0 %v6230_v37  ;;  %4929 = vmatpush1.bf16.msra.mxu1 %v6234_v23 }
 0x5fb   :  { %4899 = vmatprep.subr.bf16.mxu0 %v6236_v39  ;;  %4931 = vmatprep.subr.bf16.mxu1 %v6239_v3 }
 0x5fe   :  { %v5506_v47 = vpop.eup %5505  ;;  %4901 = vmatpush1.bf16.msra.mxu0 %v6242_v13  ;;  %4933 = vmatpush1.bf16.msra.mxu1 %v6246_v12 }
 0x5ff   :  { %v2592_v51 = vmul.f32 %v5506_v47, %v2587_v50  ;;  %4935 = vmatprep.subr.bf16.mxu0 %v6037_v18  ;;  %4967 = vmatprep.subr.bf16.mxu1 %v6039_v21  ;;  %v7186_v50 = vld [vmem:[#allocation43_spill] sm:$0xff]  ;;  %v7187_v47 = vld [vmem:[#allocation44_spill] sm:$0xff] }
 0x601   :  { %2822 = vmatmul.mubr.f32.vlgmr.msra.gmra.mrb[20].mxu0 %v2592_v51  ;;  %2893 = vmatmul.mubr.f32.vlgmr.msra.gmra.mrb[20].mxu1 %v2592_v51  ;;  %v7188_v51 = vld [vmem:[#allocation45_spill] sm:$0xff] }
 0x602   :  { %4937 = vmatpush1.bf16.msra.mxu0 %v6041_v25  ;;  %4969 = vmatpush1.bf16.msra.mxu1 %v6044_v28 }
 0x603   :  { %4939 = vmatprep.subr.bf16.mxu0 %v6048_v31  ;;  %4971 = vmatprep.subr.bf16.mxu1 %v6051_v34 }
 0x604   :  { %2985 = vmatprep.mubr.f32.mxu0 %v7054_v20  ;;  %3056 = vmatprep.mubr.f32.mxu1 %v7054_v20 }
 0x606   :  { %4941 = vmatpush1.bf16.msra.mxu0 %v7171_v41  ;;  %4973 = vmatpush1.bf16.msra.mxu1 %v7172_v53 }
 0x607   :  { %4943 = vmatprep.subr.bf16.mxu0 %v7173_v44  ;;  %4975 = vmatprep.subr.bf16.mxu1 %v7174_v48 }
 0x60a   :  { %4945 = vmatpush1.bf16.msra.mxu0 %v7175_v27  ;;  %4977 = vmatpush1.bf16.msra.mxu1 %v7176_v60 }
 0x60b   :  { %4947 = vmatprep.subr.bf16.mxu0 %v7177_v10  ;;  %4979 = vmatprep.subr.bf16.mxu1 %v7178_v8  ;;  %v7189_v8 = vld [vmem:[#allocation46_spill] sm:$0xff] }
 0x60c   :  { %v7199_v10 = vld [vmem:[#allocation66_spill] sm:$0xff] }
 0x60e   :  { %4949 = vmatpush1.bf16.msra.mxu0 %v7179_v11  ;;  %4981 = vmatpush1.bf16.msra.mxu1 %v7180_v17  ;;  %v7190_v11 = vld [vmem:[#allocation47_spill] sm:$0xff]  ;;  %v7191_v17 = vld [vmem:[#allocation48_spill] sm:$0xff] }
 0x60f   :  { %4951 = vmatprep.subr.bf16.mxu0 %v7181_v7  ;;  %4983 = vmatprep.subr.bf16.mxu1 %v7182_v4  ;;  %v7192_v7 = vld [vmem:[#allocation49_spill] sm:$0xff]  ;;  %v7193_v4 = vld [vmem:[#allocation50_spill] sm:$0xff] }
 0x612   :  { %4953 = vmatpush1.bf16.msra.mxu0 %v7183_v49  ;;  %4985 = vmatpush1.bf16.msra.mxu1 %v7184_v38  ;;  %v7194_v49 = vld [vmem:[#allocation51_spill] sm:$0xff]  ;;  %v7195_v38 = vld [vmem:[#allocation52_spill] sm:$0xff] }
 0x613   :  { %4955 = vmatprep.subr.bf16.mxu0 %v7185_v54  ;;  %4987 = vmatprep.subr.bf16.mxu1 %v7186_v50  ;;  %v7196_v54 = vld [vmem:[#allocation53_spill] sm:$0xff]  ;;  %v7197_v50 = vld [vmem:[#allocation54_spill] sm:$0xff] }
 0x616   :  { %4957 = vmatpush1.bf16.msra.mxu0 %v7187_v47  ;;  %4989 = vmatpush1.bf16.msra.mxu1 %v7188_v51  ;;  %v7198_v47 = vld [vmem:[#allocation55_spill] sm:$0xff] }
 0x617   :  { %4959 = vmatprep.subr.bf16.mxu0 %v7189_v8  ;;  %4991 = vmatprep.subr.bf16.mxu1 %v7190_v11 }
 0x61a   :  { %4961 = vmatpush1.bf16.msra.mxu0 %v7191_v17  ;;  %4993 = vmatpush1.bf16.msra.mxu1 %v7192_v7 }
 0x61b   :  { %4963 = vmatprep.subr.bf16.mxu0 %v7193_v4  ;;  %4995 = vmatprep.subr.bf16.mxu1 %v7194_v49 }
 0x61e   :  { %4965 = vmatpush1.bf16.msra.mxu0 %v7195_v38  ;;  %4997 = vmatpush1.bf16.msra.mxu1 %v7196_v54 }
 0x61f   :  { %4999 = vmatprep.subr.bf16.mxu0 %v7197_v50  ;;  %5031 = vmatprep.subr.bf16.mxu1 %v7198_v47 }
 0x6b4   :  { %v2659_v51 = vpop.f32.mrb[10].mxu0  ;;  %v2730_v8 = vpop.f32.mrb[10].mxu1 }
 0x6b5   :  { %v5272_v11 = vadd.f32 %v2659_v51, %v7199_v10  ;;  %v2661_v60 = vpop.f32.mrb[11].mxu0  ;;  %v2732_v17 = vpop.f32.mrb[11].mxu1  ;;  %v5288_v49 = vadd.f32 %v2730_v8, %v6297_v6 }
 0x6b6   :  { %v5273_v7 = vadd.f32 %v2661_v60, %v7083_v1  ;;  %v5289_v54 = vadd.f32 %v2732_v17, %v6301_v40 }
 0x6b7   :  { %v2739_v27 = vmul.f32 0.5, %v5272_v11 }
 0x6b8   :  { %v2743_v4 = vmul.f32 0.5, %v5273_v7  ;;  %v2748_v50 = vmul.f32 0.5, %v5289_v54 }
 0x6b9   :  { %5507 = vtanh.f32 %v2739_v27 }
 0x6ba   :  { %5509 = vtanh.f32 %v2743_v4 }
 0x6bb   :  { %5511 = vtanh.f32 %v5288_v49 }
 0x6bc   :  { %5513 = vtanh.f32 %v2748_v50 }
 0x6c3   :  { %v5508_v38 = vpop.eup %5507 }
 0x6c4   :  { %v5510_v47 = vpop.eup %5509  ;;  %v2741_v48 = vmul.f32 0.5, %v5508_v38 }
 0x6c5   :  { %v2745_v44 = vmul.f32 0.5, %v5510_v47  ;;  %v5512_v10 = vpop.eup %5511 }
 0x6c6   :  { %v2742_v51 = vadd.f32 0.5, %v2741_v48  ;;  %v5514_v27 = vpop.eup %5513 }
 0x6c7   :  { %v2746_v53 = vadd.f32 0.5, %v2745_v44  ;;  %v2750_v8 = vmul.f32 0.5, %v5514_v27 }
 0x6c8   :  { %v2753_v41 = vmul.f32 %v5512_v10, %v2742_v51 }
 0x6c9   :  { %v2752_v60 = vmul.f32 %v2746_v53, %v6650_v57  ;;  %v2751_v54 = vadd.f32 0.5, %v2750_v8 }
 0x6cb   :  { %v6734_v11 = vadd.f32 %v2753_v41, %v2752_v60 }
 0x6cd   :  { %5515 = vtanh.f32 %v6734_v11 }
 0x6d4   :  { %v2823_v7 = vpop.f32.mrb[20].mxu0  ;;  %v2894_v17 = vpop.f32.mrb[20].mxu1 }
 0x6d5   :  { %v5298_v4 = vadd.f32 %v2823_v7, %v6310_v36  ;;  %v2825_v49 = vpop.f32.mrb[21].mxu0  ;;  %v2896_v38 = vpop.f32.mrb[21].mxu1  ;;  %v5314_v57 = vadd.f32 %v2894_v17, %v6315_v22 }
 0x6d6   :  { %v5299_v48 = vadd.f32 %v2825_v49, %v6312_v16  ;;  %v5315_v41 = vadd.f32 %v2896_v38, %v6319_v46 }
 0x6d7   :  { %v5516_v50 = vpop.eup %5515  ;;  %v2903_v44 = vmul.f32 0.5, %v5298_v4 }
 0x6d8   :  { %v2756_v10 = vmul.f32 %v5516_v50, %v2751_v54  ;;  %v2907_v47 = vmul.f32 0.5, %v5299_v48  ;;  %v2912_v53 = vmul.f32 0.5, %v5315_v41  ;;  %v7204_v41 = vld [vmem:[#allocation32_spill] sm:$0xff] }
 0x6d9   :  { %5517 = vtanh.f32 %v2903_v44 }
 0x6da   :  { %5519 = vtanh.f32 %v2907_v47  ;;  %2986 = vmatmul.mubr.f32.vlgmr.msra.gmra.mrb[12].mxu0 %v2756_v10  ;;  %3057 = vmatmul.mubr.f32.vlgmr.msra.gmra.mrb[12].mxu1 %v2756_v10  ;;  %v7200_v47 = vld [vmem:[#allocation28_spill] sm:$0xff] }
 0x6db   :  { %5001 = vmatpush1.bf16.msra.mxu0 %v6152_v30  ;;  %5033 = vmatpush1.bf16.msra.mxu1 %v6156_v33  ;;  %5521 = vtanh.f32 %v5314_v57  ;;  %v7201_v57 = vld [vmem:[#allocation29_spill] sm:$0xff] }
 0x6dc   :  { %5003 = vmatprep.subr.bf16.mxu0 %v6158_v35  ;;  %5035 = vmatprep.subr.bf16.mxu1 %v6162_v43  ;;  %5523 = vtanh.f32 %v2912_v53  ;;  %v7209_v53 = vld [vmem:[#allocation37_spill] sm:$0xff] }
 0x6dd   :  { %3149 = vmatprep.mubr.f32.mxu0 %v7054_v20  ;;  %3220 = vmatprep.mubr.f32.mxu1 %v7054_v20 }
 0x6df   :  { %5005 = vmatpush1.bf16.msra.mxu0 %v6168_v56  ;;  %5037 = vmatpush1.bf16.msra.mxu1 %v6172_v58 }
 0x6e0   :  { %5007 = vmatprep.subr.bf16.mxu0 %v6174_v61  ;;  %5039 = vmatprep.subr.bf16.mxu1 %v6177_v5 }
 0x6e3   :  { %v5518_v51 = vpop.eup %5517  ;;  %5009 = vmatpush1.bf16.msra.mxu0 %v6182_v19  ;;  %5041 = vmatpush1.bf16.msra.mxu1 %v7058_v45 }
 0x6e4   :  { %v5520_v60 = vpop.eup %5519  ;;  %v2905_v27 = vmul.f32 0.5, %v5518_v51  ;;  %5011 = vmatprep.subr.bf16.mxu0 %v7085_v14  ;;  %5043 = vmatprep.subr.bf16.mxu1 %v7086_v59  ;;  %v7210_v51 = vld [vmem:[#allocation38_spill] sm:$0xff] }
 0x6e5   :  { %v2909_v8 = vmul.f32 0.5, %v5520_v60  ;;  %v5522_v17 = vpop.eup %5521  ;;  %v7211_v60 = vld [vmem:[#allocation39_spill] sm:$0xff] }
 0x6e6   :  { %v2906_v7 = vadd.f32 0.5, %v2905_v27  ;;  %v5524_v48 = vpop.eup %5523  ;;  %v7212_v27 = vld [vmem:[#allocation40_spill] sm:$0xff] }
 0x6e7   :  { %v2910_v4 = vadd.f32 0.5, %v2909_v8  ;;  %5013 = vmatpush1.bf16.msra.mxu0 %v7061_v52  ;;  %5045 = vmatpush1.bf16.msra.mxu1 %v7062_v24  ;;  %v7213_v8 = vld [vmem:[#allocation41_spill] sm:$0xff] }
 0x6e8   :  { %v2917_v49 = vmul.f32 %v5522_v17, %v2906_v7  ;;  %5015 = vmatprep.subr.bf16.mxu0 %v7063_v2  ;;  %5047 = vmatprep.subr.bf16.mxu1 %v7064_v15  ;;  %v7214_v7 = vld [vmem:[#allocation42_spill] sm:$0xff]  ;;  %v7215_v17 = vld [vmem:[#allocation43_spill] sm:$0xff] }
 0x6e9   :  { %v2916_v38 = vmul.f32 %v2910_v4, %v6676_v55  ;;  %v2914_v55 = vmul.f32 0.5, %v5524_v48  ;;  %v7216_v4 = vld [vmem:[#allocation44_spill] sm:$0xff]  ;;  %v7219_v48 = vld [vmem:[#allocation47_spill] sm:$0xff] }
 0x6eb   :  { %v6760_v54 = vadd.f32 %v2917_v49, %v2916_v38  ;;  %5017 = vmatpush1.bf16.msra.mxu0 %v7065_v32  ;;  %5049 = vmatpush1.bf16.msra.mxu1 %v7066_v26  ;;  %v2915_v50 = vadd.f32 0.5, %v2914_v55  ;;  %v7217_v49 = vld [vmem:[#allocation45_spill] sm:$0xff]  ;;  %v7218_v38 = vld [vmem:[#allocation46_spill] sm:$0xff]  ;;  %v7220_v55 = vld [vmem:[#allocation48_spill] sm:$0xff] }
 0x6ec   :  { %5019 = vmatprep.subr.bf16.mxu0 %v6212_v42  ;;  %5051 = vmatprep.subr.bf16.mxu1 %v7067_v63 }
 0x6ed   :  { %5525 = vtanh.f32 %v6760_v54 }
 0x6ef   :  { %5021 = vmatpush1.bf16.msra.mxu0 %v6218_v62  ;;  %5053 = vmatpush1.bf16.msra.mxu1 %v6222_v0 }
 0x6f0   :  { %5023 = vmatprep.subr.bf16.mxu0 %v6224_v9  ;;  %5055 = vmatprep.subr.bf16.mxu1 %v6227_v29 }
 0x6f3   :  { %5025 = vmatpush1.bf16.msra.mxu0 %v6230_v37  ;;  %5057 = vmatpush1.bf16.msra.mxu1 %v6234_v23 }
 0x6f4   :  { %5027 = vmatprep.subr.bf16.mxu0 %v6236_v39  ;;  %5059 = vmatprep.subr.bf16.mxu1 %v6239_v3 }
 0x6f7   :  { %v5526_v44 = vpop.eup %5525  ;;  %5029 = vmatpush1.bf16.msra.mxu0 %v6242_v13  ;;  %5061 = vmatpush1.bf16.msra.mxu1 %v6246_v12 }
 0x6f8   :  { %v2920_v10 = vmul.f32 %v5526_v44, %v2915_v50  ;;  %5063 = vmatprep.subr.bf16.mxu0 %v6037_v18  ;;  %5095 = vmatprep.subr.bf16.mxu1 %v6039_v21  ;;  %v7202_v18 = vld [vmem:[#allocation30_spill] sm:$0xff]  ;;  %v7203_v21 = vld [vmem:[#allocation31_spill] sm:$0xff]  ;;  %v7221_v50 = vld [vmem:[#allocation49_spill] sm:$0xff] }
 0x6f9   :  { %v7222_v44 = vld [vmem:[#allocation50_spill] sm:$0xff] }
 0x6fa   :  { %3150 = vmatmul.mubr.f32.vlgmr.msra.gmra.mrb[18].mxu0 %v2920_v10  ;;  %3221 = vmatmul.mubr.f32.vlgmr.msra.gmra.mrb[18].mxu1 %v2920_v10  ;;  %v7223_v10 = vld [vmem:[#allocation51_spill] sm:$0xff] }
 0x6fb   :  { %5065 = vmatpush1.bf16.msra.mxu0 %v6041_v25  ;;  %5097 = vmatpush1.bf16.msra.mxu1 %v6044_v28  ;;  %v7205_v25 = vld [vmem:[#allocation33_spill] sm:$0xff]  ;;  %v7206_v28 = vld [vmem:[#allocation34_spill] sm:$0xff] }
 0x6fc   :  { %5067 = vmatprep.subr.bf16.mxu0 %v6048_v31  ;;  %5099 = vmatprep.subr.bf16.mxu1 %v6051_v34  ;;  %v7207_v31 = vld [vmem:[#allocation35_spill] sm:$0xff]  ;;  %v7208_v34 = vld [vmem:[#allocation36_spill] sm:$0xff] }
 0x6fd   :  { %3313 = vmatprep.mubr.f32.mxu0 %v7054_v20  ;;  %3384 = vmatprep.mubr.f32.mxu1 %v7054_v20 }
 0x6ff   :  { %5069 = vmatpush1.bf16.msra.mxu0 %v7200_v47  ;;  %5101 = vmatpush1.bf16.msra.mxu1 %v7201_v57  ;;  %v7224_v47 = vld [vmem:[#allocation52_spill] sm:$0xff]  ;;  %v7225_v57 = vld [vmem:[#allocation53_spill] sm:$0xff] }
 0x700   :  { %5071 = vmatprep.subr.bf16.mxu0 %v7202_v18  ;;  %5103 = vmatprep.subr.bf16.mxu1 %v7203_v21  ;;  %v7226_v18 = vld [vmem:[#allocation54_spill] sm:$0xff]  ;;  %v7227_v21 = vld [vmem:[#allocation55_spill] sm:$0xff] }
 0x703   :  { %5073 = vmatpush1.bf16.msra.mxu0 %v7204_v41  ;;  %5105 = vmatpush1.bf16.msra.mxu1 %v7205_v25 }
 0x704   :  { %5075 = vmatprep.subr.bf16.mxu0 %v7206_v28  ;;  %5107 = vmatprep.subr.bf16.mxu1 %v7207_v31  ;;  %v7228_v28 = vld [vmem:[#allocation66_spill] sm:$0xff] }
 0x707   :  { %5077 = vmatpush1.bf16.msra.mxu0 %v7208_v34  ;;  %5109 = vmatpush1.bf16.msra.mxu1 %v7209_v53 }
 0x708   :  { %5079 = vmatprep.subr.bf16.mxu0 %v7210_v51  ;;  %5111 = vmatprep.subr.bf16.mxu1 %v7211_v60 }
 0x70b   :  { %5081 = vmatpush1.bf16.msra.mxu0 %v7212_v27  ;;  %5113 = vmatpush1.bf16.msra.mxu1 %v7213_v8 }
 0x70c   :  { %5083 = vmatprep.subr.bf16.mxu0 %v7214_v7  ;;  %5115 = vmatprep.subr.bf16.mxu1 %v7215_v17 }
 0x70f   :  { %5085 = vmatpush1.bf16.msra.mxu0 %v7216_v4  ;;  %5117 = vmatpush1.bf16.msra.mxu1 %v7217_v49 }
 0x710   :  { %5087 = vmatprep.subr.bf16.mxu0 %v7218_v38  ;;  %5119 = vmatprep.subr.bf16.mxu1 %v7219_v48 }
 0x713   :  { %5089 = vmatpush1.bf16.msra.mxu0 %v7220_v55  ;;  %5121 = vmatpush1.bf16.msra.mxu1 %v7221_v50 }
 0x714   :  { %5091 = vmatprep.subr.bf16.mxu0 %v7222_v44  ;;  %5123 = vmatprep.subr.bf16.mxu1 %v7223_v10 }
 0x717   :  { %5093 = vmatpush1.bf16.msra.mxu0 %v7224_v47  ;;  %5125 = vmatpush1.bf16.msra.mxu1 %v7225_v57 }
 0x718   :  { %5127 = vmatprep.subr.bf16.mxu0 %v7226_v18  ;;  %5159 = vmatprep.subr.bf16.mxu1 %v7227_v21 }
 0x7ad   :  { %v2987_v41 = vpop.f32.mrb[12].mxu0  ;;  %v3058_v25 = vpop.f32.mrb[12].mxu1 }
 0x7ae   :  { %v5274_v31 = vadd.f32 %v2987_v41, %v7228_v28  ;;  %v2989_v34 = vpop.f32.mrb[13].mxu0  ;;  %v3060_v53 = vpop.f32.mrb[13].mxu1  ;;  %v5290_v8 = vadd.f32 %v3058_v25, %v6297_v6 }
 0x7af   :  { %v5275_v51 = vadd.f32 %v2989_v34, %v7083_v1  ;;  %v5291_v7 = vadd.f32 %v3060_v53, %v6301_v40 }
 0x7b0   :  { %v3067_v60 = vmul.f32 0.5, %v5274_v31 }
 0x7b1   :  { %v3071_v27 = vmul.f32 0.5, %v5275_v51  ;;  %v3076_v17 = vmul.f32 0.5, %v5291_v7 }
 0x7b2   :  { %5527 = vtanh.f32 %v3067_v60 }
 0x7b3   :  { %5529 = vtanh.f32 %v3071_v27 }
 0x7b4   :  { %5531 = vtanh.f32 %v5290_v8 }
 0x7b5   :  { %5533 = vtanh.f32 %v3076_v17 }
 0x7bc   :  { %v5528_v4 = vpop.eup %5527 }
 0x7bd   :  { %v5530_v49 = vpop.eup %5529  ;;  %v3069_v38 = vmul.f32 0.5, %v5528_v4 }
 0x7be   :  { %v3073_v48 = vmul.f32 0.5, %v5530_v49  ;;  %v5532_v50 = vpop.eup %5531 }
 0x7bf   :  { %v3070_v55 = vadd.f32 0.5, %v3069_v38  ;;  %v5534_v18 = vpop.eup %5533 }
 0x7c0   :  { %v3074_v44 = vadd.f32 0.5, %v3073_v48  ;;  %v3078_v21 = vmul.f32 0.5, %v5534_v18  ;;  %v3595_v48 = vld [vmem:[#allocation17 + $0x58] sm:$0xff] }
 0x7c1   :  { %v3081_v10 = vmul.f32 %v5532_v50, %v3070_v55  ;;  %v3596_v50 = vld [vmem:[#allocation17 + $0x60] sm:$0xff]  ;;  %v3599_v18 = vld [vmem:[#allocation17 + $0x78] sm:$0xff] }
 0x7c2   :  { %v3080_v47 = vmul.f32 %v3074_v44, %v6734_v11  ;;  %v3079_v51 = vadd.f32 0.5, %v3078_v21  ;;  %v3597_v44 = vld [vmem:[#allocation17 + $0x68] sm:$0xff] }
 0x7c4   :  { %v6818_v57 = vadd.f32 %v3081_v10, %v3080_v47  ;;  %v5233_v10 = vpack.c.bf16 %v3597_v44, %v3596_v50  ;;  %v3598_v47 = vld [vmem:[#allocation17 + $0x70] sm:$0xff] }
 0x7c5   :  { %v5236_v21 = vpack.c.bf16 %v3599_v18, %v3598_v47 }
 0x7c6   :  { %5535 = vtanh.f32 %v6818_v57 }
 0x7cd   :  { %v3151_v41 = vpop.f32.mrb[18].mxu0  ;;  %v3222_v25 = vpop.f32.mrb[18].mxu1 }
 0x7ce   :  { %v5296_v31 = vadd.f32 %v3151_v41, %v6310_v36  ;;  %v3153_v34 = vpop.f32.mrb[19].mxu0  ;;  %v3224_v53 = vpop.f32.mrb[19].mxu1  ;;  %v5312_v11 = vadd.f32 %v3222_v25, %v6315_v22  ;;  %v3600_v41 = vld [vmem:[#allocation18] sm:$0xff]  ;;  %v3601_v25 = vld [vmem:[#allocation18 + $0x8] sm:$0xff] }
 0x7cf   :  { %v5297_v60 = vadd.f32 %v3153_v34, %v6312_v16  ;;  %v5313_v4 = vadd.f32 %v3224_v53, %v6319_v46  ;;  %v3602_v34 = vld [vmem:[#allocation18 + $0x10] sm:$0xff]  ;;  %v3603_v53 = vld [vmem:[#allocation18 + $0x18] sm:$0xff] }
 0x7d0   :  { %v5536_v27 = vpop.eup %5535  ;;  %v3231_v8 = vmul.f32 0.5, %v5296_v31  ;;  %v5191_v31 = vpack.c.bf16 %v3601_v25, %v3600_v41 }
 0x7d1   :  { %v3084_v7 = vmul.f32 %v5536_v27, %v3079_v51  ;;  %v3235_v17 = vmul.f32 0.5, %v5297_v60  ;;  %v5194_v51 = vpack.c.bf16 %v3603_v53, %v3602_v34  ;;  %v3604_v60 = vld [vmem:[#allocation18 + $0x20] sm:$0xff]  ;;  %v3605_v27 = vld [vmem:[#allocation18 + $0x28] sm:$0xff] }
 0x7d2   :  { %5537 = vtanh.f32 %v3231_v8  ;;  %v5197_v8 = vpack.c.bf16 %v3605_v27, %v3604_v60 }
 0x7d3   :  { %5539 = vtanh.f32 %v3235_v17  ;;  %3314 = vmatmul.mubr.f32.vlgmr.msra.gmra.mrb[14].mxu0 %v3084_v7  ;;  %3385 = vmatmul.mubr.f32.vlgmr.msra.gmra.mrb[14].mxu1 %v3084_v7  ;;  %v3606_v7 = vld [vmem:[#allocation18 + $0x30] sm:$0xff]  ;;  %v3607_v17 = vld [vmem:[#allocation18 + $0x38] sm:$0xff] }
 0x7d4   :  { %5129 = vmatpush1.bf16.msra.mxu0 %v6152_v30  ;;  %5161 = vmatpush1.bf16.msra.mxu1 %v6156_v33  ;;  %5541 = vtanh.f32 %v5312_v11  ;;  %v3240_v30 = vmul.f32 0.5, %v5313_v4  ;;  %v5200_v11 = vpack.c.bf16 %v3607_v17, %v3606_v7  ;;  %v3608_v4 = vld [vmem:[#allocation18 + $0x40] sm:$0xff] }
 0x7d5   :  { %5131 = vmatprep.subr.bf16.mxu0 %v6158_v35  ;;  %5163 = vmatprep.subr.bf16.mxu1 %v6162_v43 }
 0x7d6   :  { %3477 = vmatprep.mubr.f32.mxu0 %v7054_v20  ;;  %3548 = vmatprep.mubr.f32.mxu1 %v7054_v20  ;;  %5543 = vtanh.f32 %v3240_v30  ;;  %v3609_v30 = vld [vmem:[#allocation18 + $0x48] sm:$0xff] }
 0x7d8   :  { %5133 = vmatpush1.bf16.msra.mxu0 %v6168_v56  ;;  %5165 = vmatpush1.bf16.msra.mxu1 %v6172_v58 }
 0x7d9   :  { %5135 = vmatprep.subr.bf16.mxu0 %v6174_v61  ;;  %5167 = vmatprep.subr.bf16.mxu1 %v6177_v5 }
 0x7dc   :  { %v5538_v33 = vpop.eup %5537  ;;  %5137 = vmatpush1.bf16.msra.mxu0 %v6182_v19  ;;  %5169 = vmatpush1.bf16.msra.mxu1 %v7058_v45 }
 0x7dd   :  { %v5540_v35 = vpop.eup %5539  ;;  %v3233_v43 = vmul.f32 0.5, %v5538_v33  ;;  %5139 = vmatprep.subr.bf16.mxu0 %v7085_v14  ;;  %5171 = vmatprep.subr.bf16.mxu1 %v7086_v59  ;;  %v3593_v14 = vld [vmem:[#allocation17 + $0x48] sm:$0xff]  ;;  %v5203_v33 = vpack.c.bf16 %v3609_v30, %v3608_v4 }
 0x7de   :  { %v3237_v49 = vmul.f32 0.5, %v5540_v35  ;;  %v5542_v58 = vpop.eup %5541  ;;  %v3610_v35 = vld [vmem:[#allocation18 + $0x50] sm:$0xff] }
 0x7df   :  { %v3234_v56 = vadd.f32 0.5, %v3233_v43  ;;  %v3611_v43 = vld [vmem:[#allocation18 + $0x58] sm:$0xff] }
 0x7e0   :  { %v3238_v38 = vadd.f32 0.5, %v3237_v49  ;;  %5141 = vmatpush1.bf16.msra.mxu0 %v7061_v52  ;;  %5173 = vmatpush1.bf16.msra.mxu1 %v7062_v24  ;;  %v5544_v45 = vpop.eup %5543  ;;  %v3590_v24 = vld [vmem:[#allocation17 + $0x30] sm:$0xff]  ;;  %v5206_v49 = vpack.c.bf16 %v3611_v43, %v3610_v35  ;;  %v3766_v43 = vld [vmem:[#allocation20 + $0x8] sm:$0xff] }
 0x7e1   :  { %v3245_v61 = vmul.f32 %v5542_v58, %v3234_v56  ;;  %5143 = vmatprep.subr.bf16.mxu0 %v7063_v2  ;;  %5175 = vmatprep.subr.bf16.mxu1 %v7064_v15  ;;  %v3242_v52 = vmul.f32 0.5, %v5544_v45  ;;  %v3591_v2 = vld [vmem:[#allocation17 + $0x38] sm:$0xff]  ;;  %v3612_v56 = vld [vmem:[#allocation18 + $0x60] sm:$0xff]  ;;  %v3613_v58 = vld [vmem:[#allocation18 + $0x68] sm:$0xff] }
 0x7e2   :  { %v3244_v5 = vmul.f32 %v3238_v38, %v6760_v54  ;;  %v5224_v15 = vpack.c.bf16 %v3591_v2, %v3590_v24  ;;  %v3594_v54 = vld [vmem:[#allocation17 + $0x50] sm:$0xff]  ;;  %v5209_v38 = vpack.c.bf16 %v3613_v58, %v3612_v56  ;;  %v3768_v58 = vld [vmem:[#allocation20 + $0x18] sm:$0xff] }
 0x7e3   :  { %v5230_v55 = vpack.c.bf16 %v3595_v48, %v3594_v54 }
 0x7e4   :  { %v6844_v19 = vadd.f32 %v3245_v61, %v3244_v5  ;;  %5145 = vmatpush1.bf16.msra.mxu0 %v7065_v32  ;;  %5177 = vmatpush1.bf16.msra.mxu1 %v7066_v26  ;;  %v5813_v26 = vmov 0.0|0.0   ;;  %v3614_v61 = vld [vmem:[#allocation18 + $0x70] sm:$0xff]  ;;  %v3615_v5 = vld [vmem:[#allocation18 + $0x78] sm:$0xff] }
 0x7e5   :  { %5147 = vmatprep.subr.bf16.mxu0 %v6212_v42  ;;  %5179 = vmatprep.subr.bf16.mxu1 %v7067_v63  ;;  %v3243_v42 = vadd.f32 0.5, %v3242_v52  ;;  %v3592_v63 = vld [vmem:[#allocation17 + $0x40] sm:$0xff]  ;;  %v5212_v45 = vpack.c.bf16 %v3615_v5, %v3614_v61  ;;  %v3770_v61 = vld [vmem:[#allocation20 + $0x28] sm:$0xff] }
 0x7e6   :  { %5545 = vtanh.f32 %v6844_v19  ;;  %v5227_v59 = vpack.c.bf16 %v3593_v14, %v3592_v63 }
 0x7e8   :  { %5149 = vmatpush1.bf16.msra.mxu0 %v6218_v62  ;;  %5181 = vmatpush1.bf16.msra.mxu1 %v6222_v0  ;;  %v3584_v0 = vld [vmem:[#allocation17] sm:$0xff] }
 0x7e9   :  { %5151 = vmatprep.subr.bf16.mxu0 %v6224_v9  ;;  %5183 = vmatprep.subr.bf16.mxu1 %v6227_v29  ;;  %v3585_v9 = vld [vmem:[#allocation17 + $0x8] sm:$0xff] }
 0x7ea   :  { %v5215_v29 = vpack.c.bf16 %v3585_v9, %v3584_v0 }
 0x7ec   :  { %5153 = vmatpush1.bf16.msra.mxu0 %v6230_v37  ;;  %5185 = vmatpush1.bf16.msra.mxu1 %v6234_v23  ;;  %v3586_v37 = vld [vmem:[#allocation17 + $0x10] sm:$0xff]  ;;  %v3587_v23 = vld [vmem:[#allocation17 + $0x18] sm:$0xff] }
 0x7ed   :  { %5155 = vmatprep.subr.bf16.mxu0 %v6236_v39  ;;  %5187 = vmatprep.subr.bf16.mxu1 %v6239_v3  ;;  %v5218_v39 = vpack.c.bf16 %v3587_v23, %v3586_v37  ;;  %v3588_v3 = vld [vmem:[#allocation17 + $0x20] sm:$0xff] }
 0x7f0   :  { %v5546_v32 = vpop.eup %5545  ;;  %5157 = vmatpush1.bf16.msra.mxu0 %v6242_v13  ;;  %5189 = vmatpush1.bf16.msra.mxu1 %v6246_v12  ;;  %v3589_v13 = vld [vmem:[#allocation17 + $0x28] sm:$0xff] }
 0x7f1   :  { %v3248_v62 = vmul.f32 %v5546_v32, %v3243_v42  ;;  %5214 = vmatprep.subr.bf16.mxu1 %v5813_v26  ;;  %5190 = vmatprep.subr.bf16.mxu0 %v5813_v26  ;;  %v5221_v12 = vpack.c.bf16 %v3589_v13, %v3588_v3 }
 0x7f3   :  { %3478 = vmatmul.mubr.f32.vlgmr.msra.gmra.mrb[16].mxu0 %v3248_v62  ;;  %3549 = vmatmul.mubr.f32.vlgmr.msra.gmra.mrb[16].mxu1 %v3248_v62 }
 0x7f4   :  { %5216 = vmatpush3.bf16.msra.mxu1 %v5215_v29  ;;  %4000 = vmatprep.mubr.msk.f32.mxu1 %vm5814_vm0, %v7054_v20 }
 0x7f5   :  { %5217 = vmatprep.subr.bf16.mxu1 %v5813_v26  ;;  %3965 = vmatprep.mubr.msk.f32.mxu0 %vm5814_vm0, %v7054_v20 }
 0x7f6   :  { %5192 = vmatpush3.bf16.msra.mxu0 %v5191_v31 }
 0x7f7   :  { %5193 = vmatprep.subr.bf16.mxu0 %v5813_v26 }
 0x7f8   :  { %5219 = vmatpush3.bf16.msra.mxu1 %v5218_v39 }
 0x7f9   :  { %5220 = vmatprep.subr.bf16.mxu1 %v5813_v26 }
 0x7fa   :  { %5195 = vmatpush3.bf16.msra.mxu0 %v5194_v51 }
 0x7fb   :  { %5196 = vmatprep.subr.bf16.mxu0 %v5813_v26 }
 0x7fc   :  { %5222 = vmatpush3.bf16.msra.mxu1 %v5221_v12 }
 0x7fd   :  { %5223 = vmatprep.subr.bf16.mxu1 %v5813_v26 }
 0x7fe   :  { %5198 = vmatpush3.bf16.msra.mxu0 %v5197_v8 }
 0x7ff   :  { %5199 = vmatprep.subr.bf16.mxu0 %v5813_v26 }
 0x800   :  { %5225 = vmatpush3.bf16.msra.mxu1 %v5224_v15 }
 0x801   :  { %5226 = vmatprep.subr.bf16.mxu1 %v5813_v26 }
 0x802   :  { %5201 = vmatpush3.bf16.msra.mxu0 %v5200_v11 }
 0x803   :  { %5202 = vmatprep.subr.bf16.mxu0 %v5813_v26 }
 0x804   :  { %5228 = vmatpush3.bf16.msra.mxu1 %v5227_v59 }
 0x805   :  { %5229 = vmatprep.subr.bf16.mxu1 %v5813_v26 }
 0x806   :  { %5204 = vmatpush3.bf16.msra.mxu0 %v5203_v33 }
 0x807   :  { %5205 = vmatprep.subr.bf16.mxu0 %v5813_v26 }
 0x808   :  { %5231 = vmatpush3.bf16.msra.mxu1 %v5230_v55 }
 0x809   :  { %5232 = vmatprep.subr.bf16.mxu1 %v5813_v26 }
 0x80a   :  { %5207 = vmatpush3.bf16.msra.mxu0 %v5206_v49  ;;  %v3767_v49 = vld [vmem:[#allocation20 + $0x10] sm:$0xff] }
 0x80b   :  { %5208 = vmatprep.subr.bf16.mxu0 %v5813_v26 }
 0x80c   :  { %5234 = vmatpush3.bf16.msra.mxu1 %v5233_v10 }
 0x80d   :  { %5235 = vmatprep.subr.bf16.mxu1 %v5813_v26 }
 0x80e   :  { %5210 = vmatpush3.bf16.msra.mxu0 %v5209_v38  ;;  %v5242_v38 = vpack.c.bf16 %v3768_v58, %v3767_v49 }
 0x80f   :  { %5211 = vmatprep.subr.bf16.mxu0 %v5813_v26 }
 0x810   :  { %5237 = vmatpush3.bf16.msra.mxu1 %v5236_v21 }
 0x812   :  { %5213 = vmatpush3.bf16.msra.mxu0 %v5212_v45  ;;  %v3771_v45 = vld [vmem:[#allocation20 + $0x30] sm:$0xff] }
 0x813   :  { %5238 = vmatprep.subr.bf16.mxu0 %v5813_v26 }
 0x8a6   :  { %v3315_v52 = vpop.f32.mrb[14].mxu0  ;;  %v3386_v42 = vpop.f32.mrb[14].mxu1 }
 0x8a7   :  { %v5276_v32 = vadd.f32 %v3315_v52, %v7228_v28  ;;  %v3317_v62 = vpop.f32.mrb[15].mxu0  ;;  %v3388_v0 = vpop.f32.mrb[15].mxu1  ;;  %v5292_v23 = vadd.f32 %v3386_v42, %v6297_v6  ;;  %v3772_v52 = vld [vmem:[#allocation20 + $0x38] sm:$0xff] }
 0x8a8   :  { %v5277_v9 = vadd.f32 %v3317_v62, %v7083_v1  ;;  %v5293_v39 = vadd.f32 %v3388_v0, %v6301_v40  ;;  %v5248_v42 = vpack.c.bf16 %v3772_v52, %v3771_v45  ;;  %v3775_v0 = vld [vmem:[#allocation20 + $0x50] sm:$0xff] }
 0x8a9   :  { %v3395_v29 = vmul.f32 0.5, %v5276_v32  ;;  %v3774_v32 = vld [vmem:[#allocation20 + $0x48] sm:$0xff] }
 0x8aa   :  { %v3399_v37 = vmul.f32 0.5, %v5277_v9  ;;  %v3404_v3 = vmul.f32 0.5, %v5293_v39  ;;  %v3776_v9 = vld [vmem:[#allocation20 + $0x58] sm:$0xff] }
 0x8ab   :  { %5547 = vtanh.f32 %v3395_v29  ;;  %v5254_v29 = vpack.c.bf16 %v3776_v9, %v3775_v0 }
 0x8ac   :  { %5549 = vtanh.f32 %v3399_v37  ;;  %v3777_v37 = vld [vmem:[#allocation20 + $0x60] sm:$0xff] }
 0x8ad   :  { %5551 = vtanh.f32 %v5292_v23  ;;  %v3778_v23 = vld [vmem:[#allocation20 + $0x68] sm:$0xff] }
 0x8ae   :  { %5553 = vtanh.f32 %v3404_v3  ;;  %v5257_v39 = vpack.c.bf16 %v3778_v23, %v3777_v37  ;;  %v3779_v3 = vld [vmem:[#allocation20 + $0x70] sm:$0xff] }
 0x8b5   :  { %v5548_v13 = vpop.eup %5547 }
 0x8b6   :  { %v5550_v12 = vpop.eup %5549  ;;  %v3397_v24 = vmul.f32 0.5, %v5548_v13  ;;  %v3780_v13 = vld [vmem:[#allocation20 + $0x78] sm:$0xff] }
 0x8b7   :  { %v3401_v2 = vmul.f32 0.5, %v5550_v12  ;;  %v5552_v15 = vpop.eup %5551  ;;  %v5260_v12 = vpack.c.bf16 %v3780_v13, %v3779_v3 }
 0x8b8   :  { %v3398_v28 = vadd.f32 0.5, %v3397_v24  ;;  %v5554_v54 = vpop.eup %5553 }
 0x8b9   :  { %v3402_v63 = vadd.f32 0.5, %v3401_v2  ;;  %v3406_v6 = vmul.f32 0.5, %v5554_v54 }
 0x8ba   :  { %v3409_v14 = vmul.f32 %v5552_v15, %v3398_v28  ;;  %v3880_v15 = vld [vmem:[%s6929_s10] ss:$0 sm:$0xff] }
 0x8bb   :  { %v3408_v1 = vmul.f32 %v3402_v63, %v6818_v57  ;;  %v3407_v10 = vadd.f32 0.5, %v3406_v6 }
 0x8bd   :  { %v3410_v59 = vadd.f32 %v3409_v14, %v3408_v1 }
 0x8bf   :  { %5555 = vtanh.f32 %v3410_v59 }
 0x8c6   :  { %v3479_v48 = vpop.f32.mrb[16].mxu0  ;;  %v3550_v55 = vpop.f32.mrb[16].mxu1 }
 0x8c7   :  { %v5294_v40 = vadd.f32 %v3479_v48, %v6310_v36  ;;  %v3481_v50 = vpop.f32.mrb[17].mxu0  ;;  %v3552_v44 = vpop.f32.mrb[17].mxu1  ;;  %v5310_v57 = vadd.f32 %v3550_v55, %v6315_v22 }
 0x8c8   :  { %v5295_v47 = vadd.f32 %v3481_v50, %v6312_v16  ;;  %v5311_v31 = vadd.f32 %v3552_v44, %v6319_v46  ;;  %v3765_v46 = vld [vmem:[#allocation20] sm:$0xff] }
 0x8c9   :  { %v5556_v18 = vpop.eup %5555  ;;  %v3559_v21 = vmul.f32 0.5, %v5294_v40  ;;  %v5239_v56 = vpack.c.bf16 %v3766_v43, %v3765_v46 }
 0x8ca   :  { %v3412_v41 = vmul.f32 %v5556_v18, %v3407_v10  ;;  %v3563_v25 = vmul.f32 0.5, %v5295_v47  ;;  %v3568_v34 = vmul.f32 0.5, %v5311_v31 }
 0x8cb   :  { %5557 = vtanh.f32 %v3559_v21 }
 0x8cc   :  { %5559 = vtanh.f32 %v3563_v25  ;;  %4001 = vmatmul.mubr.f32.vlgmr.msra.gmra.mrb[32].mxu1 %v3412_v41 }
 0x8cd   :  { %5561 = vtanh.f32 %v5310_v57 }
 0x8ce   :  { %5563 = vtanh.f32 %v3568_v34 }
 0x8d5   :  { %v5558_v53 = vpop.eup %5557 }
 0x8d6   :  { %v5560_v36 = vpop.eup %5559  ;;  %v3561_v51 = vmul.f32 0.5, %v5558_v53 }
 0x8d7   :  { %v3565_v60 = vmul.f32 0.5, %v5560_v36  ;;  %v5562_v16 = vpop.eup %5561 }
 0x8d8   :  { %v3562_v27 = vadd.f32 0.5, %v3561_v51  ;;  %v5564_v22 = vpop.eup %5563 }
 0x8d9   :  { %v3566_v8 = vadd.f32 0.5, %v3565_v60  ;;  %v3570_v4 = vmul.f32 0.5, %v5564_v22 }
 0x8da   :  { %v3573_v7 = vmul.f32 %v5562_v16, %v3562_v27 }
 0x8db   :  { %v3572_v17 = vmul.f32 %v3566_v8, %v6844_v19  ;;  %v3571_v30 = vadd.f32 0.5, %v3570_v4  ;;  %v3769_v19 = vld [vmem:[#allocation20 + $0x20] sm:$0xff] }
 0x8dc   :  { %v5245_v5 = vpack.c.bf16 %v3770_v61, %v3769_v19 }
 0x8dd   :  { %v3574_v11 = vadd.f32 %v3573_v7, %v3572_v17 }
 0x8df   :  { %5565 = vtanh.f32 %v3574_v11 }
 0x8e9   :  { %v5566_v33 = vpop.eup %5565 }
 0x8ea   :  { %v3576_v35 = vmul.f32 %v5566_v33, %v3571_v30 }
 0x8ec   :  { %3966 = vmatmul.mubr.f32.vlgmr.msra.gmra.mrb[32].mxu0 %v3576_v35 }
 0x8ed   :  { %4035 = vmatprep.mubr.msk.f32.mxu0 %vm5814_vm0, %v7054_v20  ;;  %5240 = vmatpush3.bf16.msra.mxu0 %v5239_v56  ;;  %v3773_v20 = vld [vmem:[#allocation20 + $0x40] sm:$0xff] }
 0x8ee   :  { %5241 = vmatprep.subr.bf16.mxu0 %v5813_v26  ;;  %v5251_v62 = vpack.c.bf16 %v3774_v32, %v3773_v20 }
 0x8f1   :  { %5243 = vmatpush3.bf16.msra.mxu0 %v5242_v38 }
 0x8f2   :  { %5244 = vmatprep.subr.bf16.mxu0 %v5813_v26 }
 0x8f5   :  { %5246 = vmatpush3.bf16.msra.mxu0 %v5245_v5 }
 0x8f6   :  { %5247 = vmatprep.subr.bf16.mxu0 %v5813_v26 }
 0x8f9   :  { %5249 = vmatpush3.bf16.msra.mxu0 %v5248_v42 }
 0x8fa   :  { %5250 = vmatprep.subr.bf16.mxu0 %v5813_v26 }
 0x8fd   :  { %5252 = vmatpush3.bf16.msra.mxu0 %v5251_v62 }
 0x8fe   :  { %5253 = vmatprep.subr.bf16.mxu0 %v5813_v26 }
 0x901   :  { %5255 = vmatpush3.bf16.msra.mxu0 %v5254_v29 }
 0x902   :  { %5256 = vmatprep.subr.bf16.mxu0 %v5813_v26 }
 0x905   :  { %5258 = vmatpush3.bf16.msra.mxu0 %v5257_v39 }
 0x906   :  { %5259 = vmatprep.subr.bf16.mxu0 %v5813_v26  ;;  %v3881_v26 = vld [vmem:[%s6931_s12] ss:$0 sm:$0xff] }
 0x909   :  { %5261 = vmatpush3.bf16.msra.mxu0 %v5260_v12 }
 0x99f   :  { %v3752_v24 = vpop.f32.mrb[32].mxu1 }
 0x9a0   :  { %v4002_v2 = vpop.f32.mrb[33].mxu1 }
 0x9bf   :  { %v3682_v28 = vpop.f32.mrb[32].mxu0 }
 0x9c0   :  { %v3753_v63 = vadd.f32 %v3752_v24, %v3682_v28  ;;  %v3967_v14 = vpop.f32.mrb[33].mxu0 }
 0x9c2   :  { %v3763_v1 = vadd.f32 %v3880_v15, %v3753_v63 }
 0x9c4   :  { %v3764_v59 = vmax.f32 %v3763_v1, 0.0 }
 0x9c6   :  { %4036 = vmatmul.mubr.f32.vlgmr.msra.gmra.mrb[34].mxu0 %v3764_v59 }
 0xa99   :  { %v3854_v54 = vpop.f32.mrb[34].mxu0 }
 0xa9a   :  { %v3855_v6 = vadd.f32 %v3881_v26, %v3854_v54  ;;  %v4037_v48 = vpop.f32.mrb[35].mxu0 }
 0xa9c   :  { %3858 = vst [vmem:[#allocation21] sm:$0xff] %v3855_v6 }
 0xa9d   :  { %5776 = shalt.err (!%p5773_p6)
}
 0xa9e   :  { %s5777_s27 = scalar_lea.hbm %s6932_s13, 128 }
 0xa9f   :  { %p5778_p7 = scmp.ne.s32.totalorder %s6932_s13, %s5777_s27  ;;  %p5781_p8 = scmp.lt.u32.totalorder %s5777_s27, %s6932_s13 }
 0xaa1   :  { %p5783_p9 = pnand %p5781_p8, %p5778_p7 }
 0xaa3   :  { %5786 = shalt.err (!%p5783_p9)
}
 0xaa4   :  { %3868 = dma.vmem_to_hbm [thread:$0]  %s3866_s0, 128, %s6932_s13, [#allocation8]  }
 0xaa5   :  { %5797 = dma.done.wait [#allocation8], 128  }
 0xaa6   :  { %5798 = vsyncadd [#allocation8], 4294967168 }
 0xaa7   :  { %3872 = vsyncpa [#allocation7], 1 }
 0xaa8   :  { %3873 = vsyncpa [#allocation10], 1 }
 0xaa9   :  { %3874 = vsyncpa [#allocation13], 1 }
 0xaaa   :  { %3875 = vsyncpa [#allocation16], 1 }
 0xaab   :  { %3876 = vsyncpa [#allocation19], 1 }
 0xaac   :  { %3877 = vsyncpa [#allocation8], 1 }

</bundles_post_ra>
